<compile_context>
chip_gen: v7x
topology: tpu7x:2x2x1
jax: 0.10.0
libtpu: 0.0.40
codegen_flags: <defaults>
</compile_context>

<pallas_src>
import functools

import jax
import jax.numpy as jnp
import numpy as np
from jax import lax
from jax.experimental import pallas as pl
from jax.experimental.pallas import tpu as pltpu

HIDDEN = 256
BATCH_BLOCK = 8        # sublane multiple -> unmasked vregs
TARGET_CHUNK = 128     # timesteps per grid step (balanced-chunk target)


def _round_up(x, m):
    return (x + m - 1) // m * m


def _lstm_classifier_kernel(x_ref, wih_ref, whh_ref, b_ref, wout_ref, bout_ref,
                            out_ref, h_sc, c_sc, gx_sc, *,
                            seq_len, t_chunk, seq_pad):
    """One grid step = one 8-row batch block x one chunk of `t_chunk` steps.

    x_ref    : (t_chunk * 8, I) bf16   time-major rows for this (b, chunk)
    wih_ref  : (I, 4H) bf16    whh_ref : (H, 4H) bf16    b_ref : (1, 4H) f32
    wout_ref : (H, O_pad) bf16 bout_ref: (1, O_pad) f32
    out_ref  : (8, O_pad) f32
    h_sc/c_sc: (8, H) f32  persistent LSTM state (per-core VMEM scratch)
    gx_sc    : (t_chunk * 8, 4H) f32  staged input-projection gates
    """
    c_idx = pl.program_id(1)
    n_chunks = pl.num_programs(1)
    H = h_sc.shape[1]
    Bb = h_sc.shape[0]

    @pl.when(c_idx == 0)
    def _init():
        h_sc[...] = jnp.zeros_like(h_sc)
        c_sc[...] = jnp.zeros_like(c_sc)

    # ---- (1) Input projection for the whole chunk: one tall MXU matmul
    #          (bf16 operands, f32 accumulate); bias broadcast hoisted out of
    #          the recurrent loop.
    gx_sc[...] = (
        jnp.dot(x_ref[...], wih_ref[...], preferred_element_type=jnp.float32)
        + b_ref[...])

    # ---- (2) Serial recurrence over the chunk.
    whh = whh_ref[...]                     # (H, 4H) bf16, hoisted load
    mask_tail = (seq_pad != seq_len)       # static; only when T was padded

    def step(t, h, c, gx_t):
        # h cast to bf16 at the dot only; state / gate math stay f32.
        g = gx_t + jnp.dot(h.astype(jnp.bfloat16), whh,
                           preferred_element_type=jnp.float32)     # (Bb, 4H)
        i_g = jax.nn.sigmoid(g[:, 0 * H:1 * H])
        f_g = jax.nn.sigmoid(g[:, 1 * H:2 * H])
        g_g = jnp.tanh(g[:, 2 * H:3 * H])
        o_g = jax.nn.sigmoid(g[:, 3 * H:4 * H])
        c_new = f_g * c + i_g * g_g
        h_new = o_g * jnp.tanh(c_new)
        if mask_tail:
            valid = (c_idx * t_chunk + t) < seq_len
            h_new = jnp.where(valid, h_new, h)
            c_new = jnp.where(valid, c_new, c)
        return h_new, c_new

    h = h_sc[...]
    c = c_sc[...]
    if t_chunk <= 32:
        # Fully unrolled: static slices, maximal LLO overlap of MXU/EUP/VPU.
        for t in range(t_chunk):
            h, c = step(t, h, c, gx_sc[t * Bb:(t + 1) * Bb, :])
    else:
        # Partial unroll: bounds vreg live ranges at large chunk sizes.
        def body(t, carry):
            hh, cc = carry
            row = pl.multiple_of(t * Bb, Bb)
            return step(t, hh, cc, gx_sc[pl.ds(row, Bb), :])
        h, c = lax.fori_loop(0, t_chunk, body, (h, c), unroll=8)

    h_sc[...] = h
    c_sc[...] = c

    # ---- (3) Classifier head on the final hidden state (last chunk only).
    @pl.when(c_idx == n_chunks - 1)
    def _head():
        hr = jnp.maximum(h, 0.0).astype(jnp.bfloat16)              # ReLU
        logits = jnp.dot(hr, wout_ref[...],
                         preferred_element_type=jnp.float32) + bout_ref[...]
        out_ref[...] = logits.astype(out_ref.dtype)


@jax.jit
def classifier_forward(inputs, w_ih, w_hh, b_ih, b_hh, w_out, b_out):
    """inputs: (B, T, I) float32 (batch_first, like PyTorch)."""
    B, T, I = inputs.shape
    O = w_out.shape[0]
    H = HIDDEN
    Bb = BATCH_BLOCK

    n_b = pl.cdiv(B, Bb)                       # batch blocks ("parallel" axis)
    Bp = n_b * Bb
    Op = _round_up(max(O, 1), 128)             # lane-dense head matmul / store

    n_chunks = pl.cdiv(T, TARGET_CHUNK)        # balanced chunks: minimal tail
    Tc = pl.cdiv(T, n_chunks)
    Tp = n_chunks * Tc

    # Pad and relayout to (n_b * Tp * Bb, I): time-major inside each 8-row
    # batch block, so the chunk projection is one tall contiguous matmul.
    x = inputs.astype(jnp.bfloat16)
    x = jnp.pad(x, ((0, Bp - B), (0, Tp - T), (0, 0)))
    x = x.reshape(n_b, Bb, Tp, I).transpose(0, 2, 1, 3).reshape(n_b * Tp * Bb, I)

    w_ih_t = w_ih.T.astype(jnp.bfloat16)                            # (I, 4H)
    w_hh_t = w_hh.T.astype(jnp.bfloat16)                            # (H, 4H)
    bias = (b_ih + b_hh).reshape(1, 4 * H).astype(jnp.float32)      # (1, 4H)
    w_out_t = jnp.zeros((H, Op), jnp.bfloat16).at[:, :O].set(
        w_out.T.astype(jnp.bfloat16))                               # (H, Op)
    b_out_p = jnp.zeros((1, Op), jnp.float32).at[:, :O].set(
        b_out.reshape(1, O).astype(jnp.float32))                    # (1, Op)

    kernel = functools.partial(_lstm_classifier_kernel,
                               seq_len=T, t_chunk=Tc, seq_pad=Tp)

    # Explicit scoped-VMEM budget: double-buffered inputs/output + scratch.
    bytes_x = 2 * (Tc * Bb * I) * 2
    bytes_w = 2 * ((I * 4 * H) * 2 + (H * 4 * H) * 2 + (4 * H) * 4
                   + (H * Op) * 2 + Op * 4)
    bytes_out = 2 * Bb * Op * 4
    bytes_scr = (Tc * Bb * 4 * H) * 4 + 2 * Bb * H * 4
    vmem_budget = int(min(bytes_x + bytes_w + bytes_out + bytes_scr + (4 << 20),
                          100 << 20))

    grid_spec = pltpu.PrefetchScalarGridSpec(
        num_scalar_prefetch=0,
        grid=(n_b, n_chunks),
        in_specs=[
            pl.BlockSpec((Tc * Bb, I), lambda b, c: (b * n_chunks + c, 0)),
            pl.BlockSpec((I, 4 * H), lambda b, c: (0, 0)),          # W_ih^T
            pl.BlockSpec((H, 4 * H), lambda b, c: (0, 0)),          # W_hh^T
            pl.BlockSpec((1, 4 * H), lambda b, c: (0, 0)),          # bias
            pl.BlockSpec((H, Op), lambda b, c: (0, 0)),             # W_out^T
            pl.BlockSpec((1, Op), lambda b, c: (0, 0)),             # b_out
        ],
        out_specs=pl.BlockSpec((Bb, Op), lambda b, c: (b, 0)),
        scratch_shapes=[
            pltpu.VMEM((Bb, H), jnp.float32),                       # h state
            pltpu.VMEM((Bb, H), jnp.float32),                       # c state
            pltpu.VMEM((Tc * Bb, 4 * H), jnp.float32),              # gates_x
        ],
    )

    out = pl.pallas_call(
        kernel,
        out_shape=jax.ShapeDtypeStruct((Bp, Op), jnp.float32),
        grid_spec=grid_spec,
        compiler_params=pltpu.CompilerParams(
            dimension_semantics=("parallel", "arbitrary"),
            vmem_limit_bytes=vmem_budget),
    )(x, w_ih_t, w_hh_t, bias, w_out_t, b_out_p)

    return out[:B, :O]


def _reference_forward(inputs, w_ih, w_hh, b_ih, b_hh, w_out, b_out):
    """Pure-JAX f32 reference reproducing nn.LSTM (gate order i,f,g,o) + head."""
    B, T, I = inputs.shape
    h = jnp.zeros((B, HIDDEN), jnp.float32)
    c = jnp.zeros((B, HIDDEN), jnp.float32)
    for t in range(T):
        x_t = inputs[:, t, :]
        gates = x_t @ w_ih.T + b_ih + h @ w_hh.T + b_hh
        i_g = jax.nn.sigmoid(gates[:, 0 * HIDDEN:1 * HIDDEN])
        f_g = jax.nn.sigmoid(gates[:, 1 * HIDDEN:2 * HIDDEN])
        g_g = jnp.tanh(gates[:, 2 * HIDDEN:3 * HIDDEN])
        o_g = jax.nn.sigmoid(gates[:, 3 * HIDDEN:4 * HIDDEN])
        c = f_g * c + i_g * g_g
        h = o_g * jnp.tanh(c)
    return jnp.maximum(h, 0.0) @ w_out.T + b_out


if __name__ == "__main__":
    # Small, forward-consistent shapes: batch=2, seq=8, input_size=32, output=16.
    B, T, I, O = 2, 8, 32, 16

    key = jax.random.PRNGKey(0)
    k_x, k1, k2, k3, k4, k5, k6 = jax.random.split(key, 7)

    inputs = jax.random.normal(k_x, (B, T, I), dtype=jnp.float32)

    # Deterministic synthetic parameters (PyTorch nn.LSTM / nn.Linear shapes).
    s = 1.0 / np.sqrt(HIDDEN)
    w_ih = jax.random.uniform(k1, (4 * HIDDEN, I), jnp.float32, -s, s)
    w_hh = jax.random.uniform(k2, (4 * HIDDEN, HIDDEN), jnp.float32, -s, s)
    b_ih = jax.random.uniform(k3, (4 * HIDDEN,), jnp.float32, -s, s)
    b_hh = jax.random.uniform(k4, (4 * HIDDEN,), jnp.float32, -s, s)
    w_out = jax.random.uniform(k5, (O, HIDDEN), jnp.float32, -s, s)
    b_out = jax.random.uniform(k6, (O,), jnp.float32, -s, s)

    logits = classifier_forward(inputs, w_ih, w_hh, b_ih, b_hh, w_out, b_out)
    jax.block_until_ready(logits)

    ref = _reference_forward(inputs, w_ih, w_hh, b_ih, b_hh, w_out, b_out)
    # bf16 weights with f32 accumulation vs. pure-f32 reference: loosen tol.
    np.testing.assert_allclose(np.asarray(logits), np.asarray(ref),
                               rtol=2e-2, atol=2e-2)
    print("KERNEL_OK")
</pallas_src>

<mosaic_0001>
module attributes {stable_mosaic.version = 11 : i64} {
  func.func @_lstm_classifier_kernel(%arg0: i32, %arg1: i32, %arg2: memref<64x32xbf16, #tpu.memory_space<vmem>>, %arg3: memref<32x1024xbf16, #tpu.memory_space<vmem>>, %arg4: memref<256x1024xbf16, #tpu.memory_space<vmem>>, %arg5: memref<1x1024xf32, #tpu.memory_space<vmem>>, %arg6: memref<256x128xbf16, #tpu.memory_space<vmem>>, %arg7: memref<1x128xf32, #tpu.memory_space<vmem>>, %arg8: memref<8x128xf32, #tpu.memory_space<vmem>>, %arg9: memref<8x256xf32, #tpu.memory_space<vmem>>, %arg10: memref<8x256xf32, #tpu.memory_space<vmem>>, %arg11: memref<64x1024xf32, #tpu.memory_space<vmem>>) attributes {dimension_semantics = [#tpu.dimension_semantics<parallel>, #tpu.dimension_semantics<arbitrary>], iteration_bounds = array<i64: 1, 1>, scalar_prefetch = 0 : i64, scratch_operands = 3 : i64, tpu.core_type = #tpu.core_type<tc>, window_params = [{transform_indices = @transform_0, window_bounds = array<i64: 64, 32>}, {pipeline_mode = #tpu.pipeline_mode<synchronous>, transform_indices = @transform_1, window_bounds = array<i64: 32, 1024>}, {pipeline_mode = #tpu.pipeline_mode<synchronous>, transform_indices = @transform_2, window_bounds = array<i64: 256, 1024>}, {pipeline_mode = #tpu.pipeline_mode<synchronous>, transform_indices = @transform_3, window_bounds = array<i64: 1, 1024>}, {pipeline_mode = #tpu.pipeline_mode<synchronous>, transform_indices = @transform_4, window_bounds = array<i64: 256, 128>}, {pipeline_mode = #tpu.pipeline_mode<synchronous>, transform_indices = @transform_5, window_bounds = array<i64: 1, 128>}, {transform_indices = @transform_6, window_bounds = array<i64: 8, 128>}]} {
    %c0_i32 = arith.constant 0 : i32
    %0 = arith.cmpi eq, %arg1, %c0_i32 : i32
    %1 = arith.extui %0 : i1 to i32
    %c0_i32_0 = arith.constant 0 : i32
    %2 = arith.cmpi ne, %1, %c0_i32_0 : i32
    scf.if %2 {
      %cst_61 = arith.constant 0.000000e+00 : f32
      %250 = vector.broadcast %cst_61 : f32 to vector<8x256xf32>
      %c0_62 = arith.constant 0 : index
      %c0_63 = arith.constant 0 : index
      %251 = vector.load %arg9[%c0_62, %c0_63] : memref<8x256xf32, #tpu.memory_space<vmem>>, vector<8x256xf32>
      tpu.vector_store %arg9[%c0_62, %c0_63], %250 {strides = array<i32>} : memref<8x256xf32, #tpu.memory_space<vmem>>, vector<8x256xf32>,
      %cst_64 = arith.constant 0.000000e+00 : f32
      %252 = vector.broadcast %cst_64 : f32 to vector<8x256xf32>
      %c0_65 = arith.constant 0 : index
      %c0_66 = arith.constant 0 : index
      %253 = vector.load %arg10[%c0_65, %c0_66] : memref<8x256xf32, #tpu.memory_space<vmem>>, vector<8x256xf32>
      tpu.vector_store %arg10[%c0_65, %c0_66], %252 {strides = array<i32>} : memref<8x256xf32, #tpu.memory_space<vmem>>, vector<8x256xf32>,
    } else {
    }
    %c0 = arith.constant 0 : index
    %c0_1 = arith.constant 0 : index
    %3 = vector.load %arg2[%c0, %c0_1] : memref<64x32xbf16, #tpu.memory_space<vmem>>, vector<64x32xbf16>
    %c0_2 = arith.constant 0 : index
    %c0_3 = arith.constant 0 : index
    %4 = vector.load %arg3[%c0_2, %c0_3] : memref<32x1024xbf16, #tpu.memory_space<vmem>>, vector<32x1024xbf16>
    %cst = arith.constant dense<0.000000e+00> : vector<64x1024xf32>
    %5 = tpu.matmul %3, %4, %cst {dimension_numbers = #tpu.dot_dimension_numbers<[1], [0], [0], [1], [0, 0, 1, 1], [], []>} : vector<64x32xbf16>, vector<32x1024xbf16>, vector<64x1024xf32> -> vector<64x1024xf32>
    %c0_4 = arith.constant 0 : index
    %c0_5 = arith.constant 0 : index
    %6 = vector.load %arg5[%c0_4, %c0_5] : memref<1x1024xf32, #tpu.memory_space<vmem>>, vector<1x1024xf32>
    %7 = vector.broadcast %6 : vector<1x1024xf32> to vector<64x1024xf32>
    %8 = arith.addf %5, %7 : vector<64x1024xf32>
    %c0_6 = arith.constant 0 : index
    %c0_7 = arith.constant 0 : index
    %9 = vector.load %arg11[%c0_6, %c0_7] : memref<64x1024xf32, #tpu.memory_space<vmem>>, vector<64x1024xf32>
    tpu.vector_store %arg11[%c0_6, %c0_7], %8 {strides = array<i32>} : memref<64x1024xf32, #tpu.memory_space<vmem>>, vector<64x1024xf32>,
    %c0_8 = arith.constant 0 : index
    %c0_9 = arith.constant 0 : index
    %10 = vector.load %arg4[%c0_8, %c0_9] : memref<256x1024xbf16, #tpu.memory_space<vmem>>, vector<256x1024xbf16>
    %c0_10 = arith.constant 0 : index
    %c0_11 = arith.constant 0 : index
    %11 = vector.load %arg9[%c0_10, %c0_11] : memref<8x256xf32, #tpu.memory_space<vmem>>, vector<8x256xf32>
    %c0_12 = arith.constant 0 : index
    %c0_13 = arith.constant 0 : index
    %12 = vector.load %arg10[%c0_12, %c0_13] : memref<8x256xf32, #tpu.memory_space<vmem>>, vector<8x256xf32>
    %c0_14 = arith.constant 0 : index
    %c0_15 = arith.constant 0 : index
    %13 = vector.load %arg11[%c0_14, %c0_15] : memref<64x1024xf32, #tpu.memory_space<vmem>>, vector<8x1024xf32>
    %14 = arith.truncf %11 : vector<8x256xf32> to vector<8x256xbf16>
    %cst_16 = arith.constant dense<0.000000e+00> : vector<8x1024xf32>
    %15 = tpu.matmul %14, %10, %cst_16 {dimension_numbers = #tpu.dot_dimension_numbers<[1], [0], [0], [1], [0, 0, 1, 1], [], []>} : vector<8x256xbf16>, vector<256x1024xbf16>, vector<8x1024xf32> -> vector<8x1024xf32>
    %16 = arith.addf %13, %15 : vector<8x1024xf32>
    %17 = vector.extract_strided_slice %16 {offsets = [0, 0], sizes = [8, 256], strides = [1, 1]} : vector<8x1024xf32> to vector<8x256xf32>
    %18 = arith.negf %17 : vector<8x256xf32>
    %19 = math.exp %18 : vector<8x256xf32>
    %cst_17 = arith.constant 1.000000e+00 : f32
    %20 = vector.broadcast %cst_17 : f32 to vector<8x256xf32>
    %21 = arith.addf %20, %19 : vector<8x256xf32>
    %22 = arith.divf %20, %21 : vector<8x256xf32>
    %23 = vector.extract_strided_slice %16 {offsets = [0, 256], sizes = [8, 256], strides = [1, 1]} : vector<8x1024xf32> to vector<8x256xf32>
    %24 = arith.negf %23 : vector<8x256xf32>
    %25 = math.exp %24 : vector<8x256xf32>
    %cst_18 = arith.constant 1.000000e+00 : f32
    %26 = vector.broadcast %cst_18 : f32 to vector<8x256xf32>
    %27 = arith.addf %26, %25 : vector<8x256xf32>
    %28 = arith.divf %26, %27 : vector<8x256xf32>
    %29 = vector.extract_strided_slice %16 {offsets = [0, 512], sizes = [8, 256], strides = [1, 1]} : vector<8x1024xf32> to vector<8x256xf32>
    %30 = math.tanh %29 : vector<8x256xf32>
    %31 = vector.extract_strided_slice %16 {offsets = [0, 768], sizes = [8, 256], strides = [1, 1]} : vector<8x1024xf32> to vector<8x256xf32>
    %32 = arith.negf %31 : vector<8x256xf32>
    %33 = math.exp %32 : vector<8x256xf32>
    %cst_19 = arith.constant 1.000000e+00 : f32
    %34 = vector.broadcast %cst_19 : f32 to vector<8x256xf32>
    %35 = arith.addf %34, %33 : vector<8x256xf32>
    %36 = arith.divf %34, %35 : vector<8x256xf32>
    %37 = arith.mulf %28, %12 : vector<8x256xf32>
    %38 = arith.mulf %22, %30 : vector<8x256xf32>
    %39 = arith.addf %37, %38 : vector<8x256xf32>
    %40 = math.tanh %39 : vector<8x256xf32>
    %41 = arith.mulf %36, %40 : vector<8x256xf32>
    %c8 = arith.constant 8 : index
    %c0_20 = arith.constant 0 : index
    %42 = vector.load %arg11[%c8, %c0_20] : memref<64x1024xf32, #tpu.memory_space<vmem>>, vector<8x1024xf32>
    %43 = arith.truncf %41 : vector<8x256xf32> to vector<8x256xbf16>
    %cst_21 = arith.constant dense<0.000000e+00> : vector<8x1024xf32>
    %44 = tpu.matmul %43, %10, %cst_21 {dimension_numbers = #tpu.dot_dimension_numbers<[1], [0], [0], [1], [0, 0, 1, 1], [], []>} : vector<8x256xbf16>, vector<256x1024xbf16>, vector<8x1024xf32> -> vector<8x1024xf32>
    %45 = arith.addf %42, %44 : vector<8x1024xf32>
    %46 = vector.extract_strided_slice %45 {offsets = [0, 0], sizes = [8, 256], strides = [1, 1]} : vector<8x1024xf32> to vector<8x256xf32>
    %47 = arith.negf %46 : vector<8x256xf32>
    %48 = math.exp %47 : vector<8x256xf32>
    %cst_22 = arith.constant 1.000000e+00 : f32
    %49 = vector.broadcast %cst_22 : f32 to vector<8x256xf32>
    %50 = arith.addf %49, %48 : vector<8x256xf32>
    %51 = arith.divf %49, %50 : vector<8x256xf32>
    %52 = vector.extract_strided_slice %45 {offsets = [0, 256], sizes = [8, 256], strides = [1, 1]} : vector<8x1024xf32> to vector<8x256xf32>
    %53 = arith.negf %52 : vector<8x256xf32>
    %54 = math.exp %53 : vector<8x256xf32>
    %cst_23 = arith.constant 1.000000e+00 : f32
    %55 = vector.broadcast %cst_23 : f32 to vector<8x256xf32>
    %56 = arith.addf %55, %54 : vector<8x256xf32>
    %57 = arith.divf %55, %56 : vector<8x256xf32>
    %58 = vector.extract_strided_slice %45 {offsets = [0, 512], sizes = [8, 256], strides = [1, 1]} : vector<8x1024xf32> to vector<8x256xf32>
    %59 = math.tanh %58 : vector<8x256xf32>
    %60 = vector.extract_strided_slice %45 {offsets = [0, 768], sizes = [8, 256], strides = [1, 1]} : vector<8x1024xf32> to vector<8x256xf32>
    %61 = arith.negf %60 : vector<8x256xf32>
    %62 = math.exp %61 : vector<8x256xf32>
    %cst_24 = arith.constant 1.000000e+00 : f32
    %63 = vector.broadcast %cst_24 : f32 to vector<8x256xf32>
    %64 = arith.addf %63, %62 : vector<8x256xf32>
    %65 = arith.divf %63, %64 : vector<8x256xf32>
    %66 = arith.mulf %57, %39 : vector<8x256xf32>
    %67 = arith.mulf %51, %59 : vector<8x256xf32>
    %68 = arith.addf %66, %67 : vector<8x256xf32>
    %69 = math.tanh %68 : vector<8x256xf32>
    %70 = arith.mulf %65, %69 : vector<8x256xf32>
    %c16 = arith.constant 16 : index
    %c0_25 = arith.constant 0 : index
    %71 = vector.load %arg11[%c16, %c0_25] : memref<64x1024xf32, #tpu.memory_space<vmem>>, vector<8x1024xf32>
    %72 = arith.truncf %70 : vector<8x256xf32> to vector<8x256xbf16>
    %cst_26 = arith.constant dense<0.000000e+00> : vector<8x1024xf32>
    %73 = tpu.matmul %72, %10, %cst_26 {dimension_numbers = #tpu.dot_dimension_numbers<[1], [0], [0], [1], [0, 0, 1, 1], [], []>} : vector<8x256xbf16>, vector<256x1024xbf16>, vector<8x1024xf32> -> vector<8x1024xf32>
    %74 = arith.addf %71, %73 : vector<8x1024xf32>
    %75 = vector.extract_strided_slice %74 {offsets = [0, 0], sizes = [8, 256], strides = [1, 1]} : vector<8x1024xf32> to vector<8x256xf32>
    %76 = arith.negf %75 : vector<8x256xf32>
    %77 = math.exp %76 : vector<8x256xf32>
    %cst_27 = arith.constant 1.000000e+00 : f32
    %78 = vector.broadcast %cst_27 : f32 to vector<8x256xf32>
    %79 = arith.addf %78, %77 : vector<8x256xf32>
    %80 = arith.divf %78, %79 : vector<8x256xf32>
    %81 = vector.extract_strided_slice %74 {offsets = [0, 256], sizes = [8, 256], strides = [1, 1]} : vector<8x1024xf32> to vector<8x256xf32>
    %82 = arith.negf %81 : vector<8x256xf32>
    %83 = math.exp %82 : vector<8x256xf32>
    %cst_28 = arith.constant 1.000000e+00 : f32
    %84 = vector.broadcast %cst_28 : f32 to vector<8x256xf32>
    %85 = arith.addf %84, %83 : vector<8x256xf32>
    %86 = arith.divf %84, %85 : vector<8x256xf32>
    %87 = vector.extract_strided_slice %74 {offsets = [0, 512], sizes = [8, 256], strides = [1, 1]} : vector<8x1024xf32> to vector<8x256xf32>
    %88 = math.tanh %87 : vector<8x256xf32>
    %89 = vector.extract_strided_slice %74 {offsets = [0, 768], sizes = [8, 256], strides = [1, 1]} : vector<8x1024xf32> to vector<8x256xf32>
    %90 = arith.negf %89 : vector<8x256xf32>
    %91 = math.exp %90 : vector<8x256xf32>
    %cst_29 = arith.constant 1.000000e+00 : f32
    %92 = vector.broadcast %cst_29 : f32 to vector<8x256xf32>
    %93 = arith.addf %92, %91 : vector<8x256xf32>
    %94 = arith.divf %92, %93 : vector<8x256xf32>
    %95 = arith.mulf %86, %68 : vector<8x256xf32>
    %96 = arith.mulf %80, %88 : vector<8x256xf32>
    %97 = arith.addf %95, %96 : vector<8x256xf32>
    %98 = math.tanh %97 : vector<8x256xf32>
    %99 = arith.mulf %94, %98 : vector<8x256xf32>
    %c24 = arith.constant 24 : index
    %c0_30 = arith.constant 0 : index
    %100 = vector.load %arg11[%c24, %c0_30] : memref<64x1024xf32, #tpu.memory_space<vmem>>, vector<8x1024xf32>
    %101 = arith.truncf %99 : vector<8x256xf32> to vector<8x256xbf16>
    %cst_31 = arith.constant dense<0.000000e+00> : vector<8x1024xf32>
    %102 = tpu.matmul %101, %10, %cst_31 {dimension_numbers = #tpu.dot_dimension_numbers<[1], [0], [0], [1], [0, 0, 1, 1], [], []>} : vector<8x256xbf16>, vector<256x1024xbf16>, vector<8x1024xf32> -> vector<8x1024xf32>
    %103 = arith.addf %100, %102 : vector<8x1024xf32>
    %104 = vector.extract_strided_slice %103 {offsets = [0, 0], sizes = [8, 256], strides = [1, 1]} : vector<8x1024xf32> to vector<8x256xf32>
    %105 = arith.negf %104 : vector<8x256xf32>
    %106 = math.exp %105 : vector<8x256xf32>
    %cst_32 = arith.constant 1.000000e+00 : f32
    %107 = vector.broadcast %cst_32 : f32 to vector<8x256xf32>
    %108 = arith.addf %107, %106 : vector<8x256xf32>
    %109 = arith.divf %107, %108 : vector<8x256xf32>
    %110 = vector.extract_strided_slice %103 {offsets = [0, 256], sizes = [8, 256], strides = [1, 1]} : vector<8x1024xf32> to vector<8x256xf32>
    %111 = arith.negf %110 : vector<8x256xf32>
    %112 = math.exp %111 : vector<8x256xf32>
    %cst_33 = arith.constant 1.000000e+00 : f32
    %113 = vector.broadcast %cst_33 : f32 to vector<8x256xf32>
    %114 = arith.addf %113, %112 : vector<8x256xf32>
    %115 = arith.divf %113, %114 : vector<8x256xf32>
    %116 = vector.extract_strided_slice %103 {offsets = [0, 512], sizes = [8, 256], strides = [1, 1]} : vector<8x1024xf32> to vector<8x256xf32>
    %117 = math.tanh %116 : vector<8x256xf32>
    %118 = vector.extract_strided_slice %103 {offsets = [0, 768], sizes = [8, 256], strides = [1, 1]} : vector<8x1024xf32> to vector<8x256xf32>
    %119 = arith.negf %118 : vector<8x256xf32>
    %120 = math.exp %119 : vector<8x256xf32>
    %cst_34 = arith.constant 1.000000e+00 : f32
    %121 = vector.broadcast %cst_34 : f32 to vector<8x256xf32>
    %122 = arith.addf %121, %120 : vector<8x256xf32>
    %123 = arith.divf %121, %122 : vector<8x256xf32>
    %124 = arith.mulf %115, %97 : vector<8x256xf32>
    %125 = arith.mulf %109, %117 : vector<8x256xf32>
    %126 = arith.addf %124, %125 : vector<8x256xf32>
    %127 = math.tanh %126 : vector<8x256xf32>
    %128 = arith.mulf %123, %127 : vector<8x256xf32>
    %c32 = arith.constant 32 : index
    %c0_35 = arith.constant 0 : index
    %129 = vector.load %arg11[%c32, %c0_35] : memref<64x1024xf32, #tpu.memory_space<vmem>>, vector<8x1024xf32>
    %130 = arith.truncf %128 : vector<8x256xf32> to vector<8x256xbf16>
    %cst_36 = arith.constant dense<0.000000e+00> : vector<8x1024xf32>
    %131 = tpu.matmul %130, %10, %cst_36 {dimension_numbers = #tpu.dot_dimension_numbers<[1], [0], [0], [1], [0, 0, 1, 1], [], []>} : vector<8x256xbf16>, vector<256x1024xbf16>, vector<8x1024xf32> -> vector<8x1024xf32>
    %132 = arith.addf %129, %131 : vector<8x1024xf32>
    %133 = vector.extract_strided_slice %132 {offsets = [0, 0], sizes = [8, 256], strides = [1, 1]} : vector<8x1024xf32> to vector<8x256xf32>
    %134 = arith.negf %133 : vector<8x256xf32>
    %135 = math.exp %134 : vector<8x256xf32>
    %cst_37 = arith.constant 1.000000e+00 : f32
    %136 = vector.broadcast %cst_37 : f32 to vector<8x256xf32>
    %137 = arith.addf %136, %135 : vector<8x256xf32>
    %138 = arith.divf %136, %137 : vector<8x256xf32>
    %139 = vector.extract_strided_slice %132 {offsets = [0, 256], sizes = [8, 256], strides = [1, 1]} : vector<8x1024xf32> to vector<8x256xf32>
    %140 = arith.negf %139 : vector<8x256xf32>
    %141 = math.exp %140 : vector<8x256xf32>
    %cst_38 = arith.constant 1.000000e+00 : f32
    %142 = vector.broadcast %cst_38 : f32 to vector<8x256xf32>
    %143 = arith.addf %142, %141 : vector<8x256xf32>
    %144 = arith.divf %142, %143 : vector<8x256xf32>
    %145 = vector.extract_strided_slice %132 {offsets = [0, 512], sizes = [8, 256], strides = [1, 1]} : vector<8x1024xf32> to vector<8x256xf32>
    %146 = math.tanh %145 : vector<8x256xf32>
    %147 = vector.extract_strided_slice %132 {offsets = [0, 768], sizes = [8, 256], strides = [1, 1]} : vector<8x1024xf32> to vector<8x256xf32>
    %148 = arith.negf %147 : vector<8x256xf32>
    %149 = math.exp %148 : vector<8x256xf32>
    %cst_39 = arith.constant 1.000000e+00 : f32
    %150 = vector.broadcast %cst_39 : f32 to vector<8x256xf32>
    %151 = arith.addf %150, %149 : vector<8x256xf32>
    %152 = arith.divf %150, %151 : vector<8x256xf32>
    %153 = arith.mulf %144, %126 : vector<8x256xf32>
    %154 = arith.mulf %138, %146 : vector<8x256xf32>
    %155 = arith.addf %153, %154 : vector<8x256xf32>
    %156 = math.tanh %155 : vector<8x256xf32>
    %157 = arith.mulf %152, %156 : vector<8x256xf32>
    %c40 = arith.constant 40 : index
    %c0_40 = arith.constant 0 : index
    %158 = vector.load %arg11[%c40, %c0_40] : memref<64x1024xf32, #tpu.memory_space<vmem>>, vector<8x1024xf32>
    %159 = arith.truncf %157 : vector<8x256xf32> to vector<8x256xbf16>
    %cst_41 = arith.constant dense<0.000000e+00> : vector<8x1024xf32>
    %160 = tpu.matmul %159, %10, %cst_41 {dimension_numbers = #tpu.dot_dimension_numbers<[1], [0], [0], [1], [0, 0, 1, 1], [], []>} : vector<8x256xbf16>, vector<256x1024xbf16>, vector<8x1024xf32> -> vector<8x1024xf32>
    %161 = arith.addf %158, %160 : vector<8x1024xf32>
    %162 = vector.extract_strided_slice %161 {offsets = [0, 0], sizes = [8, 256], strides = [1, 1]} : vector<8x1024xf32> to vector<8x256xf32>
    %163 = arith.negf %162 : vector<8x256xf32>
    %164 = math.exp %163 : vector<8x256xf32>
    %cst_42 = arith.constant 1.000000e+00 : f32
    %165 = vector.broadcast %cst_42 : f32 to vector<8x256xf32>
    %166 = arith.addf %165, %164 : vector<8x256xf32>
    %167 = arith.divf %165, %166 : vector<8x256xf32>
    %168 = vector.extract_strided_slice %161 {offsets = [0, 256], sizes = [8, 256], strides = [1, 1]} : vector<8x1024xf32> to vector<8x256xf32>
    %169 = arith.negf %168 : vector<8x256xf32>
    %170 = math.exp %169 : vector<8x256xf32>
    %cst_43 = arith.constant 1.000000e+00 : f32
    %171 = vector.broadcast %cst_43 : f32 to vector<8x256xf32>
    %172 = arith.addf %171, %170 : vector<8x256xf32>
    %173 = arith.divf %171, %172 : vector<8x256xf32>
    %174 = vector.extract_strided_slice %161 {offsets = [0, 512], sizes = [8, 256], strides = [1, 1]} : vector<8x1024xf32> to vector<8x256xf32>
    %175 = math.tanh %174 : vector<8x256xf32>
    %176 = vector.extract_strided_slice %161 {offsets = [0, 768], sizes = [8, 256], strides = [1, 1]} : vector<8x1024xf32> to vector<8x256xf32>
    %177 = arith.negf %176 : vector<8x256xf32>
    %178 = math.exp %177 : vector<8x256xf32>
    %cst_44 = arith.constant 1.000000e+00 : f32
    %179 = vector.broadcast %cst_44 : f32 to vector<8x256xf32>
    %180 = arith.addf %179, %178 : vector<8x256xf32>
    %181 = arith.divf %179, %180 : vector<8x256xf32>
    %182 = arith.mulf %173, %155 : vector<8x256xf32>
    %183 = arith.mulf %167, %175 : vector<8x256xf32>
    %184 = arith.addf %182, %183 : vector<8x256xf32>
    %185 = math.tanh %184 : vector<8x256xf32>
    %186 = arith.mulf %181, %185 : vector<8x256xf32>
    %c48 = arith.constant 48 : index
    %c0_45 = arith.constant 0 : index
    %187 = vector.load %arg11[%c48, %c0_45] : memref<64x1024xf32, #tpu.memory_space<vmem>>, vector<8x1024xf32>
    %188 = arith.truncf %186 : vector<8x256xf32> to vector<8x256xbf16>
    %cst_46 = arith.constant dense<0.000000e+00> : vector<8x1024xf32>
    %189 = tpu.matmul %188, %10, %cst_46 {dimension_numbers = #tpu.dot_dimension_numbers<[1], [0], [0], [1], [0, 0, 1, 1], [], []>} : vector<8x256xbf16>, vector<256x1024xbf16>, vector<8x1024xf32> -> vector<8x1024xf32>
    %190 = arith.addf %187, %189 : vector<8x1024xf32>
    %191 = vector.extract_strided_slice %190 {offsets = [0, 0], sizes = [8, 256], strides = [1, 1]} : vector<8x1024xf32> to vector<8x256xf32>
    %192 = arith.negf %191 : vector<8x256xf32>
    %193 = math.exp %192 : vector<8x256xf32>
    %cst_47 = arith.constant 1.000000e+00 : f32
    %194 = vector.broadcast %cst_47 : f32 to vector<8x256xf32>
    %195 = arith.addf %194, %193 : vector<8x256xf32>
    %196 = arith.divf %194, %195 : vector<8x256xf32>
    %197 = vector.extract_strided_slice %190 {offsets = [0, 256], sizes = [8, 256], strides = [1, 1]} : vector<8x1024xf32> to vector<8x256xf32>
    %198 = arith.negf %197 : vector<8x256xf32>
    %199 = math.exp %198 : vector<8x256xf32>
    %cst_48 = arith.constant 1.000000e+00 : f32
    %200 = vector.broadcast %cst_48 : f32 to vector<8x256xf32>
    %201 = arith.addf %200, %199 : vector<8x256xf32>
    %202 = arith.divf %200, %201 : vector<8x256xf32>
    %203 = vector.extract_strided_slice %190 {offsets = [0, 512], sizes = [8, 256], strides = [1, 1]} : vector<8x1024xf32> to vector<8x256xf32>
    %204 = math.tanh %203 : vector<8x256xf32>
    %205 = vector.extract_strided_slice %190 {offsets = [0, 768], sizes = [8, 256], strides = [1, 1]} : vector<8x1024xf32> to vector<8x256xf32>
    %206 = arith.negf %205 : vector<8x256xf32>
    %207 = math.exp %206 : vector<8x256xf32>
    %cst_49 = arith.constant 1.000000e+00 : f32
    %208 = vector.broadcast %cst_49 : f32 to vector<8x256xf32>
    %209 = arith.addf %208, %207 : vector<8x256xf32>
    %210 = arith.divf %208, %209 : vector<8x256xf32>
    %211 = arith.mulf %202, %184 : vector<8x256xf32>
    %212 = arith.mulf %196, %204 : vector<8x256xf32>
    %213 = arith.addf %211, %212 : vector<8x256xf32>
    %214 = math.tanh %213 : vector<8x256xf32>
    %215 = arith.mulf %210, %214 : vector<8x256xf32>
    %c56 = arith.constant 56 : index
    %c0_50 = arith.constant 0 : index
    %216 = vector.load %arg11[%c56, %c0_50] : memref<64x1024xf32, #tpu.memory_space<vmem>>, vector<8x1024xf32>
    %217 = arith.truncf %215 : vector<8x256xf32> to vector<8x256xbf16>
    %cst_51 = arith.constant dense<0.000000e+00> : vector<8x1024xf32>
    %218 = tpu.matmul %217, %10, %cst_51 {dimension_numbers = #tpu.dot_dimension_numbers<[1], [0], [0], [1], [0, 0, 1, 1], [], []>} : vector<8x256xbf16>, vector<256x1024xbf16>, vector<8x1024xf32> -> vector<8x1024xf32>
    %219 = arith.addf %216, %218 : vector<8x1024xf32>
    %220 = vector.extract_strided_slice %219 {offsets = [0, 0], sizes = [8, 256], strides = [1, 1]} : vector<8x1024xf32> to vector<8x256xf32>
    %221 = arith.negf %220 : vector<8x256xf32>
    %222 = math.exp %221 : vector<8x256xf32>
    %cst_52 = arith.constant 1.000000e+00 : f32
    %223 = vector.broadcast %cst_52 : f32 to vector<8x256xf32>
    %224 = arith.addf %223, %222 : vector<8x256xf32>
    %225 = arith.divf %223, %224 : vector<8x256xf32>
    %226 = vector.extract_strided_slice %219 {offsets = [0, 256], sizes = [8, 256], strides = [1, 1]} : vector<8x1024xf32> to vector<8x256xf32>
    %227 = arith.negf %226 : vector<8x256xf32>
    %228 = math.exp %227 : vector<8x256xf32>
    %cst_53 = arith.constant 1.000000e+00 : f32
    %229 = vector.broadcast %cst_53 : f32 to vector<8x256xf32>
    %230 = arith.addf %229, %228 : vector<8x256xf32>
    %231 = arith.divf %229, %230 : vector<8x256xf32>
    %232 = vector.extract_strided_slice %219 {offsets = [0, 512], sizes = [8, 256], strides = [1, 1]} : vector<8x1024xf32> to vector<8x256xf32>
    %233 = math.tanh %232 : vector<8x256xf32>
    %234 = vector.extract_strided_slice %219 {offsets = [0, 768], sizes = [8, 256], strides = [1, 1]} : vector<8x1024xf32> to vector<8x256xf32>
    %235 = arith.negf %234 : vector<8x256xf32>
    %236 = math.exp %235 : vector<8x256xf32>
    %cst_54 = arith.constant 1.000000e+00 : f32
    %237 = vector.broadcast %cst_54 : f32 to vector<8x256xf32>
    %238 = arith.addf %237, %236 : vector<8x256xf32>
    %239 = arith.divf %237, %238 : vector<8x256xf32>
    %240 = arith.mulf %231, %213 : vector<8x256xf32>
    %241 = arith.mulf %225, %233 : vector<8x256xf32>
    %242 = arith.addf %240, %241 : vector<8x256xf32>
    %243 = math.tanh %242 : vector<8x256xf32>
    %244 = arith.mulf %239, %243 : vector<8x256xf32>
    %c0_55 = arith.constant 0 : index
    %c0_56 = arith.constant 0 : index
    %245 = vector.load %arg9[%c0_55, %c0_56] : memref<8x256xf32, #tpu.memory_space<vmem>>, vector<8x256xf32>
    tpu.vector_store %arg9[%c0_55, %c0_56], %244 {strides = array<i32>} : memref<8x256xf32, #tpu.memory_space<vmem>>, vector<8x256xf32>,
    %c0_57 = arith.constant 0 : index
    %c0_58 = arith.constant 0 : index
    %246 = vector.load %arg10[%c0_57, %c0_58] : memref<8x256xf32, #tpu.memory_space<vmem>>, vector<8x256xf32>
    tpu.vector_store %arg10[%c0_57, %c0_58], %242 {strides = array<i32>} : memref<8x256xf32, #tpu.memory_space<vmem>>, vector<8x256xf32>,
    %c0_i32_59 = arith.constant 0 : i32
    %247 = arith.cmpi eq, %arg1, %c0_i32_59 : i32
    %248 = arith.extui %247 : i1 to i32
    %c0_i32_60 = arith.constant 0 : i32
    %249 = arith.cmpi ne, %248, %c0_i32_60 : i32
    scf.if %249 {
      %cst_61 = arith.constant 0.000000e+00 : f32
      %250 = vector.broadcast %cst_61 : f32 to vector<8x256xf32>
      %251 = arith.maximumf %244, %250 : vector<8x256xf32>
      %252 = arith.truncf %251 : vector<8x256xf32> to vector<8x256xbf16>
      %c0_62 = arith.constant 0 : index
      %c0_63 = arith.constant 0 : index
      %253 = vector.load %arg6[%c0_62, %c0_63] : memref<256x128xbf16, #tpu.memory_space<vmem>>, vector<256x128xbf16>
      %cst_64 = arith.constant dense<0.000000e+00> : vector<8x128xf32>
      %254 = tpu.matmul %252, %253, %cst_64 {dimension_numbers = #tpu.dot_dimension_numbers<[1], [0], [0], [1], [0, 0, 1, 1], [], []>} : vector<8x256xbf16>, vector<256x128xbf16>, vector<8x128xf32> -> vector<8x128xf32>
      %c0_65 = arith.constant 0 : index
      %c0_66 = arith.constant 0 : index
      %255 = vector.load %arg7[%c0_65, %c0_66] : memref<1x128xf32, #tpu.memory_space<vmem>>, vector<1x128xf32>
      %256 = vector.broadcast %255 : vector<1x128xf32> to vector<8x128xf32>
      %257 = arith.addf %254, %256 : vector<8x128xf32>
      %c0_67 = arith.constant 0 : index
      %c0_68 = arith.constant 0 : index
      %258 = vector.load %arg8[%c0_67, %c0_68] : memref<8x128xf32, #tpu.memory_space<vmem>>, vector<8x128xf32>
      tpu.vector_store %arg8[%c0_67, %c0_68], %257 {strides = array<i32>} : memref<8x128xf32, #tpu.memory_space<vmem>>, vector<8x128xf32>,
    } else {
    }
    return
  }
  func.func @transform_0(%arg0: i32, %arg1: i32) -> (i32, i32) {
    %c1_i32 = arith.constant 1 : i32
    %0 = arith.muli %arg0, %c1_i32 : i32
    %1 = arith.addi %0, %arg1 : i32
    %c0_i32 = arith.constant 0 : i32
    %c0_i32_0 = arith.constant 0 : i32
    return %1, %c0_i32 : i32, i32
  }
  func.func @transform_1(%arg0: i32, %arg1: i32) -> (i32, i32) {
    %c0_i32 = arith.constant 0 : i32
    %c0_i32_0 = arith.constant 0 : i32
    %c0_i32_1 = arith.constant 0 : i32
    return %c0_i32, %c0_i32_0 : i32, i32
  }
  func.func @transform_2(%arg0: i32, %arg1: i32) -> (i32, i32) {
    %c0_i32 = arith.constant 0 : i32
    %c0_i32_0 = arith.constant 0 : i32
    %c0_i32_1 = arith.constant 0 : i32
    return %c0_i32, %c0_i32_0 : i32, i32
  }
  func.func @transform_3(%arg0: i32, %arg1: i32) -> (i32, i32) {
    %c0_i32 = arith.constant 0 : i32
    %c0_i32_0 = arith.constant 0 : i32
    %c0_i32_1 = arith.constant 0 : i32
    return %c0_i32, %c0_i32_0 : i32, i32
  }
  func.func @transform_4(%arg0: i32, %arg1: i32) -> (i32, i32) {
    %c0_i32 = arith.constant 0 : i32
    %c0_i32_0 = arith.constant 0 : i32
    %c0_i32_1 = arith.constant 0 : i32
    return %c0_i32, %c0_i32_0 : i32, i32
  }
  func.func @transform_5(%arg0: i32, %arg1: i32) -> (i32, i32) {
    %c0_i32 = arith.constant 0 : i32
    %c0_i32_0 = arith.constant 0 : i32
    %c0_i32_1 = arith.constant 0 : i32
    return %c0_i32, %c0_i32_0 : i32, i32
  }
  func.func @transform_6(%arg0: i32, %arg1: i32) -> (i32, i32) {
    %c0_i32 = arith.constant 0 : i32
    %c0_i32_0 = arith.constant 0 : i32
    return %arg0, %c0_i32 : i32, i32
  }
}

</mosaic_0001>

<bundles_post_ra>
// kernel: classifier_forward.1
= control target key start
LH: loop header
LB: loop body
LE: loop exit
PB: predicated region body
PF: predicated region fallthrough
CT: control target
= control target key end

     0   :  { %v3931_v3 = vmov 0   ;;  %vm220_vm0 = vcmask 261120   ;;  %s6211_s1 = inlined_call_operand.vmem [shape: bf16[32,1024], index: 1, kind: input, shape index: {}]   ;;  %s6212_s0 = inlined_call_operand.vmem [shape: bf16[64,32], index: 0, kind: input, shape index: {}]   ;;  %s6213_s2 = inlined_call_operand.vmem [shape: bf16[256,1024], index: 2, kind: input, shape index: {}]   ;;  %s6214_s3 = inlined_call_operand.vmem [shape: f32[1,1024], index: 3, kind: input, shape index: {}]   ;;  %s6215_s4 = inlined_call_operand.vmem [shape: bf16[256,128], index: 4, kind: input, shape index: {}]   ;;  %s6216_s5 = inlined_call_operand.vmem [shape: f32[1,128], index: 5, kind: input, shape index: {}]   ;;  %s6217_s6 = inlined_call_operand.vmem [shape: f32[8,128], index: 6, kind: output, shape index: {}]  }
   0x1   :  { %v62_v0 = vld [vmem:[%s6211_s1] sm:$0xff]  ;;  %265 = vmatprep.mubr.bf16.mxu0 %v3931_v3  ;;  %285 = vmatprep.mubr.bf16.mxu1 %v3931_v3  ;;  %v63_v8 = vld [vmem:[%s6211_s1 + $0x8] sm:$0xff]  ;;  %v64_v11 = vld [vmem:[%s6211_s1 + $0x10] sm:$0xff] }
   0x2   :  { %v66_v1 = vld [vmem:[%s6211_s1 + $0x20] sm:$0xff]  ;;  %v67_v9 = vld [vmem:[%s6211_s1 + $0x28] sm:$0xff]  ;;  %v68_v12 = vld [vmem:[%s6211_s1 + $0x30] sm:$0xff] }
   0x3   :  { %v70_v2 = vld [vmem:[%s6211_s1 + $0x40] sm:$0xff]  ;;  %v3403_v4 = vcombine.high %v62_v0, %v66_v1  ;;  %v3402_v5 = vcombine.low %v62_v0, %v66_v1  ;;  %v3405_v13 = vcombine.high %v63_v8, %v67_v9  ;;  %v3407_v14 = vcombine.high %v64_v11, %v68_v12  ;;  %v71_v15 = vld [vmem:[%s6211_s1 + $0x48] sm:$0xff]  ;;  %v4005_v17 = vld [vmem:[%s6212_s0 + $0x10] sm:$0xff]  }
   0x4   :  { %v74_v6 = vld [vmem:[%s6211_s1 + $0x60] sm:$0xff]  ;;  %v75_v18 = vld [vmem:[%s6211_s1 + $0x68] sm:$0xff]  ;;  %v3404_v19 = vcombine.low %v63_v8, %v67_v9  ;;  %v72_v20 = vld [vmem:[%s6211_s1 + $0x50] sm:$0xff]  ;;  %v3406_v23 = vcombine.low %v64_v11, %v68_v12 }
   0x5   :  { %v3411_v7 = vcombine.high %v70_v2, %v74_v6  ;;  %233 = vmatprep.subr.bf16.mxu0 %v3403_v4  ;;  %3649 = vmatprep.subr.bf16.mxu1 %v3403_v4  ;;  %v3410_v10 = vcombine.low %v70_v2, %v74_v6  ;;  %v4000_v16 = vld [vmem:[%s6212_s0] sm:$0xff]   ;;  %v76_v21 = vld [vmem:[%s6211_s1 + $0x70] sm:$0xff]  ;;  %v3413_v22 = vcombine.high %v71_v15, %v75_v18  ;;  %v65_v24 = vld [vmem:[%s6211_s1 + $0x18] sm:$0xff] }
   0x6   :  { %234 = vmatpush1.bf16.msra.mxu0 %v3402_v5  ;;  %3651 = vmatpush1.bf16.msra.mxu1 %v3402_v5  ;;  %v69_v25 = vld [vmem:[%s6211_s1 + $0x38] sm:$0xff]  ;;  %v3415_v26 = vcombine.high %v72_v20, %v76_v21  ;;  %v3412_v27 = vcombine.low %v71_v15, %v75_v18  ;;  %v3414_v29 = vcombine.low %v72_v20, %v76_v21  ;;  %v589_v30 = vld [vmem:[%s6213_s2] sm:$0xff]  ;;  %v4037_v32 = vld [vmem:[%s6212_s0 + $0x8] sm:$0xff]  }
   0x7   :  { %235 = vmatprep.subr.bf16.mxu0 %v3411_v7  ;;  %3650 = vmatprep.subr.bf16.mxu1 %v3411_v7  ;;  %v3409_v28 = vcombine.high %v65_v24, %v69_v25  ;;  %v593_v31 = vld [vmem:[%s6213_s2 + $0x20] sm:$0xff]  ;;  %v4042_v33 = vld [vmem:[%s6212_s0 + $0x18] sm:$0xff]   ;;  %v3408_v39 = vcombine.low %v65_v24, %v69_v25  ;;  %v4078_v45 = vld [vmem:[%s6213_s2 + $0x8] sm:$0xff] }
   0x8   :  { %v4044_v34 = vcombine.high %v589_v30, %v593_v31  ;;  %v597_v35 = vld [vmem:[%s6213_s2 + $0x40] sm:$0xff]  ;;  %v73_v37 = vld [vmem:[%s6211_s1 + $0x58] sm:$0xff]  ;;  %v4065_v40 = vcombine.low %v589_v30, %v593_v31  ;;  %v4083_v46 = vld [vmem:[%s6213_s2 + $0x28] sm:$0xff] }
   0x9   :  { %v601_v36 = vld [vmem:[%s6213_s2 + $0x60] sm:$0xff]  ;;  %v77_v38 = vld [vmem:[%s6211_s1 + $0x78] sm:$0xff]  ;;  %v4098_v50 = vcombine.high %v4078_v45, %v4083_v46  ;;  %v598_v15 = vld [vmem:[%s6213_s2 + $0x48] sm:$0xff]  ;;  %v4209_v20 = vcombine.low %v4078_v45, %v4083_v46 }
   0xa   :  { %236 = vmatpush1.bf16.msra.mxu0 %v3410_v10  ;;  %3652 = vmatpush1.bf16.msra.mxu1 %v3410_v10  ;;  %6478 = vst [vmem:[#allocation5_spill] sm:$0xff] %v4044_v34  ;;  %6479 = vst [vmem:[#allocation6_spill] sm:$0xff] %v4065_v40  ;;  %v4067_v41 = vcombine.high %v597_v35, %v601_v36  ;;  %v605_v42 = vld [vmem:[%s6213_s2 + $0x80] sm:$0xff]  ;;  %v3417_v44 = vcombine.high %v73_v37, %v77_v38  ;;  %v602_v18 = vld [vmem:[%s6213_s2 + $0x68] sm:$0xff] }
   0xb   :  { %306 = vmatprep.subr.bf16.mxu1 %v3405_v13  ;;  %379 = vmatprep.subr.bf16.mxu0 %v3407_v14  ;;  %v609_v43 = vld [vmem:[%s6213_s2 + $0xa0] sm:$0xff]  ;;  %v4090_v47 = vcombine.low %v597_v35, %v601_v36  ;;  %v3416_v48 = vcombine.low %v73_v37, %v77_v38  ;;  %6483 = vst [vmem:[#allocation10_spill] sm:$0xff] %v4098_v50  ;;  %v6218_v13 = vmov 0.0|0.0   ;;  %6497 = vst [vmem:[#allocation24_spill] sm:$0xff] %v4209_v20  ;;  %v606_v25 = vld [vmem:[%s6213_s2 + $0x88] sm:$0xff] }
   0xc   :  { %6480 = vst [vmem:[#allocation7_spill] sm:$0xff] %v4067_v41  ;;  %v4094_v49 = vcombine.high %v605_v42, %v609_v43  ;;  %v613_v51 = vld [vmem:[%s6213_s2 + $0xc0] sm:$0xff]  ;;  %v4108_v53 = vcombine.low %v605_v42, %v609_v43  ;;  %v614_v35 = vld [vmem:[%s6213_s2 + $0xc8] sm:$0xff] }
   0xd   :  { %3418 = vmatmul.mubr.msk.bf16.vlgmr.msra.gmra.mrb[0].mxu0 %vm220_vm0, %v4000_v16  ;;  %3420 = vmatmul.mubr.msk.bf16.vlgmr.msra.gmra.mrb[0].mxu1 %vm220_vm0, %v4005_v17  ;;  %6481 = vst [vmem:[#allocation8_spill] sm:$0xff] %v4090_v47  ;;  %v617_v52 = vld [vmem:[%s6213_s2 + $0xe0] sm:$0xff]  ;;  %v618_v36 = vld [vmem:[%s6213_s2 + $0xe8] sm:$0xff] }
   0xe   :  { %307 = vmatpush1.bf16.msra.mxu1 %v3404_v19  ;;  %275 = vmatprep.mubr.bf16.mxu0 %v3931_v3  ;;  %6482 = vst [vmem:[#allocation9_spill] sm:$0xff] %v4094_v49  ;;  %6484 = vst [vmem:[#allocation11_spill] sm:$0xff] %v4108_v53  ;;  %v4111_v54 = vcombine.high %v613_v51, %v617_v52  ;;  %v621_v55 = vld [vmem:[%s6213_s2 + $0x100] sm:$0xff]  ;;  %v4125_v57 = vcombine.low %v613_v51, %v617_v52  ;;  %v622_v45 = vld [vmem:[%s6213_s2 + $0x108] sm:$0xff] }
   0xf   :  { %295 = vmatprep.mubr.bf16.mxu1 %v3931_v3  ;;  %308 = vmatprep.subr.bf16.mxu1 %v3413_v22  ;;  %v625_v56 = vld [vmem:[%s6213_s2 + $0x120] sm:$0xff]  ;;  %v4214_v22 = vcombine.high %v598_v15, %v602_v18  ;;  %v4265_v42 = vcombine.high %v614_v35, %v618_v36  ;;  %v626_v46 = vld [vmem:[%s6213_s2 + $0x128] sm:$0xff]  ;;  %v4285_v51 = vcombine.low %v614_v35, %v618_v36 }
  0x10   :  { %380 = vmatpush1.bf16.msra.mxu0 %v3406_v23  ;;  %6485 = vst [vmem:[#allocation12_spill] sm:$0xff] %v4111_v54  ;;  %6486 = vst [vmem:[#allocation13_spill] sm:$0xff] %v4125_v57  ;;  %v4129_v58 = vcombine.high %v621_v55, %v625_v56  ;;  %v629_v59 = vld [vmem:[%s6213_s2 + $0x140] sm:$0xff]  ;;  %v4139_v61 = vcombine.low %v621_v55, %v625_v56  ;;  %v4291_v55 = vcombine.high %v622_v45, %v626_v46 }
  0x11   :  { %381 = vmatprep.subr.bf16.mxu0 %v3415_v26  ;;  %v633_v60 = vld [vmem:[%s6213_s2 + $0x160] sm:$0xff]  ;;  %6499 = vst [vmem:[#allocation26_spill] sm:$0xff] %v4214_v22  ;;  %v610_v26 = vld [vmem:[%s6213_s2 + $0xa8] sm:$0xff]  ;;  %6507 = vst [vmem:[#allocation34_spill] sm:$0xff] %v4265_v42 }
  0x12   :  { %309 = vmatpush1.bf16.msra.mxu1 %v3412_v27  ;;  %6487 = vst [vmem:[#allocation14_spill] sm:$0xff] %v4129_v58  ;;  %6488 = vst [vmem:[#allocation15_spill] sm:$0xff] %v4139_v61  ;;  %v4142_v62 = vcombine.high %v629_v59, %v633_v60  ;;  %v637_v63 = vld [vmem:[%s6213_s2 + $0x180] sm:$0xff]  ;;  %v4155_v1 = vcombine.low %v629_v59, %v633_v60  ;;  %v4240_v30 = vcombine.high %v606_v25, %v610_v26  ;;  %v630_v59 = vld [vmem:[%s6213_s2 + $0x148] sm:$0xff] }
  0x13   :  { %452 = vmatprep.subr.bf16.mxu1 %v3409_v28  ;;  %v641_v0 = vld [vmem:[%s6213_s2 + $0x1a0] sm:$0xff]  ;;  %v4234_v28 = vcombine.low %v598_v15, %v602_v18  ;;  %v4259_v38 = vcombine.low %v606_v25, %v610_v26  ;;  %6509 = vst [vmem:[#allocation36_spill] sm:$0xff] %v4285_v51  ;;  %6511 = vst [vmem:[#allocation38_spill] sm:$0xff] %v4291_v55  ;;  %v634_v60 = vld [vmem:[%s6213_s2 + $0x168] sm:$0xff] }
  0x14   :  { %382 = vmatpush1.bf16.msra.mxu0 %v3414_v29  ;;  %6489 = vst [vmem:[#allocation16_spill] sm:$0xff] %v4142_v62  ;;  %6490 = vst [vmem:[#allocation17_spill] sm:$0xff] %v4155_v1  ;;  %v4159_v2 = vcombine.high %v637_v63, %v641_v0  ;;  %v645_v4 = vld [vmem:[%s6213_s2 + $0x1c0] sm:$0xff]  ;;  %v4169_v6 = vcombine.low %v637_v63, %v641_v0  ;;  %v4310_v0 = vcombine.low %v622_v45, %v626_v46  ;;  %v646_v26 = vld [vmem:[%s6213_s2 + $0x1c8] sm:$0xff] }
  0x15   :  { %3419 = vmatmul.mubr.msk.bf16.gmra.mrb[4].mxu0 %vm220_vm0, %v4037_v32  ;;  %3421 = vmatmul.mubr.msk.bf16.gmra.mrb[4].mxu1 %vm220_vm0, %v4042_v33  ;;  %v649_v5 = vld [vmem:[%s6213_s2 + $0x1e0] sm:$0xff]  ;;  %6501 = vst [vmem:[#allocation28_spill] sm:$0xff] %v4234_v28  ;;  %6503 = vst [vmem:[#allocation30_spill] sm:$0xff] %v4240_v30  ;;  %v4336_v18 = vcombine.low %v630_v59, %v634_v60  ;;  %v591_v45 = vld [vmem:[%s6213_s2 + $0x10] sm:$0xff] }
  0x16   :  { %338 = vmatprep.mubr.bf16.mxu1 %v3931_v3  ;;  %411 = vmatprep.mubr.bf16.mxu0 %v3931_v3  ;;  %6491 = vst [vmem:[#allocation18_spill] sm:$0xff] %v4159_v2  ;;  %6492 = vst [vmem:[#allocation19_spill] sm:$0xff] %v4169_v6  ;;  %v4172_v7 = vcombine.high %v645_v4, %v649_v5  ;;  %v653_v8 = vld [vmem:[%s6213_s2 + $0x200] sm:$0xff]  ;;  %v4185_v10 = vcombine.low %v645_v4, %v649_v5  ;;  %v595_v46 = vld [vmem:[%s6213_s2 + $0x30] sm:$0xff] }
  0x17   :  { %1371 = vmatprep.subr.bf16.mxu0 %v4044_v34  ;;  %v657_v9 = vld [vmem:[%s6213_s2 + $0x220] sm:$0xff]  ;;  %6505 = vst [vmem:[#allocation32_spill] sm:$0xff] %v4259_v38  ;;  %6513 = vst [vmem:[#allocation40_spill] sm:$0xff] %v4310_v0  ;;  %v4316_v5 = vcombine.high %v630_v59, %v634_v60  ;;  %v4393_v60 = vcombine.high %v591_v45, %v595_v46 }
  0x18   :  { %6493 = vst [vmem:[#allocation20_spill] sm:$0xff] %v4172_v7  ;;  %6494 = vst [vmem:[#allocation21_spill] sm:$0xff] %v4185_v10  ;;  %v4189_v11 = vcombine.high %v653_v8, %v657_v9  ;;  %v661_v12 = vld [vmem:[%s6213_s2 + $0x240] sm:$0xff]  ;;  %v4205_v19 = vcombine.low %v653_v8, %v657_v9 }
  0x19   :  { %v665_v14 = vld [vmem:[%s6213_s2 + $0x260] sm:$0xff]  ;;  %6515 = vst [vmem:[#allocation42_spill] sm:$0xff] %v4316_v5  ;;  %6517 = vst [vmem:[#allocation44_spill] sm:$0xff] %v4336_v18 }
  0x1a   :  { %6495 = vst [vmem:[#allocation22_spill] sm:$0xff] %v4189_v11  ;;  %6496 = vst [vmem:[#allocation23_spill] sm:$0xff] %v4205_v19  ;;  %v4212_v21 = vcombine.high %v661_v12, %v665_v14  ;;  %v669_v23 = vld [vmem:[%s6213_s2 + $0x280] sm:$0xff]  ;;  %v4232_v27 = vcombine.low %v661_v12, %v665_v14  ;;  %v638_v12 = vld [vmem:[%s6213_s2 + $0x188] sm:$0xff] }
  0x1b   :  { %v673_v24 = vld [vmem:[%s6213_s2 + $0x2a0] sm:$0xff]  ;;  %v642_v14 = vld [vmem:[%s6213_s2 + $0x1a8] sm:$0xff]  ;;  %6527 = vst [vmem:[#allocation54_spill] sm:$0xff] %v4393_v60 }
  0x1c   :  { %6498 = vst [vmem:[#allocation25_spill] sm:$0xff] %v4212_v21  ;;  %6500 = vst [vmem:[#allocation27_spill] sm:$0xff] %v4232_v27  ;;  %v4238_v29 = vcombine.high %v669_v23, %v673_v24  ;;  %v681_v31 = vld [vmem:[%s6213_s2 + $0x2e0] sm:$0xff]  ;;  %v4257_v37 = vcombine.low %v669_v23, %v673_v24  ;;  %v4342_v24 = vcombine.high %v638_v12, %v642_v14 }
  0x1d   :  { %3422 = vmatmul.mubr.msk.bf16.vlgmr.msra.gmra.mrb[8].mxu1 %vm220_vm0, %v4000_v16  ;;  %3426 = vmatmul.mubr.msk.bf16.vlgmr.msra.gmra.mrb[8].mxu0 %vm220_vm0, %v4000_v16  ;;  %v685_v43 = vld [vmem:[%s6213_s2 + $0x300] sm:$0xff]  ;;  %v4361_v35 = vcombine.low %v638_v12, %v642_v14  ;;  %v603_v12 = vld [vmem:[%s6213_s2 + $0x70] sm:$0xff] }
  0x1e   :  { %1372 = vmatpush1.bf16.msra.mxu0 %v4065_v40  ;;  %453 = vmatpush1.bf16.msra.mxu1 %v3408_v39  ;;  %6502 = vst [vmem:[#allocation29_spill] sm:$0xff] %v4238_v29  ;;  %6504 = vst [vmem:[#allocation31_spill] sm:$0xff] %v4257_v37  ;;  %v697_v56 = vld [vmem:[%s6213_s2 + $0x360] sm:$0xff] }
  0x1f   :  { %1373 = vmatprep.subr.bf16.mxu0 %v4067_v41  ;;  %348 = vmatprep.mubr.bf16.mxu1 %v3931_v3  ;;  %v701_v8 = vld [vmem:[%s6213_s2 + $0x380] sm:$0xff]  ;;  %6519 = vst [vmem:[#allocation46_spill] sm:$0xff] %v4342_v24  ;;  %6521 = vst [vmem:[#allocation48_spill] sm:$0xff] %v4361_v35 }
  0x20   :  { %454 = vmatprep.subr.bf16.mxu1 %v3417_v44  ;;  %421 = vmatprep.mubr.bf16.mxu0 %v3931_v3  ;;  %v689_v44 = vld [vmem:[%s6213_s2 + $0x320] sm:$0xff] }
  0x21   :  { %v4289_v52 = vcombine.high %v685_v43, %v689_v44  ;;  %v4308_v63 = vcombine.low %v685_v43, %v689_v44  ;;  %v705_v9 = vld [vmem:[%s6213_s2 + $0x3a0] sm:$0xff]  ;;  %v658_v44 = vld [vmem:[%s6213_s2 + $0x228] sm:$0xff] }
  0x22   :  { %1374 = vmatpush1.bf16.msra.mxu0 %v4090_v47  ;;  %455 = vmatpush1.bf16.msra.mxu1 %v3416_v48  ;;  %v4340_v23 = vcombine.high %v701_v8, %v705_v9  ;;  %v713_v25 = vld [vmem:[%s6213_s2 + $0x3e0] sm:$0xff] }
  0x23   :  { %1375 = vmatprep.subr.bf16.mxu0 %v4094_v49  ;;  %1412 = vmatprep.subr.bf16.mxu1 %v4098_v50  ;;  %6510 = vst [vmem:[#allocation37_spill] sm:$0xff] %v4289_v52  ;;  %6512 = vst [vmem:[#allocation39_spill] sm:$0xff] %v4308_v63 }
  0x24   :  { %6518 = vst [vmem:[#allocation45_spill] sm:$0xff] %v4340_v23 }
  0x25   :  { %3423 = vmatmul.mubr.msk.bf16.gmra.mrb[12].mxu1 %vm220_vm0, %v4037_v32  ;;  %3427 = vmatmul.mubr.msk.bf16.gmra.mrb[12].mxu0 %vm220_vm0, %v4037_v32 }
  0x26   :  { %1376 = vmatpush1.bf16.msra.mxu0 %v4108_v53  ;;  %358 = vmatprep.mubr.bf16.mxu1 %v3931_v3 }
  0x27   :  { %1377 = vmatprep.subr.bf16.mxu0 %v4111_v54  ;;  %431 = vmatprep.mubr.bf16.mxu0 %v3931_v3 }
  0x2a   :  { %1378 = vmatpush1.bf16.msra.mxu0 %v4125_v57 }
  0x2b   :  { %1379 = vmatprep.subr.bf16.mxu0 %v4129_v58 }
  0x2d   :  { %3424 = vmatmul.mubr.msk.bf16.gmra.mrb[16].mxu1 %vm220_vm0, %v4005_v17  ;;  %3428 = vmatmul.mubr.msk.bf16.gmra.mrb[16].mxu0 %vm220_vm0, %v4005_v17 }
  0x2e   :  { %1380 = vmatpush1.bf16.msra.mxu0 %v4139_v61  ;;  %368 = vmatprep.mubr.bf16.mxu1 %v3931_v3 }
  0x2f   :  { %1381 = vmatprep.subr.bf16.mxu0 %v4142_v62  ;;  %441 = vmatprep.mubr.bf16.mxu0 %v3931_v3 }
  0x32   :  { %1382 = vmatpush1.bf16.msra.mxu0 %v4155_v1 }
  0x33   :  { %1383 = vmatprep.subr.bf16.mxu0 %v4159_v2 }
  0x35   :  { %3425 = vmatmul.mubr.msk.bf16.gmra.mrb[20].mxu1 %vm220_vm0, %v4042_v33  ;;  %3429 = vmatmul.mubr.msk.bf16.gmra.mrb[20].mxu0 %vm220_vm0, %v4042_v33 }
  0x36   :  { %1384 = vmatpush1.bf16.msra.mxu0 %v4169_v6  ;;  %484 = vmatprep.mubr.bf16.mxu1 %v3931_v3 }
  0x37   :  { %1385 = vmatprep.subr.bf16.mxu0 %v4172_v7  ;;  %1403 = vmatprep.mubr.bf16.mxu0 %v6218_v13 }
  0x3a   :  { %1386 = vmatpush1.bf16.msra.mxu0 %v4185_v10 }
  0x3b   :  { %1387 = vmatprep.subr.bf16.mxu0 %v4189_v11 }
  0x3d   :  { %3430 = vmatmul.mubr.msk.bf16.vlgmr.msra.gmra.mrb[24].mxu1 %vm220_vm0, %v4000_v16  ;;  %v677_v16 = vld [vmem:[%s6213_s2 + $0x2c0] sm:$0xff] }
  0x3e   :  { %1388 = vmatpush1.bf16.msra.mxu0 %v4205_v19  ;;  %1413 = vmatpush1.bf16.msra.mxu1 %v4209_v20  ;;  %v4263_v39 = vcombine.high %v677_v16, %v681_v31  ;;  %v4283_v48 = vcombine.low %v677_v16, %v681_v31  ;;  %v650_v16 = vld [vmem:[%s6213_s2 + $0x1e8] sm:$0xff]  ;;  %v4359_v31 = vcombine.low %v701_v8, %v705_v9  ;;  %v599_v9 = vld [vmem:[%s6213_s2 + $0x50] sm:$0xff] }
  0x3f   :  { %1389 = vmatprep.subr.bf16.mxu0 %v4212_v21  ;;  %1414 = vmatprep.subr.bf16.mxu1 %v4214_v22  ;;  %v4367_v43 = vcombine.high %v646_v26, %v650_v16  ;;  %v666_v8 = vld [vmem:[%s6213_s2 + $0x268] sm:$0xff] }
  0x40   :  { %494 = vmatprep.mubr.bf16.mxu1 %v3931_v3  ;;  %6506 = vst [vmem:[#allocation33_spill] sm:$0xff] %v4263_v39  ;;  %6508 = vst [vmem:[#allocation35_spill] sm:$0xff] %v4283_v48 }
  0x41   :  { %6520 = vst [vmem:[#allocation47_spill] sm:$0xff] %v4359_v31  ;;  %6523 = vst [vmem:[#allocation50_spill] sm:$0xff] %v4367_v43 }
  0x42   :  { %1390 = vmatpush1.bf16.msra.mxu0 %v4232_v27  ;;  %1415 = vmatpush1.bf16.msra.mxu1 %v4234_v28 }
  0x43   :  { %1391 = vmatprep.subr.bf16.mxu0 %v4238_v29  ;;  %1416 = vmatprep.subr.bf16.mxu1 %v4240_v30 }
  0x45   :  { %3431 = vmatmul.mubr.msk.bf16.gmra.mrb[28].mxu1 %vm220_vm0, %v4037_v32  ;;  %v693_v32 = vld [vmem:[%s6213_s2 + $0x340] sm:$0xff] }
  0x46   :  { %1392 = vmatpush1.bf16.msra.mxu0 %v4257_v37  ;;  %1417 = vmatpush1.bf16.msra.mxu1 %v4259_v38  ;;  %v4314_v4 = vcombine.high %v693_v32, %v697_v56  ;;  %v4334_v15 = vcombine.low %v693_v32, %v697_v56  ;;  %v4387_v56 = vcombine.low %v646_v26, %v650_v16  ;;  %v670_v16 = vld [vmem:[%s6213_s2 + $0x288] sm:$0xff] }
  0x47   :  { %1393 = vmatprep.subr.bf16.mxu0 %v4263_v39  ;;  %1418 = vmatprep.subr.bf16.mxu1 %v4265_v42  ;;  %v4418_v26 = vcombine.high %v599_v9, %v603_v12 }
  0x48   :  { %504 = vmatprep.mubr.bf16.mxu1 %v3931_v3  ;;  %6514 = vst [vmem:[#allocation41_spill] sm:$0xff] %v4314_v4  ;;  %6516 = vst [vmem:[#allocation43_spill] sm:$0xff] %v4334_v15 }
  0x49   :  { %6525 = vst [vmem:[#allocation52_spill] sm:$0xff] %v4387_v56  ;;  %6531 = vst [vmem:[#allocation58_spill] sm:$0xff] %v4418_v26 }
  0x4a   :  { %1394 = vmatpush1.bf16.msra.mxu0 %v4283_v48  ;;  %1419 = vmatpush1.bf16.msra.mxu1 %v4285_v51 }
  0x4b   :  { %1395 = vmatprep.subr.bf16.mxu0 %v4289_v52  ;;  %1420 = vmatprep.subr.bf16.mxu1 %v4291_v55 }
  0x4d   :  { %3432 = vmatmul.mubr.msk.bf16.gmra.mrb[32].mxu1 %vm220_vm0, %v4005_v17  ;;  %v709_v17 = vld [vmem:[%s6213_s2 + $0x3c0] sm:$0xff] }
  0x4e   :  { %1396 = vmatpush1.bf16.msra.mxu0 %v4308_v63  ;;  %1421 = vmatpush1.bf16.msra.mxu1 %v4310_v0  ;;  %v4365_v36 = vcombine.high %v709_v17, %v713_v25  ;;  %v4385_v32 = vcombine.low %v709_v17, %v713_v25  ;;  %v4412_v17 = vcombine.low %v591_v45, %v595_v46  ;;  %v6532_v45 = vmov 0.0|0.0  }
  0x4f   :  { %1397 = vmatprep.subr.bf16.mxu0 %v4314_v4  ;;  %1422 = vmatprep.subr.bf16.mxu1 %v4316_v5 }
  0x50   :  { %514 = vmatprep.mubr.bf16.mxu1 %v3931_v3  ;;  %6522 = vst [vmem:[#allocation49_spill] sm:$0xff] %v4365_v36  ;;  %v654_v3 = vld [vmem:[%s6213_s2 + $0x208] sm:$0xff]  ;;  %6524 = vst [vmem:[#allocation51_spill] sm:$0xff] %v4385_v32 }
  0x51   :  { %v4391_v59 = vcombine.high %v654_v3, %v658_v44  ;;  %v4410_v14 = vcombine.low %v654_v3, %v658_v44  ;;  %6529 = vst [vmem:[#allocation56_spill] sm:$0xff] %v4412_v17  ;;  %v607_v3 = vld [vmem:[%s6213_s2 + $0x90] sm:$0xff] }
  0x52   :  { %1398 = vmatpush1.bf16.msra.mxu0 %v4334_v15  ;;  %1423 = vmatpush1.bf16.msra.mxu1 %v4336_v18  ;;  %v611_v44 = vld [vmem:[%s6213_s2 + $0xb0] sm:$0xff] }
  0x53   :  { %1399 = vmatprep.subr.bf16.mxu0 %v4340_v23  ;;  %1424 = vmatprep.subr.bf16.mxu1 %v4342_v24  ;;  %6526 = vst [vmem:[#allocation53_spill] sm:$0xff] %v4391_v59  ;;  %6528 = vst [vmem:[#allocation55_spill] sm:$0xff] %v4410_v14 }
  0x55   :  { %3433 = vmatmul.mubr.msk.bf16.gmra.mrb[36].mxu1 %vm220_vm0, %v4042_v33  ;;  %v662_v33 = vld [vmem:[%s6213_s2 + $0x248] sm:$0xff] }
  0x56   :  { %1400 = vmatpush1.bf16.msra.mxu0 %v4359_v31  ;;  %1425 = vmatpush1.bf16.msra.mxu1 %v4361_v35  ;;  %v4416_v25 = vcombine.high %v662_v33, %v666_v8  ;;  %v4435_v46 = vcombine.low %v662_v33, %v666_v8  ;;  %v615_v33 = vld [vmem:[%s6213_s2 + $0xd0] sm:$0xff] }
  0x57   :  { %1401 = vmatprep.subr.bf16.mxu0 %v4365_v36  ;;  %1426 = vmatprep.subr.bf16.mxu1 %v4367_v43  ;;  %v619_v8 = vld [vmem:[%s6213_s2 + $0xf0] sm:$0xff] }
  0x58   :  { %1444 = vmatprep.mubr.bf16.mxu1 %v6218_v13  ;;  %6530 = vst [vmem:[#allocation57_spill] sm:$0xff] %v4416_v25  ;;  %v674_v13 = vld [vmem:[%s6213_s2 + $0x2a8] sm:$0xff]  ;;  %6533 = vst [vmem:[#allocation59_spill] sm:$0xff] %v4435_v46 }
  0x5a   :  { %1402 = vmatpush1.bf16.msra.mxu0 %v4385_v32  ;;  %1427 = vmatpush1.bf16.msra.mxu1 %v4387_v56  ;;  %v4443_v32 = vcombine.high %v607_v3, %v611_v44  ;;  %v678_v56 = vld [vmem:[%s6213_s2 + $0x2c8] sm:$0xff] }
  0x5b   :  { %1428 = vmatprep.subr.bf16.mxu1 %v4391_v59  ;;  %1453 = vmatprep.subr.bf16.mxu0 %v4393_v60  ;;  %v4437_v60 = vcombine.low %v599_v9, %v603_v12  ;;  %v4441_v59 = vcombine.high %v670_v16, %v674_v13  ;;  %v4460_v9 = vcombine.low %v670_v16, %v674_v13  ;;  %v623_v13 = vld [vmem:[%s6213_s2 + $0x110] sm:$0xff] }
  0x5c   :  { %6536 = vst [vmem:[#allocation62_spill] sm:$0xff] %v4443_v32  ;;  %v4462_v12 = vcombine.low %v607_v3, %v611_v44  ;;  %v627_v16 = vld [vmem:[%s6213_s2 + $0x130] sm:$0xff]  ;;  %v4486_v44 = vcombine.low %v615_v33, %v619_v8 }
  0x5d   :  { %1404 = vmatmul.mubr.bf16.vlgmr.msra.gmra.mrb[24].mxu0 %v6532_v45  ;;  %6534 = vst [vmem:[#allocation60_spill] sm:$0xff] %v4437_v60  ;;  %6535 = vst [vmem:[#allocation61_spill] sm:$0xff] %v4441_v59 }
  0x5e   :  { %1429 = vmatpush1.bf16.msra.mxu1 %v4410_v14  ;;  %1454 = vmatpush1.bf16.msra.mxu0 %v4412_v17  ;;  %v682_v17 = vld [vmem:[%s6213_s2 + $0x2e8] sm:$0xff]  ;;  %6537 = vst [vmem:[#allocation63_spill] sm:$0xff] %v4460_v9  ;;  %6538 = vst [vmem:[#allocation64_spill] sm:$0xff] %v4462_v12 }
  0x5f   :  { %1430 = vmatprep.subr.bf16.mxu1 %v4416_v25  ;;  %1455 = vmatprep.subr.bf16.mxu0 %v4418_v26  ;;  %v4466_v26 = vcombine.high %v678_v56, %v682_v17  ;;  %v4468_v25 = vcombine.high %v615_v33, %v619_v8  ;;  %v686_v14 = vld [vmem:[%s6213_s2 + $0x308] sm:$0xff]  ;;  %v4484_v3 = vcombine.low %v678_v56, %v682_v17  ;;  %v631_v56 = vld [vmem:[%s6213_s2 + $0x150] sm:$0xff] }
  0x60   :  { %1485 = vmatprep.mubr.bf16.mxu0 %v6532_v45  ;;  %6542 = vst [vmem:[#allocation68_spill] sm:$0xff] %v4486_v44  ;;  %v635_v17 = vld [vmem:[%s6213_s2 + $0x170] sm:$0xff]  ;;  %v4510_v8 = vcombine.low %v623_v13, %v627_v16 }
  0x61   :  { %6539 = vst [vmem:[#allocation65_spill] sm:$0xff] %v4466_v26  ;;  %6540 = vst [vmem:[#allocation66_spill] sm:$0xff] %v4468_v25 }
  0x62   :  { %1431 = vmatpush1.bf16.msra.mxu1 %v4435_v46  ;;  %1456 = vmatpush1.bf16.msra.mxu0 %v4437_v60  ;;  %v690_v60 = vld [vmem:[%s6213_s2 + $0x328] sm:$0xff]  ;;  %6541 = vst [vmem:[#allocation67_spill] sm:$0xff] %v4484_v3  ;;  %6546 = vst [vmem:[#allocation72_spill] sm:$0xff] %v4510_v8 }
  0x63   :  { %1432 = vmatprep.subr.bf16.mxu1 %v4441_v59  ;;  %1457 = vmatprep.subr.bf16.mxu0 %v4443_v32  ;;  %v4490_v32 = vcombine.high %v686_v14, %v690_v60  ;;  %v4492_v59 = vcombine.high %v623_v13, %v627_v16  ;;  %v694_v46 = vld [vmem:[%s6213_s2 + $0x348] sm:$0xff]  ;;  %v4508_v33 = vcombine.low %v686_v14, %v690_v60  ;;  %v639_v60 = vld [vmem:[%s6213_s2 + $0x190] sm:$0xff] }
  0x64   :  { %v643_v14 = vld [vmem:[%s6213_s2 + $0x1b0] sm:$0xff]  ;;  %v4534_v16 = vcombine.low %v631_v56, %v635_v17 }
  0x65   :  { %6543 = vst [vmem:[#allocation69_spill] sm:$0xff] %v4490_v32  ;;  %6544 = vst [vmem:[#allocation70_spill] sm:$0xff] %v4492_v59 }
  0x66   :  { %1433 = vmatpush1.bf16.msra.mxu1 %v4460_v9  ;;  %1458 = vmatpush1.bf16.msra.mxu0 %v4462_v12  ;;  %v698_v12 = vld [vmem:[%s6213_s2 + $0x368] sm:$0xff]  ;;  %6545 = vst [vmem:[#allocation71_spill] sm:$0xff] %v4508_v33  ;;  %6550 = vst [vmem:[#allocation76_spill] sm:$0xff] %v4534_v16 }
  0x67   :  { %1434 = vmatprep.subr.bf16.mxu1 %v4466_v26  ;;  %1459 = vmatprep.subr.bf16.mxu0 %v4468_v25  ;;  %v4514_v25 = vcombine.high %v694_v46, %v698_v12  ;;  %v4516_v26 = vcombine.high %v631_v56, %v635_v17  ;;  %v702_v9 = vld [vmem:[%s6213_s2 + $0x388] sm:$0xff]  ;;  %v4532_v13 = vcombine.low %v694_v46, %v698_v12  ;;  %v647_v46 = vld [vmem:[%s6213_s2 + $0x1d0] sm:$0xff] }
  0x68   :  { %v651_v12 = vld [vmem:[%s6213_s2 + $0x1f0] sm:$0xff]  ;;  %v4558_v17 = vcombine.low %v639_v60, %v643_v14 }
  0x69   :  { %6547 = vst [vmem:[#allocation73_spill] sm:$0xff] %v4514_v25  ;;  %6548 = vst [vmem:[#allocation74_spill] sm:$0xff] %v4516_v26 }
  0x6a   :  { %1435 = vmatpush1.bf16.msra.mxu1 %v4484_v3  ;;  %1460 = vmatpush1.bf16.msra.mxu0 %v4486_v44  ;;  %v706_v44 = vld [vmem:[%s6213_s2 + $0x3a8] sm:$0xff]  ;;  %6549 = vst [vmem:[#allocation75_spill] sm:$0xff] %v4532_v13  ;;  %6554 = vst [vmem:[#allocation80_spill] sm:$0xff] %v4558_v17 }
  0x6b   :  { %1436 = vmatprep.subr.bf16.mxu1 %v4490_v32  ;;  %1461 = vmatprep.subr.bf16.mxu0 %v4492_v59  ;;  %v4538_v59 = vcombine.high %v702_v9, %v706_v44  ;;  %v4540_v32 = vcombine.high %v639_v60, %v643_v14  ;;  %v710_v3 = vld [vmem:[%s6213_s2 + $0x3c8] sm:$0xff]  ;;  %v4556_v56 = vcombine.low %v702_v9, %v706_v44  ;;  %v592_v9 = vld [vmem:[%s6213_s2 + $0x18] sm:$0xff] }
  0x6c   :  { %v596_v44 = vld [vmem:[%s6213_s2 + $0x38] sm:$0xff]  ;;  %v4582_v14 = vcombine.low %v647_v46, %v651_v12 }
  0x6d   :  { %6551 = vst [vmem:[#allocation77_spill] sm:$0xff] %v4538_v59  ;;  %6552 = vst [vmem:[#allocation78_spill] sm:$0xff] %v4540_v32 }
  0x6e   :  { %1437 = vmatpush1.bf16.msra.mxu1 %v4508_v33  ;;  %1462 = vmatpush1.bf16.msra.mxu0 %v4510_v8  ;;  %v714_v8 = vld [vmem:[%s6213_s2 + $0x3e8] sm:$0xff]  ;;  %6553 = vst [vmem:[#allocation79_spill] sm:$0xff] %v4556_v56  ;;  %v655_v33 = vld [vmem:[%s6213_s2 + $0x210] sm:$0xff]  ;;  %6558 = vst [vmem:[#allocation84_spill] sm:$0xff] %v4582_v14 }
  0x6f   :  { %1438 = vmatprep.subr.bf16.mxu1 %v4514_v25  ;;  %1463 = vmatprep.subr.bf16.mxu0 %v4516_v26  ;;  %v4562_v26 = vcombine.high %v710_v3, %v714_v8  ;;  %v4564_v25 = vcombine.high %v647_v46, %v651_v12  ;;  %v4580_v60 = vcombine.low %v710_v3, %v714_v8  ;;  %v600_v3 = vld [vmem:[%s6213_s2 + $0x58] sm:$0xff] }
  0x70   :  { %v604_v8 = vld [vmem:[%s6213_s2 + $0x78] sm:$0xff]  ;;  %v4606_v12 = vcombine.low %v592_v9, %v596_v44 }
  0x71   :  { %6555 = vst [vmem:[#allocation81_spill] sm:$0xff] %v4562_v26  ;;  %6556 = vst [vmem:[#allocation82_spill] sm:$0xff] %v4564_v25 }
  0x72   :  { %1439 = vmatpush1.bf16.msra.mxu1 %v4532_v13  ;;  %1464 = vmatpush1.bf16.msra.mxu0 %v4534_v16  ;;  %v659_v16 = vld [vmem:[%s6213_s2 + $0x230] sm:$0xff]  ;;  %6557 = vst [vmem:[#allocation83_spill] sm:$0xff] %v4580_v60  ;;  %6562 = vst [vmem:[#allocation88_spill] sm:$0xff] %v4606_v12 }
  0x73   :  { %1440 = vmatprep.subr.bf16.mxu1 %v4538_v59  ;;  %1465 = vmatprep.subr.bf16.mxu0 %v4540_v32  ;;  %v4586_v32 = vcombine.high %v655_v33, %v659_v16  ;;  %v4588_v59 = vcombine.high %v592_v9, %v596_v44  ;;  %v663_v13 = vld [vmem:[%s6213_s2 + $0x250] sm:$0xff]  ;;  %v4604_v46 = vcombine.low %v655_v33, %v659_v16  ;;  %v608_v33 = vld [vmem:[%s6213_s2 + $0x98] sm:$0xff] }
  0x74   :  { %v612_v16 = vld [vmem:[%s6213_s2 + $0xb8] sm:$0xff]  ;;  %v4631_v44 = vcombine.low %v600_v3, %v604_v8 }
  0x75   :  { %6559 = vst [vmem:[#allocation85_spill] sm:$0xff] %v4586_v32  ;;  %6560 = vst [vmem:[#allocation86_spill] sm:$0xff] %v4588_v59 }
  0x76   :  { %1441 = vmatpush1.bf16.msra.mxu1 %v4556_v56  ;;  %1466 = vmatpush1.bf16.msra.mxu0 %v4558_v17  ;;  %v667_v17 = vld [vmem:[%s6213_s2 + $0x270] sm:$0xff]  ;;  %6561 = vst [vmem:[#allocation87_spill] sm:$0xff] %v4604_v46  ;;  %6566 = vst [vmem:[#allocation92_spill] sm:$0xff] %v4631_v44 }
  0x77   :  { %1442 = vmatprep.subr.bf16.mxu1 %v4562_v26  ;;  %1467 = vmatprep.subr.bf16.mxu0 %v4564_v25  ;;  %v4610_v25 = vcombine.high %v663_v13, %v667_v17  ;;  %v4612_v26 = vcombine.high %v600_v3, %v604_v8  ;;  %v671_v56 = vld [vmem:[%s6213_s2 + $0x290] sm:$0xff]  ;;  %v4629_v9 = vcombine.low %v663_v13, %v667_v17  ;;  %v616_v13 = vld [vmem:[%s6213_s2 + $0xd8] sm:$0xff] }
  0x78   :  { %v620_v17 = vld [vmem:[%s6213_s2 + $0xf8] sm:$0xff]  ;;  %v4656_v8 = vcombine.low %v608_v33, %v612_v16 }
  0x79   :  { %6563 = vst [vmem:[#allocation89_spill] sm:$0xff] %v4610_v25  ;;  %6564 = vst [vmem:[#allocation90_spill] sm:$0xff] %v4612_v26 }
  0x7a   :  { %1443 = vmatpush1.bf16.msra.mxu1 %v4580_v60  ;;  %1468 = vmatpush1.bf16.msra.mxu0 %v4582_v14  ;;  %v675_v14 = vld [vmem:[%s6213_s2 + $0x2b0] sm:$0xff]  ;;  %6565 = vst [vmem:[#allocation91_spill] sm:$0xff] %v4629_v9  ;;  %6570 = vst [vmem:[#allocation96_spill] sm:$0xff] %v4656_v8 }
  0x7b   :  { %1469 = vmatprep.subr.bf16.mxu0 %v4586_v32  ;;  %1494 = vmatprep.subr.bf16.mxu1 %v4588_v59  ;;  %v4635_v32 = vcombine.high %v671_v56, %v675_v14  ;;  %v4637_v59 = vcombine.high %v608_v33, %v612_v16  ;;  %v679_v60 = vld [vmem:[%s6213_s2 + $0x2d0] sm:$0xff]  ;;  %v4654_v3 = vcombine.low %v671_v56, %v675_v14  ;;  %v624_v56 = vld [vmem:[%s6213_s2 + $0x118] sm:$0xff] }
  0x7c   :  { %v628_v14 = vld [vmem:[%s6213_s2 + $0x138] sm:$0xff]  ;;  %v4680_v16 = vcombine.low %v616_v13, %v620_v17 }
  0x7d   :  { %1445 = vmatmul.mubr.bf16.vlgmr.msra.gmra.mrb[40].mxu1 %v6532_v45  ;;  %6567 = vst [vmem:[#allocation93_spill] sm:$0xff] %v4635_v32  ;;  %6568 = vst [vmem:[#allocation94_spill] sm:$0xff] %v4637_v59 }
  0x7e   :  { %1470 = vmatpush1.bf16.msra.mxu0 %v4604_v46  ;;  %1495 = vmatpush1.bf16.msra.mxu1 %v4606_v12  ;;  %v683_v46 = vld [vmem:[%s6213_s2 + $0x2f0] sm:$0xff]  ;;  %6569 = vst [vmem:[#allocation95_spill] sm:$0xff] %v4654_v3  ;;  %6574 = vst [vmem:[#allocation100_spill] sm:$0xff] %v4680_v16 }
  0x7f   :  { %1471 = vmatprep.subr.bf16.mxu0 %v4610_v25  ;;  %1496 = vmatprep.subr.bf16.mxu1 %v4612_v26  ;;  %v4660_v25 = vcombine.high %v679_v60, %v683_v46  ;;  %v4662_v26 = vcombine.high %v616_v13, %v620_v17  ;;  %v687_v12 = vld [vmem:[%s6213_s2 + $0x310] sm:$0xff]  ;;  %v4678_v33 = vcombine.low %v679_v60, %v683_v46  ;;  %v632_v60 = vld [vmem:[%s6213_s2 + $0x158] sm:$0xff] }
  0x80   :  { %1526 = vmatprep.mubr.bf16.mxu1 %v6532_v45  ;;  %v636_v46 = vld [vmem:[%s6213_s2 + $0x178] sm:$0xff]  ;;  %v4704_v17 = vcombine.low %v624_v56, %v628_v14 }
  0x81   :  { %6571 = vst [vmem:[#allocation97_spill] sm:$0xff] %v4660_v25  ;;  %6572 = vst [vmem:[#allocation98_spill] sm:$0xff] %v4662_v26 }
  0x82   :  { %1472 = vmatpush1.bf16.msra.mxu0 %v4629_v9  ;;  %1497 = vmatpush1.bf16.msra.mxu1 %v4631_v44  ;;  %v691_v9 = vld [vmem:[%s6213_s2 + $0x330] sm:$0xff]  ;;  %6573 = vst [vmem:[#allocation99_spill] sm:$0xff] %v4678_v33  ;;  %6578 = vst [vmem:[#allocation104_spill] sm:$0xff] %v4704_v17 }
  0x83   :  { %1473 = vmatprep.subr.bf16.mxu0 %v4635_v32  ;;  %1498 = vmatprep.subr.bf16.mxu1 %v4637_v59  ;;  %v4684_v32 = vcombine.high %v687_v12, %v691_v9  ;;  %v4686_v59 = vcombine.high %v624_v56, %v628_v14  ;;  %v695_v44 = vld [vmem:[%s6213_s2 + $0x350] sm:$0xff]  ;;  %v4702_v13 = vcombine.low %v687_v12, %v691_v9  ;;  %v640_v12 = vld [vmem:[%s6213_s2 + $0x198] sm:$0xff] }
  0x84   :  { %v644_v9 = vld [vmem:[%s6213_s2 + $0x1b8] sm:$0xff]  ;;  %v4728_v14 = vcombine.low %v632_v60, %v636_v46 }
  0x85   :  { %6575 = vst [vmem:[#allocation101_spill] sm:$0xff] %v4684_v32  ;;  %6576 = vst [vmem:[#allocation102_spill] sm:$0xff] %v4686_v59 }
  0x86   :  { %1474 = vmatpush1.bf16.msra.mxu0 %v4654_v3  ;;  %1499 = vmatpush1.bf16.msra.mxu1 %v4656_v8  ;;  %v699_v3 = vld [vmem:[%s6213_s2 + $0x370] sm:$0xff]  ;;  %6577 = vst [vmem:[#allocation103_spill] sm:$0xff] %v4702_v13 }
  0x87   :  { %1475 = vmatprep.subr.bf16.mxu0 %v4660_v25  ;;  %1500 = vmatprep.subr.bf16.mxu1 %v4662_v26  ;;  %v4708_v25 = vcombine.high %v695_v44, %v699_v3  ;;  %v4710_v26 = vcombine.high %v632_v60, %v636_v46  ;;  %v703_v8 = vld [vmem:[%s6213_s2 + $0x390] sm:$0xff]  ;;  %v4726_v56 = vcombine.low %v695_v44, %v699_v3  ;;  %v648_v44 = vld [vmem:[%s6213_s2 + $0x1d8] sm:$0xff] }
  0x88   :  { %v652_v3 = vld [vmem:[%s6213_s2 + $0x1f8] sm:$0xff]  ;;  %v4752_v46 = vcombine.low %v640_v12, %v644_v9 }
  0x89   :  { %6579 = vst [vmem:[#allocation105_spill] sm:$0xff] %v4708_v25  ;;  %6580 = vst [vmem:[#allocation106_spill] sm:$0xff] %v4710_v26 }
  0x8a   :  { %1476 = vmatpush1.bf16.msra.mxu0 %v4678_v33  ;;  %1501 = vmatpush1.bf16.msra.mxu1 %v4680_v16  ;;  %v707_v33 = vld [vmem:[%s6213_s2 + $0x3b0] sm:$0xff]  ;;  %6581 = vst [vmem:[#allocation107_spill] sm:$0xff] %v4726_v56  ;;  %6584 = vst [vmem:[#allocation110_spill] sm:$0xff] %v4752_v46 }
  0x8b   :  { %1477 = vmatprep.subr.bf16.mxu0 %v4684_v32  ;;  %1502 = vmatprep.subr.bf16.mxu1 %v4686_v59  ;;  %v4732_v32 = vcombine.high %v703_v8, %v707_v33  ;;  %v4734_v59 = vcombine.high %v640_v12, %v644_v9  ;;  %v711_v16 = vld [vmem:[%s6213_s2 + $0x3d0] sm:$0xff]  ;;  %v4750_v60 = vcombine.low %v703_v8, %v707_v33  ;;  %v664_v9 = vld [vmem:[%s6213_s2 + $0x258] sm:$0xff] }
  0x8c   :  { %v4770_v33 = vcombine.low %v648_v44, %v652_v3 }
  0x8d   :  { %6582 = vst [vmem:[#allocation108_spill] sm:$0xff] %v4732_v32  ;;  %6583 = vst [vmem:[#allocation109_spill] sm:$0xff] %v4750_v60 }
  0x8e   :  { %1478 = vmatpush1.bf16.msra.mxu0 %v4702_v13  ;;  %1503 = vmatpush1.bf16.msra.mxu1 %v4704_v17  ;;  %v715_v13 = vld [vmem:[%s6213_s2 + $0x3f0] sm:$0xff]  ;;  %v656_v17 = vld [vmem:[%s6213_s2 + $0x218] sm:$0xff]  ;;  %6588 = vst [vmem:[#allocation114_spill] sm:$0xff] %v4770_v33 }
  0x8f   :  { %1479 = vmatprep.subr.bf16.mxu0 %v4708_v25  ;;  %1504 = vmatprep.subr.bf16.mxu1 %v4710_v26  ;;  %v4756_v25 = vcombine.high %v711_v16, %v715_v13  ;;  %v4758_v26 = vcombine.high %v648_v44, %v652_v3  ;;  %v4768_v8 = vcombine.low %v711_v16, %v715_v13  ;;  %v672_v44 = vld [vmem:[%s6213_s2 + $0x298] sm:$0xff] }
  0x90   :  { %v676_v3 = vld [vmem:[%s6213_s2 + $0x2b8] sm:$0xff] }
  0x91   :  { %6585 = vst [vmem:[#allocation111_spill] sm:$0xff] %v4756_v25  ;;  %6586 = vst [vmem:[#allocation112_spill] sm:$0xff] %v4758_v26 }
  0x92   :  { %1480 = vmatpush1.bf16.msra.mxu0 %v4726_v56  ;;  %1505 = vmatpush1.bf16.msra.mxu1 %v4728_v14  ;;  %v660_v56 = vld [vmem:[%s6213_s2 + $0x238] sm:$0xff]  ;;  %6587 = vst [vmem:[#allocation113_spill] sm:$0xff] %v4768_v8 }
  0x93   :  { %1481 = vmatprep.subr.bf16.mxu0 %v4732_v32  ;;  %1506 = vmatprep.subr.bf16.mxu1 %v4734_v59  ;;  %v4774_v12 = vcombine.high %v656_v17, %v660_v56  ;;  %v4784_v16 = vcombine.low %v656_v17, %v660_v56  ;;  %v4802_v56 = vcombine.high %v672_v44, %v676_v3 }
  0x95   :  { %6589 = vst [vmem:[#allocation115_spill] sm:$0xff] %v4774_v12  ;;  %6590 = vst [vmem:[#allocation116_spill] sm:$0xff] %v4784_v16 }
  0x96   :  { %1482 = vmatpush1.bf16.msra.mxu0 %v4750_v60  ;;  %1507 = vmatpush1.bf16.msra.mxu1 %v4752_v46  ;;  %v668_v60 = vld [vmem:[%s6213_s2 + $0x278] sm:$0xff]  ;;  %6593 = vst [vmem:[#allocation119_spill] sm:$0xff] %v4802_v56 }
  0x97   :  { %1483 = vmatprep.subr.bf16.mxu0 %v4756_v25  ;;  %1508 = vmatprep.subr.bf16.mxu1 %v4758_v26  ;;  %v4787_v13 = vcombine.high %v664_v9, %v668_v60  ;;  %v4798_v17 = vcombine.low %v664_v9, %v668_v60  ;;  %v4812_v60 = vcombine.low %v672_v44, %v676_v3 }
  0x99   :  { %6591 = vst [vmem:[#allocation117_spill] sm:$0xff] %v4787_v13  ;;  %6592 = vst [vmem:[#allocation118_spill] sm:$0xff] %v4798_v17 }
  0x9a   :  { %1484 = vmatpush1.bf16.msra.mxu0 %v4768_v8  ;;  %1509 = vmatpush1.bf16.msra.mxu1 %v4770_v33  ;;  %v684_v8 = vld [vmem:[%s6213_s2 + $0x2f8] sm:$0xff]  ;;  %6594 = vst [vmem:[#allocation120_spill] sm:$0xff] %v4812_v60 }
  0x9b   :  { %1510 = vmatprep.subr.bf16.mxu1 %v4774_v12  ;;  %1601 = vmatprep.subr.bf16.mxu0 %v4044_v34  ;;  %v680_v34 = vld [vmem:[%s6213_s2 + $0x2d8] sm:$0xff] }
  0x9c   :  { %v4816_v9 = vcombine.high %v680_v34, %v684_v8  ;;  %v4826_v44 = vcombine.low %v680_v34, %v684_v8 }
  0x9d   :  { %1486 = vmatmul.mubr.bf16.vlgmr.msra.gmra.mrb[28].mxu0 %v6532_v45 }
  0x9e   :  { %1511 = vmatpush1.bf16.msra.mxu1 %v4784_v16  ;;  %1602 = vmatpush1.bf16.msra.mxu0 %v4065_v40  ;;  %6595 = vst [vmem:[#allocation121_spill] sm:$0xff] %v4816_v9  ;;  %v692_v40 = vld [vmem:[%s6213_s2 + $0x338] sm:$0xff]  ;;  %6596 = vst [vmem:[#allocation122_spill] sm:$0xff] %v4826_v44 }
  0x9f   :  { %1512 = vmatprep.subr.bf16.mxu1 %v4787_v13  ;;  %1603 = vmatprep.subr.bf16.mxu0 %v4067_v41  ;;  %v688_v41 = vld [vmem:[%s6213_s2 + $0x318] sm:$0xff] }
  0xa0   :  { %v4830_v3 = vcombine.high %v688_v41, %v692_v40  ;;  %v4840_v34 = vcombine.low %v688_v41, %v692_v40 }
  0xa2   :  { %1513 = vmatpush1.bf16.msra.mxu1 %v4798_v17  ;;  %1604 = vmatpush1.bf16.msra.mxu0 %v4090_v47  ;;  %6597 = vst [vmem:[#allocation123_spill] sm:$0xff] %v4830_v3  ;;  %v700_v47 = vld [vmem:[%s6213_s2 + $0x378] sm:$0xff]  ;;  %6598 = vst [vmem:[#allocation124_spill] sm:$0xff] %v4840_v34 }
  0xa3   :  { %1514 = vmatprep.subr.bf16.mxu1 %v4802_v56  ;;  %1605 = vmatprep.subr.bf16.mxu0 %v4094_v49  ;;  %v696_v49 = vld [vmem:[%s6213_s2 + $0x358] sm:$0xff] }
  0xa4   :  { %v4844_v8 = vcombine.high %v696_v49, %v700_v47  ;;  %v4854_v40 = vcombine.low %v696_v49, %v700_v47 }
  0xa6   :  { %1515 = vmatpush1.bf16.msra.mxu1 %v4812_v60  ;;  %1606 = vmatpush1.bf16.msra.mxu0 %v4108_v53  ;;  %6599 = vst [vmem:[#allocation125_spill] sm:$0xff] %v4844_v8  ;;  %v708_v53 = vld [vmem:[%s6213_s2 + $0x3b8] sm:$0xff]  ;;  %6600 = vst [vmem:[#allocation126_spill] sm:$0xff] %v4854_v40 }
  0xa7   :  { %1516 = vmatprep.subr.bf16.mxu1 %v4816_v9  ;;  %1607 = vmatprep.subr.bf16.mxu0 %v4111_v54  ;;  %v704_v54 = vld [vmem:[%s6213_s2 + $0x398] sm:$0xff] }
  0xa8   :  { %v4858_v41 = vcombine.high %v704_v54, %v708_v53  ;;  %v4868_v47 = vcombine.low %v704_v54, %v708_v53  ;;  %v80_v53 = vlaneseq }
  0xaa   :  { %1517 = vmatpush1.bf16.msra.mxu1 %v4826_v44  ;;  %1608 = vmatpush1.bf16.msra.mxu0 %v4125_v57  ;;  %6601 = vst [vmem:[#allocation127_spill] sm:$0xff] %v4858_v41  ;;  %v716_v57 = vld [vmem:[%s6213_s2 + $0x3f8] sm:$0xff]  ;;  %6602 = vst [vmem:[#allocation128_spill] sm:$0xff] %v4868_v47  ;;  %v4910_v54 = vshrl.u32 %v80_v53, 7  ;;  %v6606_v53 = vld [vmem:[#allocation51_spill] sm:$0xff] }
  0xab   :  { %1518 = vmatprep.subr.bf16.mxu1 %v4830_v3  ;;  %1609 = vmatprep.subr.bf16.mxu0 %v4129_v58  ;;  %v712_v58 = vld [vmem:[%s6213_s2 + $0x3d8] sm:$0xff] }
  0xac   :  { %v4872_v49 = vcombine.high %v712_v58, %v716_v57 }
  0xae   :  { %1519 = vmatpush1.bf16.msra.mxu1 %v4840_v34  ;;  %1610 = vmatpush1.bf16.msra.mxu0 %v4139_v61  ;;  %6603 = vst [vmem:[#allocation129_spill] sm:$0xff] %v4872_v49 }
  0xaf   :  { %1520 = vmatprep.subr.bf16.mxu1 %v4844_v8  ;;  %1611 = vmatprep.subr.bf16.mxu0 %v4142_v62  ;;  %v4876_v62 = vcombine.low %v712_v58, %v716_v57  ;;  %v82_v57 = vsub.s32 0, %v4910_v54  ;;  %v4920_v58 = vld [vmem:[%s6214_s3] sm:$0xff] }
  0xb1   :  { %6604 = vst [vmem:[#allocation130_spill] sm:$0xff] %v4876_v62 }
  0xb2   :  { %1521 = vmatpush1.bf16.msra.mxu1 %v4854_v40  ;;  %1612 = vmatpush1.bf16.msra.mxu0 %v4155_v1 }
  0xb3   :  { %1522 = vmatprep.subr.bf16.mxu1 %v4858_v41  ;;  %1613 = vmatprep.subr.bf16.mxu0 %v4159_v2 }
  0xb6   :  { %1523 = vmatpush1.bf16.msra.mxu1 %v4868_v47  ;;  %1614 = vmatpush1.bf16.msra.mxu0 %v4169_v6  ;;  %v6639_v6 = vld [vmem:[#allocation79_spill] sm:$0xff] }
  0xb7   :  { %1524 = vmatprep.subr.bf16.mxu1 %v4872_v49  ;;  %1615 = vmatprep.subr.bf16.mxu0 %v4172_v7  ;;  %v6636_v7 = vld [vmem:[#allocation77_spill] sm:$0xff] }
  0xba   :  { %1525 = vmatpush1.bf16.msra.mxu1 %v4876_v62  ;;  %1616 = vmatpush1.bf16.msra.mxu0 %v4185_v10 }
  0xbb   :  { %1642 = vmatprep.subr.bf16.mxu1 %v4098_v50  ;;  %1617 = vmatprep.subr.bf16.mxu0 %v4189_v11  ;;  %v6628_v11 = vld [vmem:[#allocation69_spill] sm:$0xff] }
  0xbd   :  { %1527 = vmatmul.mubr.bf16.vlgmr.msra.gmra.mrb[44].mxu1 %v6532_v45  ;;  %v86_v45 = vsub.s32 1, %v4910_v54 }
  0xbe   :  { %1643 = vmatpush1.bf16.msra.mxu1 %v4209_v20  ;;  %1618 = vmatpush1.bf16.msra.mxu0 %v4205_v19 }
  0xbf   :  { %1644 = vmatprep.subr.bf16.mxu1 %v4214_v22  ;;  %1619 = vmatprep.subr.bf16.mxu0 %v4212_v21 }
  0xc2   :  { %1645 = vmatpush1.bf16.msra.mxu1 %v4234_v28  ;;  %1620 = vmatpush1.bf16.msra.mxu0 %v4232_v27 }
  0xc3   :  { %1646 = vmatprep.subr.bf16.mxu1 %v4240_v30  ;;  %1621 = vmatprep.subr.bf16.mxu0 %v4238_v29 }
  0xc6   :  { %1647 = vmatpush1.bf16.msra.mxu1 %v4259_v38  ;;  %1622 = vmatpush1.bf16.msra.mxu0 %v4257_v37 }
  0xc7   :  { %1648 = vmatprep.subr.bf16.mxu1 %v4265_v42  ;;  %1623 = vmatprep.subr.bf16.mxu0 %v4263_v39 }
  0xca   :  { %1649 = vmatpush1.bf16.msra.mxu1 %v4285_v51  ;;  %1624 = vmatpush1.bf16.msra.mxu0 %v4283_v48 }
  0xcb   :  { %1650 = vmatprep.subr.bf16.mxu1 %v4291_v55  ;;  %1625 = vmatprep.subr.bf16.mxu0 %v4289_v52  ;;  %v6610_v52 = vld [vmem:[#allocation57_spill] sm:$0xff] }
  0xce   :  { %1651 = vmatpush1.bf16.msra.mxu1 %v4310_v0  ;;  %1626 = vmatpush1.bf16.msra.mxu0 %v4308_v63  ;;  %v6609_v63 = vld [vmem:[#allocation55_spill] sm:$0xff] }
  0xcf   :  { %1652 = vmatprep.subr.bf16.mxu1 %v4316_v5  ;;  %1627 = vmatprep.subr.bf16.mxu0 %v4314_v4  ;;  %v4928_v4 = vrot.slane %v4920_v58, %v82_v57 }
  0xd2   :  { %1653 = vmatpush1.bf16.msra.mxu1 %v4336_v18  ;;  %1628 = vmatpush1.bf16.msra.mxu0 %v4334_v15  ;;  %v6607_v15 = vld [vmem:[#allocation53_spill] sm:$0xff] }
  0xd3   :  { %1654 = vmatprep.subr.bf16.mxu1 %v4342_v24  ;;  %1629 = vmatprep.subr.bf16.mxu0 %v4340_v23  ;;  %v6605_v23 = vld [vmem:[#allocation52_spill] sm:$0xff]  ;;  %v6640_v24 = vld [vmem:[#allocation81_spill] sm:$0xff] }
  0xd6   :  { %1655 = vmatpush1.bf16.msra.mxu1 %v4361_v35  ;;  %1630 = vmatpush1.bf16.msra.mxu0 %v4359_v31  ;;  %v6608_v31 = vld [vmem:[#allocation54_spill] sm:$0xff] }
  0xd7   :  { %1656 = vmatprep.subr.bf16.mxu1 %v4367_v43  ;;  %1631 = vmatprep.subr.bf16.mxu0 %v4365_v36  ;;  %v4931_v36 = vrot.slane %v4920_v58, %v86_v45  ;;  %v6613_v45 = vld [vmem:[#allocation59_spill] sm:$0xff] }
  0xda   :  { %1657 = vmatpush1.bf16.msra.mxu1 %v6605_v23  ;;  %1632 = vmatpush1.bf16.msra.mxu0 %v6606_v53 }
  0xdb   :  { %1658 = vmatprep.subr.bf16.mxu1 %v6607_v15  ;;  %1683 = vmatprep.subr.bf16.mxu0 %v6608_v31  ;;  %v6620_v15 = vld [vmem:[#allocation65_spill] sm:$0xff] }
  0xde   :  { %1659 = vmatpush1.bf16.msra.mxu1 %v6609_v63 }
  0xdf   :  { %1660 = vmatprep.subr.bf16.mxu1 %v6610_v52 }
  0xe0   :  { %v287_v48 = vpop.f32.mrb[0].mxu1  ;;  %v4935_v39 = vpop.f32.mrb[0].mxu0 }
  0xe1   :  { %v4938_v37 = vadd.f32 %v287_v48, %v4928_v4  ;;  %v289_v53 = vpop.f32.mrb[1].mxu1  ;;  %v4940_v29 = vpop.f32.mrb[1].mxu0  ;;  %v6616_v48 = vld [vmem:[#allocation61_spill] sm:$0xff] }
  0xe2   :  { %v4943_v31 = vadd.f32 %v289_v53, %v4931_v36  ;;  %v291_v57 = vpop.f32.mrb[2].mxu1  ;;  %v271_v27 = vpop.f32.mrb[2].mxu0  ;;  %1661 = vmatpush1.bf16.msra.mxu1 %v6613_v45 }
  0xe3   :  { %6611 = vst [vmem:[#allocation131_spill] sm:$0xff] %v4938_v37  ;;  %v4947_v21 = vadd.f32 %v291_v57, %v4928_v4  ;;  %v293_v52 = vpop.f32.mrb[3].mxu1  ;;  %v4950_v63 = vadd.f32 %v271_v27, %v4928_v4  ;;  %v273_v19 = vpop.f32.mrb[3].mxu0  ;;  %1662 = vmatprep.subr.bf16.mxu1 %v6616_v48 }
  0xe4   :  { %6612 = vst [vmem:[#allocation132_spill] sm:$0xff] %v4943_v31  ;;  %v4954_v37 = vadd.f32 %v293_v52, %v4931_v36  ;;  %v4957_v53 = vadd.f32 %v273_v19, %v4931_v36  ;;  %v6619_v31 = vld [vmem:[#allocation63_spill] sm:$0xff] }
  0xe5   :  { %6614 = vst [vmem:[#allocation133_spill] sm:$0xff] %v4947_v21  ;;  %6615 = vst [vmem:[#allocation134_spill] sm:$0xff] %v4950_v63 }
  0xe6   :  { %6617 = vst [vmem:[#allocation135_spill] sm:$0xff] %v4954_v37  ;;  %6618 = vst [vmem:[#allocation136_spill] sm:$0xff] %v4957_v53  ;;  %1663 = vmatpush1.bf16.msra.mxu1 %v6619_v31  ;;  %v6625_v31 = vld [vmem:[#allocation67_spill] sm:$0xff] }
  0xe7   :  { %1664 = vmatprep.subr.bf16.mxu1 %v6620_v15 }
  0xe8   :  { %v297_v45 = vpop.f32.mrb[4].mxu1  ;;  %v277_v57 = vpop.f32.mrb[4].mxu0 }
  0xe9   :  { %v4962_v21 = vadd.f32 %v297_v45, %v4928_v4  ;;  %v299_v27 = vpop.f32.mrb[5].mxu1  ;;  %v4965_v63 = vadd.f32 %v277_v57, %v4928_v4  ;;  %v279_v48 = vpop.f32.mrb[5].mxu0 }
  0xea   :  { %v4968_v52 = vadd.f32 %v299_v27, %v4931_v36  ;;  %v301_v37 = vpop.f32.mrb[6].mxu1  ;;  %v4971_v19 = vadd.f32 %v279_v48, %v4931_v36  ;;  %v281_v53 = vpop.f32.mrb[6].mxu0  ;;  %1665 = vmatpush1.bf16.msra.mxu1 %v6625_v31 }
  0xeb   :  { %6621 = vst [vmem:[#allocation137_spill] sm:$0xff] %v4962_v21  ;;  %6622 = vst [vmem:[#allocation138_spill] sm:$0xff] %v4965_v63  ;;  %v4975_v15 = vadd.f32 %v301_v37, %v4928_v4  ;;  %v303_v45 = vpop.f32.mrb[7].mxu1  ;;  %v4978_v21 = vadd.f32 %v281_v53, %v4928_v4  ;;  %v283_v57 = vpop.f32.mrb[7].mxu0  ;;  %v98_v63 = vsub.s32 4, %v4910_v54  ;;  %1666 = vmatprep.subr.bf16.mxu1 %v6628_v11  ;;  %v90_v37 = vsub.s32 2, %v4910_v54 }
  0xec   :  { %6623 = vst [vmem:[#allocation139_spill] sm:$0xff] %v4968_v52  ;;  %6624 = vst [vmem:[#allocation140_spill] sm:$0xff] %v4971_v19  ;;  %v4983_v27 = vadd.f32 %v303_v45, %v4931_v36  ;;  %v4986_v48 = vadd.f32 %v283_v57, %v4931_v36  ;;  %v102_v52 = vsub.s32 5, %v4910_v54  ;;  %v6631_v19 = vld [vmem:[#allocation71_spill] sm:$0xff] }
  0xed   :  { %6626 = vst [vmem:[#allocation141_spill] sm:$0xff] %v4975_v15  ;;  %6627 = vst [vmem:[#allocation142_spill] sm:$0xff] %v4978_v21  ;;  %v94_v15 = vsub.s32 3, %v4910_v54  ;;  %v4993_v53 = vrot.slane %v4920_v58, %v98_v63  ;;  %v6632_v21 = vld [vmem:[#allocation73_spill] sm:$0xff] }
  0xee   :  { %6629 = vst [vmem:[#allocation143_spill] sm:$0xff] %v4983_v27  ;;  %6630 = vst [vmem:[#allocation144_spill] sm:$0xff] %v4986_v48  ;;  %1667 = vmatpush1.bf16.msra.mxu1 %v6631_v19  ;;  %v5001_v57 = vrot.slane %v4920_v58, %v102_v52  ;;  %v5004_v27 = vrot.slane %v4920_v58, %v90_v37 }
  0xef   :  { %1668 = vmatprep.subr.bf16.mxu1 %v6632_v21  ;;  %v5011_v19 = vrot.slane %v4920_v58, %v94_v15  ;;  %v6633_v21 = vld [vmem:[#allocation75_spill] sm:$0xff] }
  0xf0   :  { %v4996_v11 = vpop.f32.mrb[8].mxu1  ;;  %v4998_v45 = vpop.f32.mrb[8].mxu0 }
  0xf1   :  { %v5006_v48 = vpop.f32.mrb[9].mxu1  ;;  %v5008_v31 = vpop.f32.mrb[9].mxu0 }
  0xf2   :  { %v344_v63 = vpop.f32.mrb[10].mxu1  ;;  %v417_v23 = vpop.f32.mrb[10].mxu0  ;;  %1669 = vmatpush1.bf16.msra.mxu1 %v6633_v21 }
  0xf3   :  { %v5015_v10 = vadd.f32 %v344_v63, %v5004_v27  ;;  %v346_v43 = vpop.f32.mrb[11].mxu1  ;;  %v5018_v52 = vadd.f32 %v417_v23, %v4993_v53  ;;  %v419_v37 = vpop.f32.mrb[11].mxu0  ;;  %1670 = vmatprep.subr.bf16.mxu1 %v6636_v7 }
  0xf4   :  { %v5022_v35 = vadd.f32 %v346_v43, %v5011_v19  ;;  %v5025_v15 = vadd.f32 %v419_v37, %v5001_v57 }
  0xf5   :  { %6634 = vst [vmem:[#allocation145_spill] sm:$0xff] %v5015_v10  ;;  %6635 = vst [vmem:[#allocation146_spill] sm:$0xff] %v5018_v52 }
  0xf6   :  { %6637 = vst [vmem:[#allocation147_spill] sm:$0xff] %v5022_v35  ;;  %6638 = vst [vmem:[#allocation148_spill] sm:$0xff] %v5025_v15  ;;  %1671 = vmatpush1.bf16.msra.mxu1 %v6639_v6  ;;  %v6645_v6 = vld [vmem:[#allocation83_spill] sm:$0xff] }
  0xf7   :  { %1672 = vmatprep.subr.bf16.mxu1 %v6640_v24 }
  0xf8   :  { %v350_v21 = vpop.f32.mrb[12].mxu1  ;;  %v423_v63 = vpop.f32.mrb[12].mxu0 }
  0xf9   :  { %v5030_v10 = vadd.f32 %v350_v21, %v5004_v27  ;;  %v352_v23 = vpop.f32.mrb[13].mxu1  ;;  %v5033_v52 = vadd.f32 %v423_v63, %v4993_v53  ;;  %v425_v7 = vpop.f32.mrb[13].mxu0 }
  0xfa   :  { %v5036_v43 = vadd.f32 %v352_v23, %v5011_v19  ;;  %v354_v35 = vpop.f32.mrb[14].mxu1  ;;  %v5039_v37 = vadd.f32 %v425_v7, %v5001_v57  ;;  %v427_v15 = vpop.f32.mrb[14].mxu0  ;;  %1673 = vmatpush1.bf16.msra.mxu1 %v6645_v6 }
  0xfb   :  { %6641 = vst [vmem:[#allocation149_spill] sm:$0xff] %v5030_v10  ;;  %6642 = vst [vmem:[#allocation150_spill] sm:$0xff] %v5033_v52  ;;  %v5043_v24 = vadd.f32 %v354_v35, %v5004_v27  ;;  %v356_v21 = vpop.f32.mrb[15].mxu1  ;;  %v5046_v10 = vadd.f32 %v427_v15, %v4993_v53  ;;  %v429_v63 = vpop.f32.mrb[15].mxu0  ;;  %v6648_v52 = vld [vmem:[#allocation86_spill] sm:$0xff] }
  0xfc   :  { %6643 = vst [vmem:[#allocation151_spill] sm:$0xff] %v5036_v43  ;;  %6644 = vst [vmem:[#allocation152_spill] sm:$0xff] %v5039_v37  ;;  %1724 = vmatprep.subr.bf16.mxu1 %v6648_v52  ;;  %v5050_v23 = vadd.f32 %v356_v21, %v5011_v19  ;;  %v5053_v43 = vadd.f32 %v429_v63, %v5001_v57 }
  0xfd   :  { %6646 = vst [vmem:[#allocation153_spill] sm:$0xff] %v5043_v24  ;;  %6647 = vst [vmem:[#allocation154_spill] sm:$0xff] %v5046_v10 }
  0xfe   :  { %6649 = vst [vmem:[#allocation155_spill] sm:$0xff] %v5050_v23  ;;  %6650 = vst [vmem:[#allocation156_spill] sm:$0xff] %v5053_v43 }
 0x100   :  { %v360_v7 = vpop.f32.mrb[16].mxu1  ;;  %v433_v37 = vpop.f32.mrb[16].mxu0 }
 0x101   :  { %v5056_v6 = vadd.f32 %v360_v7, %v5004_v27  ;;  %v362_v35 = vpop.f32.mrb[17].mxu1  ;;  %v5059_v24 = vadd.f32 %v433_v37, %v4993_v53  ;;  %v435_v15 = vpop.f32.mrb[17].mxu0 }
 0x102   :  { %v5062_v10 = vadd.f32 %v362_v35, %v5011_v19  ;;  %v364_v52 = vpop.f32.mrb[18].mxu1  ;;  %v5065_v21 = vadd.f32 %v435_v15, %v5001_v57  ;;  %v437_v23 = vpop.f32.mrb[18].mxu0 }
 0x103   :  { %6651 = vst [vmem:[#allocation157_spill] sm:$0xff] %v5056_v6  ;;  %6652 = vst [vmem:[#allocation158_spill] sm:$0xff] %v5059_v24  ;;  %v5068_v63 = vadd.f32 %v364_v52, %v5004_v27  ;;  %v366_v43 = vpop.f32.mrb[19].mxu1  ;;  %v5071_v7 = vadd.f32 %v437_v23, %v4993_v53  ;;  %v439_v6 = vpop.f32.mrb[19].mxu0 }
 0x104   :  { %6653 = vst [vmem:[#allocation159_spill] sm:$0xff] %v5062_v10  ;;  %6654 = vst [vmem:[#allocation160_spill] sm:$0xff] %v5065_v21  ;;  %v5074_v37 = vadd.f32 %v366_v43, %v5011_v19  ;;  %v5077_v24 = vadd.f32 %v439_v6, %v5001_v57 }
 0x105   :  { %6655 = vst [vmem:[#allocation161_spill] sm:$0xff] %v5068_v63  ;;  %6656 = vst [vmem:[#allocation162_spill] sm:$0xff] %v5071_v7 }
 0x106   :  { %6657 = vst [vmem:[#allocation163_spill] sm:$0xff] %v5074_v37  ;;  %6658 = vst [vmem:[#allocation164_spill] sm:$0xff] %v5077_v24 }
 0x108   :  { %v370_v35 = vpop.f32.mrb[20].mxu1  ;;  %v443_v10 = vpop.f32.mrb[20].mxu0 }
 0x109   :  { %v5080_v15 = vadd.f32 %v370_v35, %v5004_v27  ;;  %v372_v21 = vpop.f32.mrb[21].mxu1  ;;  %v5083_v52 = vadd.f32 %v443_v10, %v4993_v53  ;;  %v445_v63 = vpop.f32.mrb[21].mxu0 }
 0x10a   :  { %v5086_v23 = vadd.f32 %v372_v21, %v5011_v19  ;;  %v374_v7 = vpop.f32.mrb[22].mxu1  ;;  %v5089_v43 = vadd.f32 %v445_v63, %v5001_v57  ;;  %v447_v37 = vpop.f32.mrb[22].mxu0  ;;  %v106_v21 = vsub.s32 6, %v4910_v54  ;;  %v110_v63 = vsub.s32 7, %v4910_v54 }
 0x10b   :  { %6659 = vst [vmem:[#allocation165_spill] sm:$0xff] %v5080_v15  ;;  %6660 = vst [vmem:[#allocation166_spill] sm:$0xff] %v5083_v52  ;;  %v5092_v6 = vadd.f32 %v374_v7, %v5004_v27  ;;  %v376_v24 = vpop.f32.mrb[23].mxu1  ;;  %v5095_v35 = vadd.f32 %v447_v37, %v4993_v53  ;;  %v449_v15 = vpop.f32.mrb[23].mxu0 }
 0x10c   :  { %6661 = vst [vmem:[#allocation167_spill] sm:$0xff] %v5086_v23  ;;  %6662 = vst [vmem:[#allocation168_spill] sm:$0xff] %v5089_v43  ;;  %v5098_v10 = vadd.f32 %v376_v24, %v5011_v19  ;;  %v5101_v52 = vadd.f32 %v449_v15, %v5001_v57  ;;  %v5108_v7 = vrot.slane %v4920_v58, %v106_v21 }
 0x10d   :  { %6663 = vst [vmem:[#allocation169_spill] sm:$0xff] %v5092_v6  ;;  %6664 = vst [vmem:[#allocation170_spill] sm:$0xff] %v5095_v35  ;;  %v5113_v37 = vrot.slane %v4920_v58, %v110_v63 }
 0x10e   :  { %6665 = vst [vmem:[#allocation171_spill] sm:$0xff] %v5098_v10  ;;  %6666 = vst [vmem:[#allocation172_spill] sm:$0xff] %v5101_v52 }
 0x110   :  { %v5105_v43 = vpop.f32.mrb[24].mxu1 }
 0x111   :  { %v5110_v6 = vpop.f32.mrb[25].mxu1 }
 0x112   :  { %v490_v35 = vpop.f32.mrb[26].mxu1 }
 0x113   :  { %v5116_v24 = vadd.f32 %v490_v35, %v5108_v7  ;;  %v492_v15 = vpop.f32.mrb[27].mxu1 }
 0x114   :  { %v5119_v52 = vadd.f32 %v492_v15, %v5113_v37 }
 0x115   :  { %6667 = vst [vmem:[#allocation173_spill] sm:$0xff] %v5116_v24 }
 0x116   :  { %6668 = vst [vmem:[#allocation174_spill] sm:$0xff] %v5119_v52 }
 0x118   :  { %v496_v10 = vpop.f32.mrb[28].mxu1 }
 0x119   :  { %v5122_v54 = vadd.f32 %v496_v10, %v5108_v7  ;;  %v498_v23 = vpop.f32.mrb[29].mxu1 }
 0x11a   :  { %v5125_v21 = vadd.f32 %v498_v23, %v5113_v37  ;;  %v500_v2 = vpop.f32.mrb[30].mxu1 }
 0x11b   :  { %6669 = vst [vmem:[#allocation175_spill] sm:$0xff] %v5122_v54  ;;  %v5128_v58 = vadd.f32 %v500_v2, %v5108_v7  ;;  %v502_v63 = vpop.f32.mrb[31].mxu1 }
 0x11c   :  { %6670 = vst [vmem:[#allocation176_spill] sm:$0xff] %v5125_v21  ;;  %v5131_v35 = vadd.f32 %v502_v63, %v5113_v37 }
 0x11d   :  { %6671 = vst [vmem:[#allocation177_spill] sm:$0xff] %v5128_v58 }
 0x11e   :  { %6672 = vst [vmem:[#allocation178_spill] sm:$0xff] %v5131_v35 }
 0x120   :  { %v506_v24 = vpop.f32.mrb[32].mxu1 }
 0x121   :  { %v5134_v15 = vadd.f32 %v506_v24, %v5108_v7  ;;  %v508_v52 = vpop.f32.mrb[33].mxu1 }
 0x122   :  { %v5137_v10 = vadd.f32 %v508_v52, %v5113_v37  ;;  %v510_v54 = vpop.f32.mrb[34].mxu1 }
 0x123   :  { %6673 = vst [vmem:[#allocation179_spill] sm:$0xff] %v5134_v15  ;;  %v5140_v23 = vadd.f32 %v510_v54, %v5108_v7  ;;  %v512_v21 = vpop.f32.mrb[35].mxu1 }
 0x124   :  { %6674 = vst [vmem:[#allocation180_spill] sm:$0xff] %v5137_v10  ;;  %v5143_v2 = vadd.f32 %v512_v21, %v5113_v37  ;;  %v268_v21 = vadd.f32 %v4935_v39, %v4928_v4 }
 0x125   :  { %6675 = vst [vmem:[#allocation181_spill] sm:$0xff] %v5140_v23 }
 0x126   :  { %6676 = vst [vmem:[#allocation182_spill] sm:$0xff] %v5143_v2  ;;  %v270_v2 = vadd.f32 %v4940_v29, %v4931_v36 }
 0x128   :  { %v516_v58 = vpop.f32.mrb[36].mxu1 }
 0x129   :  { %v5146_v63 = vadd.f32 %v516_v58, %v5108_v7  ;;  %v518_v35 = vpop.f32.mrb[37].mxu1 }
 0x12a   :  { %v5149_v24 = vadd.f32 %v518_v35, %v5113_v37  ;;  %v520_v15 = vpop.f32.mrb[38].mxu1 }
 0x12b   :  { %6677 = vst [vmem:[#allocation183_spill] sm:$0xff] %v5146_v63  ;;  %v5152_v52 = vadd.f32 %v520_v15, %v5108_v7  ;;  %v522_v10 = vpop.f32.mrb[39].mxu1  ;;  %v341_v15 = vadd.f32 %v4996_v11, %v5004_v27 }
 0x12c   :  { %6678 = vst [vmem:[#allocation184_spill] sm:$0xff] %v5149_v24  ;;  %v5155_v54 = vadd.f32 %v522_v10, %v5113_v37 }
 0x12d   :  { %6679 = vst [vmem:[#allocation185_spill] sm:$0xff] %v5152_v52  ;;  %v343_v52 = vadd.f32 %v5006_v48, %v5011_v19 }
 0x12e   :  { %6680 = vst [vmem:[#allocation186_spill] sm:$0xff] %v5155_v54 }
 0x130   :  { %v1405_v58 = vpop.f32.mrb[24].mxu0 }
 0x131   :  { %v1535_v63 = vadd.f32 %v1405_v58, %v268_v21  ;;  %v1407_v23 = vpop.f32.mrb[25].mxu0 }
 0x132   :  { %v1536_v18 = vadd.f32 %v1407_v23, %v270_v2  ;;  %v1409_v35 = vpop.f32.mrb[26].mxu0 }
 0x133   :  { %v1410_v24 = vpop.f32.mrb[27].mxu0  ;;  %v3562_v0 = vmul.f32 -1.442695, %v1535_v63 }
 0x134   :  { %v3563_v29 = vmul.f32 -1.442695, %v1536_v18  ;;  %v416_v18 = vadd.f32 %v5008_v31, %v5001_v57 }
 0x135   :  { %3675 = vpow2.f32 %v3562_v0 }
 0x136   :  { %3677 = vpow2.f32 %v3563_v29 }
 0x13f   :  { %v3676_v23 = vpop.eup %3675 }
 0x140   :  { %v3678_v2 = vpop.eup %3677  ;;  %v1549_v24 = vadd.f32 1.0, %v3676_v23 }
 0x141   :  { %v1550_v19 = vadd.f32 1.0, %v3678_v2  ;;  %v487_v2 = vadd.f32 %v5105_v43, %v5108_v7 }
 0x150   :  { %v1446_v10 = vpop.f32.mrb[40].mxu1 }
 0x151   :  { %v1537_v54 = vadd.f32 %v1446_v10, %v341_v15  ;;  %v1448_v1 = vpop.f32.mrb[41].mxu1 }
 0x152   :  { %v1538_v5 = vadd.f32 %v1448_v1, %v343_v52  ;;  %v1450_v39 = vpop.f32.mrb[42].mxu1  ;;  %v414_v1 = vadd.f32 %v4998_v45, %v4993_v53 }
 0x153   :  { %v1451_v4 = vpop.f32.mrb[43].mxu1  ;;  %v3564_v36 = vmul.f32 -1.442695, %v1537_v54 }
 0x154   :  { %v3565_v21 = vmul.f32 -1.442695, %v1538_v5 }
 0x155   :  { %3679 = vpow2.f32 %v3564_v36 }
 0x156   :  { %3681 = vpow2.f32 %v3565_v21 }
 0x157   :  { %3683 = vrcp.f32 %v1549_v24 }
 0x158   :  { %3685 = vrcp.f32 %v1550_v19 }
 0x15f   :  { %v3680_v11 = vpop.eup %3679 }
 0x160   :  { %v3682_v27 = vpop.eup %3681  ;;  %v1561_v48 = vadd.f32 1.0, %v3680_v11  ;;  %v489_v11 = vadd.f32 %v5110_v6, %v5113_v37 }
 0x161   :  { %v1562_v58 = vadd.f32 1.0, %v3682_v27  ;;  %v3684_v15 = vpop.eup %3683 }
 0x162   :  { %3687 = vrcp.f32 %v1561_v48  ;;  %v3686_v10 = vpop.eup %3685 }
 0x163   :  { %3689 = vrcp.f32 %v1562_v58 }
 0x16c   :  { %v3688_v39 = vpop.eup %3687 }
 0x16d   :  { %v3690_v4 = vpop.eup %3689  ;;  %v1581_v29 = vmul.f32 0.0, %v3688_v39 }
 0x16e   :  { %v1582_v31 = vmul.f32 0.0, %v3690_v4  ;;  %v6681_v4 = vld [vmem:[#allocation56_spill] sm:$0xff] }
 0x170   :  { %v1487_v0 = vpop.f32.mrb[28].mxu0 }
 0x171   :  { %v1539_v5 = vadd.f32 %v1487_v0, %v414_v1  ;;  %v1489_v63 = vpop.f32.mrb[29].mxu0 }
 0x172   :  { %v1540_v52 = vadd.f32 %v1489_v63, %v416_v18  ;;  %v1491_v54 = vpop.f32.mrb[30].mxu0 }
 0x173   :  { %3691 = vtanh.f32 %v1539_v5  ;;  %v1492_v35 = vpop.f32.mrb[31].mxu0 }
 0x174   :  { %3693 = vtanh.f32 %v1540_v52 }
 0x17d   :  { %v3692_v53 = vpop.eup %3691 }
 0x17e   :  { %v3694_v45 = vpop.eup %3693  ;;  %v1583_v36 = vmul.f32 %v3692_v53, %v3684_v15  ;;  %v6682_v53 = vld [vmem:[#allocation88_spill] sm:$0xff] }
 0x17f   :  { %v1584_v57 = vmul.f32 %v3694_v45, %v3686_v10  ;;  %v6683_v45 = vld [vmem:[#allocation58_spill] sm:$0xff] }
 0x180   :  { %v5169_v21 = vadd.f32 %v1583_v36, %v1581_v29  ;;  %v6684_v29 = vld [vmem:[#allocation90_spill] sm:$0xff]  ;;  %v6685_v36 = vld [vmem:[#allocation60_spill] sm:$0xff] }
 0x181   :  { %v5171_v23 = vadd.f32 %v1584_v57, %v1582_v31  ;;  %v6686_v31 = vld [vmem:[#allocation92_spill] sm:$0xff]  ;;  %v6687_v57 = vld [vmem:[#allocation62_spill] sm:$0xff] }
 0x190   :  { %v1528_v27 = vpop.f32.mrb[44].mxu1 }
 0x191   :  { %v1541_v24 = vadd.f32 %v1528_v27, %v487_v2  ;;  %v1530_v19 = vpop.f32.mrb[45].mxu1  ;;  %v6688_v2 = vld [vmem:[#allocation94_spill] sm:$0xff]  ;;  %v6690_v27 = vld [vmem:[#allocation96_spill] sm:$0xff] }
 0x192   :  { %v1542_v48 = vadd.f32 %v1530_v19, %v489_v11  ;;  %v1532_v58 = vpop.f32.mrb[46].mxu1  ;;  %v6689_v11 = vld [vmem:[#allocation64_spill] sm:$0xff]  ;;  %v6692_v19 = vld [vmem:[#allocation98_spill] sm:$0xff] }
 0x193   :  { %v3566_v1 = vmul.f32 -1.442695, %v1541_v24  ;;  %v1533_v18 = vpop.f32.mrb[47].mxu1  ;;  %v6691_v24 = vld [vmem:[#allocation66_spill] sm:$0xff]  ;;  %v6694_v58 = vld [vmem:[#allocation100_spill] sm:$0xff] }
 0x194   :  { %v3567_v0 = vmul.f32 -1.442695, %v1542_v48  ;;  %v6693_v48 = vld [vmem:[#allocation68_spill] sm:$0xff]  ;;  %v6696_v18 = vld [vmem:[#allocation102_spill] sm:$0xff] }
 0x195   :  { %3695 = vpow2.f32 %v3566_v1  ;;  %v6695_v1 = vld [vmem:[#allocation70_spill] sm:$0xff] }
 0x196   :  { %3697 = vpow2.f32 %v3567_v0  ;;  %v6697_v0 = vld [vmem:[#allocation72_spill] sm:$0xff] }
 0x197   :  { %3699 = vtanh.f32 %v5169_v21 }
 0x198   :  { %3701 = vtanh.f32 %v5171_v23 }
 0x19f   :  { %v3696_v5 = vpop.eup %3695 }
 0x1a0   :  { %v3698_v63 = vpop.eup %3697  ;;  %v1575_v52 = vadd.f32 1.0, %v3696_v5  ;;  %v6698_v5 = vld [vmem:[#allocation104_spill] sm:$0xff] }
 0x1a1   :  { %v1576_v43 = vadd.f32 1.0, %v3698_v63  ;;  %v3700_v6 = vpop.eup %3699  ;;  %v6699_v63 = vld [vmem:[#allocation74_spill] sm:$0xff] }
 0x1a2   :  { %3703 = vrcp.f32 %v1575_v52  ;;  %v3702_v7 = vpop.eup %3701  ;;  %v6700_v52 = vld [vmem:[#allocation106_spill] sm:$0xff] }
 0x1a3   :  { %3705 = vrcp.f32 %v1576_v43  ;;  %v6701_v43 = vld [vmem:[#allocation76_spill] sm:$0xff] }
 0x1ac   :  { %v3704_v37 = vpop.eup %3703 }
 0x1ad   :  { %v3706_v54 = vpop.eup %3705  ;;  %v1589_v35 = vmul.f32 %v3704_v37, %v3700_v6  ;;  %v6702_v6 = vld [vmem:[#allocation78_spill] sm:$0xff] }
 0x1ae   :  { %v1590_v15 = vmul.f32 %v3706_v54, %v3702_v7  ;;  %v6703_v7 = vld [vmem:[#allocation80_spill] sm:$0xff]  ;;  %v6704_v37 = vld [vmem:[#allocation82_spill] sm:$0xff] }
 0x1af   :  { %v5179_v39 = vpack.c.bf16 %v1589_v35, %v1589_v35  ;;  %v6705_v54 = vld [vmem:[#allocation84_spill] sm:$0xff]  ;;  %v6706_v35 = vld [vmem:[#allocation85_spill] sm:$0xff] }
 0x1b0   :  { %v1600_v10 = vpack.c.bf16 %v1590_v15, %v1590_v15  ;;  %v6707_v15 = vld [vmem:[#allocation87_spill] sm:$0xff] }
 0x1b2   :  { %1633 = vmatprep.mubr.bf16.mxu0 %v1600_v10  ;;  %1674 = vmatprep.mubr.bf16.mxu1 %v1600_v10 }
 0x1b3   :  { %1634 = vmatmul.mubr.bf16.vlgmr.msra.gmra.mrb[32].mxu0 %v5179_v39  ;;  %1675 = vmatmul.mubr.bf16.vlgmr.msra.gmra.mrb[48].mxu1 %v5179_v39 }
 0x1b4   :  { %1684 = vmatpush1.bf16.msra.mxu0 %v6681_v4  ;;  %1725 = vmatpush1.bf16.msra.mxu1 %v6682_v53 }
 0x1b5   :  { %1715 = vmatprep.mubr.bf16.mxu0 %v1600_v10  ;;  %1756 = vmatprep.mubr.bf16.mxu1 %v1600_v10  ;;  %v6708_v10 = vld [vmem:[#allocation89_spill] sm:$0xff] }
 0x1b6   :  { %1685 = vmatprep.subr.bf16.mxu0 %v6683_v45  ;;  %1726 = vmatprep.subr.bf16.mxu1 %v6684_v29 }
 0x1b8   :  { %1686 = vmatpush1.bf16.msra.mxu0 %v6685_v36  ;;  %1727 = vmatpush1.bf16.msra.mxu1 %v6686_v31 }
 0x1b9   :  { %1687 = vmatprep.subr.bf16.mxu0 %v6687_v57  ;;  %1728 = vmatprep.subr.bf16.mxu1 %v6688_v2 }
 0x1bc   :  { %1688 = vmatpush1.bf16.msra.mxu0 %v6689_v11  ;;  %1729 = vmatpush1.bf16.msra.mxu1 %v6690_v27 }
 0x1bd   :  { %1689 = vmatprep.subr.bf16.mxu0 %v6691_v24  ;;  %1730 = vmatprep.subr.bf16.mxu1 %v6692_v19 }
 0x1c0   :  { %1690 = vmatpush1.bf16.msra.mxu0 %v6693_v48  ;;  %1731 = vmatpush1.bf16.msra.mxu1 %v6694_v58 }
 0x1c1   :  { %1691 = vmatprep.subr.bf16.mxu0 %v6695_v1  ;;  %1732 = vmatprep.subr.bf16.mxu1 %v6696_v18 }
 0x1c4   :  { %1692 = vmatpush1.bf16.msra.mxu0 %v6697_v0  ;;  %1733 = vmatpush1.bf16.msra.mxu1 %v6698_v5 }
 0x1c5   :  { %1693 = vmatprep.subr.bf16.mxu0 %v6699_v63  ;;  %1734 = vmatprep.subr.bf16.mxu1 %v6700_v52 }
 0x1c8   :  { %1694 = vmatpush1.bf16.msra.mxu0 %v6701_v43  ;;  %1735 = vmatpush1.bf16.msra.mxu1 %v4728_v14 }
 0x1c9   :  { %1695 = vmatprep.subr.bf16.mxu0 %v6702_v6  ;;  %1736 = vmatprep.subr.bf16.mxu1 %v4734_v59 }
 0x1cc   :  { %1696 = vmatpush1.bf16.msra.mxu0 %v6703_v7  ;;  %1737 = vmatpush1.bf16.msra.mxu1 %v4752_v46  ;;  %v6709_v46 = vld [vmem:[#allocation91_spill] sm:$0xff] }
 0x1cd   :  { %1697 = vmatprep.subr.bf16.mxu0 %v6704_v37  ;;  %1738 = vmatprep.subr.bf16.mxu1 %v4758_v26  ;;  %v6710_v26 = vld [vmem:[#allocation93_spill] sm:$0xff] }
 0x1d0   :  { %1698 = vmatpush1.bf16.msra.mxu0 %v6705_v54  ;;  %1739 = vmatpush1.bf16.msra.mxu1 %v4770_v33  ;;  %v6711_v33 = vld [vmem:[#allocation95_spill] sm:$0xff] }
 0x1d1   :  { %1699 = vmatprep.subr.bf16.mxu0 %v6706_v35  ;;  %1740 = vmatprep.subr.bf16.mxu1 %v4774_v12  ;;  %v6712_v12 = vld [vmem:[#allocation97_spill] sm:$0xff] }
 0x1d4   :  { %1700 = vmatpush1.bf16.msra.mxu0 %v6707_v15  ;;  %1741 = vmatpush1.bf16.msra.mxu1 %v4784_v16  ;;  %v6713_v16 = vld [vmem:[#allocation99_spill] sm:$0xff] }
 0x1d5   :  { %1701 = vmatprep.subr.bf16.mxu0 %v6708_v10  ;;  %1742 = vmatprep.subr.bf16.mxu1 %v4787_v13  ;;  %v6714_v13 = vld [vmem:[#allocation101_spill] sm:$0xff] }
 0x1d8   :  { %1702 = vmatpush1.bf16.msra.mxu0 %v6709_v46  ;;  %1743 = vmatpush1.bf16.msra.mxu1 %v4798_v17  ;;  %v6715_v17 = vld [vmem:[#allocation103_spill] sm:$0xff] }
 0x1d9   :  { %1703 = vmatprep.subr.bf16.mxu0 %v6710_v26  ;;  %1744 = vmatprep.subr.bf16.mxu1 %v4802_v56  ;;  %v6716_v56 = vld [vmem:[#allocation105_spill] sm:$0xff] }
 0x1dc   :  { %1704 = vmatpush1.bf16.msra.mxu0 %v6711_v33  ;;  %1745 = vmatpush1.bf16.msra.mxu1 %v4812_v60  ;;  %v6717_v60 = vld [vmem:[#allocation107_spill] sm:$0xff] }
 0x1dd   :  { %1705 = vmatprep.subr.bf16.mxu0 %v6712_v12  ;;  %1746 = vmatprep.subr.bf16.mxu1 %v4816_v9 }
 0x1e0   :  { %1706 = vmatpush1.bf16.msra.mxu0 %v6713_v16  ;;  %1747 = vmatpush1.bf16.msra.mxu1 %v4826_v44  ;;  %v6718_v44 = vld [vmem:[#allocation109_spill] sm:$0xff] }
 0x1e1   :  { %1707 = vmatprep.subr.bf16.mxu0 %v6714_v13  ;;  %1748 = vmatprep.subr.bf16.mxu1 %v4830_v3 }
 0x1e4   :  { %1708 = vmatpush1.bf16.msra.mxu0 %v6715_v17  ;;  %1749 = vmatpush1.bf16.msra.mxu1 %v4840_v34  ;;  %v6719_v34 = vld [vmem:[#allocation113_spill] sm:$0xff] }
 0x1e5   :  { %1709 = vmatprep.subr.bf16.mxu0 %v6716_v56  ;;  %1750 = vmatprep.subr.bf16.mxu1 %v4844_v8  ;;  %v6720_v8 = vld [vmem:[#allocation5_spill] sm:$0xff] }
 0x1e8   :  { %1710 = vmatpush1.bf16.msra.mxu0 %v6717_v60  ;;  %1751 = vmatpush1.bf16.msra.mxu1 %v4854_v40 }
 0x1e9   :  { %1711 = vmatprep.subr.bf16.mxu0 %v4732_v32  ;;  %1752 = vmatprep.subr.bf16.mxu1 %v4858_v41  ;;  %v6721_v41 = vld [vmem:[#allocation6_spill] sm:$0xff] }
 0x1ec   :  { %1712 = vmatpush1.bf16.msra.mxu0 %v6718_v44  ;;  %1753 = vmatpush1.bf16.msra.mxu1 %v4868_v47  ;;  %v6722_v47 = vld [vmem:[#allocation7_spill] sm:$0xff] }
 0x1ed   :  { %1713 = vmatprep.subr.bf16.mxu0 %v4756_v25  ;;  %1754 = vmatprep.subr.bf16.mxu1 %v4872_v49  ;;  %v6723_v49 = vld [vmem:[#allocation8_spill] sm:$0xff] }
 0x1f0   :  { %1714 = vmatpush1.bf16.msra.mxu0 %v6719_v34  ;;  %1755 = vmatpush1.bf16.msra.mxu1 %v4876_v62  ;;  %v6724_v62 = vld [vmem:[#allocation9_spill] sm:$0xff] }
 0x1f1   :  { %1831 = vmatprep.subr.bf16.mxu0 %v6720_v8  ;;  %1872 = vmatprep.subr.bf16.mxu1 %v4098_v50  ;;  %v6725_v50 = vld [vmem:[#allocation11_spill] sm:$0xff] }
 0x1f2   :  { %v6779_v8 = vld [vmem:[#allocation147_spill] sm:$0xff] }
 0x1f3   :  { %1716 = vmatmul.mubr.bf16.vlgmr.msra.gmra.mrb[36].mxu0 %v5179_v39  ;;  %1757 = vmatmul.mubr.bf16.vlgmr.msra.gmra.mrb[52].mxu1 %v5179_v39  ;;  %v6726_v39 = vld [vmem:[#allocation12_spill] sm:$0xff] }
 0x1f4   :  { %1832 = vmatpush1.bf16.msra.mxu0 %v6721_v41  ;;  %1873 = vmatpush1.bf16.msra.mxu1 %v4209_v20  ;;  %v6727_v20 = vld [vmem:[#allocation13_spill] sm:$0xff]  ;;  %v6778_v41 = vld [vmem:[#allocation136_spill] sm:$0xff] }
 0x1f5   :  { %1833 = vmatprep.subr.bf16.mxu0 %v6722_v47  ;;  %1874 = vmatprep.subr.bf16.mxu1 %v4214_v22  ;;  %v6728_v22 = vld [vmem:[#allocation14_spill] sm:$0xff] }
 0x1f8   :  { %1834 = vmatpush1.bf16.msra.mxu0 %v6723_v49  ;;  %1875 = vmatpush1.bf16.msra.mxu1 %v4234_v28  ;;  %v6776_v28 = vld [vmem:[#allocation134_spill] sm:$0xff]  ;;  %v6777_v49 = vld [vmem:[#allocation145_spill] sm:$0xff] }
 0x1f9   :  { %1835 = vmatprep.subr.bf16.mxu0 %v6724_v62  ;;  %1876 = vmatprep.subr.bf16.mxu1 %v4240_v30  ;;  %v6729_v62 = vld [vmem:[#allocation40_spill] sm:$0xff] }
 0x1fa   :  { %v6730_v30 = vld [vmem:[#allocation16_spill] sm:$0xff] }
 0x1fc   :  { %1836 = vmatpush1.bf16.msra.mxu0 %v6725_v50  ;;  %1877 = vmatpush1.bf16.msra.mxu1 %v4259_v38  ;;  %v6731_v50 = vld [vmem:[#allocation42_spill] sm:$0xff]  ;;  %v6732_v38 = vld [vmem:[#allocation17_spill] sm:$0xff] }
 0x1fd   :  { %1837 = vmatprep.subr.bf16.mxu0 %v6726_v39  ;;  %1878 = vmatprep.subr.bf16.mxu1 %v4265_v42  ;;  %v6733_v39 = vld [vmem:[#allocation44_spill] sm:$0xff]  ;;  %v6734_v42 = vld [vmem:[#allocation18_spill] sm:$0xff] }
 0x200   :  { %1838 = vmatpush1.bf16.msra.mxu0 %v6727_v20  ;;  %1879 = vmatpush1.bf16.msra.mxu1 %v4285_v51  ;;  %v6735_v20 = vld [vmem:[#allocation46_spill] sm:$0xff]  ;;  %v6736_v51 = vld [vmem:[#allocation19_spill] sm:$0xff] }
 0x201   :  { %1839 = vmatprep.subr.bf16.mxu0 %v6728_v22  ;;  %1880 = vmatprep.subr.bf16.mxu1 %v4291_v55  ;;  %v6737_v22 = vld [vmem:[#allocation48_spill] sm:$0xff] }
 0x202   :  { %v6738_v55 = vld [vmem:[#allocation20_spill] sm:$0xff] }
 0x204   :  { %1840 = vmatpush1.bf16.msra.mxu0 %v4139_v61  ;;  %1881 = vmatpush1.bf16.msra.mxu1 %v6729_v62  ;;  %v6739_v61 = vld [vmem:[#allocation50_spill] sm:$0xff]  ;;  %v6740_v62 = vld [vmem:[#allocation21_spill] sm:$0xff] }
 0x205   :  { %1841 = vmatprep.subr.bf16.mxu0 %v6730_v30  ;;  %1882 = vmatprep.subr.bf16.mxu1 %v6731_v50  ;;  %v6741_v30 = vld [vmem:[#allocation52_spill] sm:$0xff]  ;;  %v6742_v50 = vld [vmem:[#allocation22_spill] sm:$0xff] }
 0x208   :  { %1842 = vmatpush1.bf16.msra.mxu0 %v6732_v38  ;;  %1883 = vmatpush1.bf16.msra.mxu1 %v6733_v39  ;;  %v6743_v38 = vld [vmem:[#allocation53_spill] sm:$0xff]  ;;  %v6744_v39 = vld [vmem:[#allocation23_spill] sm:$0xff] }
 0x209   :  { %1843 = vmatprep.subr.bf16.mxu0 %v6734_v42  ;;  %1884 = vmatprep.subr.bf16.mxu1 %v6735_v20  ;;  %v6745_v42 = vld [vmem:[#allocation55_spill] sm:$0xff]  ;;  %v6746_v20 = vld [vmem:[#allocation25_spill] sm:$0xff] }
 0x20c   :  { %1844 = vmatpush1.bf16.msra.mxu0 %v6736_v51  ;;  %1885 = vmatpush1.bf16.msra.mxu1 %v6737_v22  ;;  %v6747_v51 = vld [vmem:[#allocation57_spill] sm:$0xff]  ;;  %v6748_v22 = vld [vmem:[#allocation27_spill] sm:$0xff] }
 0x20d   :  { %1845 = vmatprep.subr.bf16.mxu0 %v6738_v55  ;;  %1886 = vmatprep.subr.bf16.mxu1 %v6739_v61  ;;  %v6749_v55 = vld [vmem:[#allocation59_spill] sm:$0xff]  ;;  %v6750_v61 = vld [vmem:[#allocation29_spill] sm:$0xff] }
 0x210   :  { %1846 = vmatpush1.bf16.msra.mxu0 %v6740_v62  ;;  %1887 = vmatpush1.bf16.msra.mxu1 %v6741_v30  ;;  %v6751_v62 = vld [vmem:[#allocation61_spill] sm:$0xff]  ;;  %v6752_v30 = vld [vmem:[#allocation31_spill] sm:$0xff] }
 0x211   :  { %1847 = vmatprep.subr.bf16.mxu0 %v6742_v50  ;;  %1888 = vmatprep.subr.bf16.mxu1 %v6743_v38  ;;  %v6753_v50 = vld [vmem:[#allocation63_spill] sm:$0xff]  ;;  %v6754_v38 = vld [vmem:[#allocation33_spill] sm:$0xff] }
 0x214   :  { %1848 = vmatpush1.bf16.msra.mxu0 %v6744_v39  ;;  %1889 = vmatpush1.bf16.msra.mxu1 %v6745_v42  ;;  %v6755_v39 = vld [vmem:[#allocation65_spill] sm:$0xff]  ;;  %v6756_v42 = vld [vmem:[#allocation35_spill] sm:$0xff] }
 0x215   :  { %1849 = vmatprep.subr.bf16.mxu0 %v6746_v20  ;;  %1890 = vmatprep.subr.bf16.mxu1 %v6747_v51  ;;  %v6757_v20 = vld [vmem:[#allocation67_spill] sm:$0xff]  ;;  %v6758_v51 = vld [vmem:[#allocation37_spill] sm:$0xff] }
 0x218   :  { %1850 = vmatpush1.bf16.msra.mxu0 %v6748_v22  ;;  %1891 = vmatpush1.bf16.msra.mxu1 %v6749_v55  ;;  %v6759_v22 = vld [vmem:[#allocation69_spill] sm:$0xff]  ;;  %v6760_v55 = vld [vmem:[#allocation39_spill] sm:$0xff] }
 0x219   :  { %1851 = vmatprep.subr.bf16.mxu0 %v6750_v61  ;;  %1892 = vmatprep.subr.bf16.mxu1 %v6751_v62  ;;  %v6761_v61 = vld [vmem:[#allocation71_spill] sm:$0xff]  ;;  %v6762_v62 = vld [vmem:[#allocation41_spill] sm:$0xff] }
 0x21c   :  { %1852 = vmatpush1.bf16.msra.mxu0 %v6752_v30  ;;  %1893 = vmatpush1.bf16.msra.mxu1 %v6753_v50  ;;  %v6763_v30 = vld [vmem:[#allocation73_spill] sm:$0xff]  ;;  %v6764_v50 = vld [vmem:[#allocation43_spill] sm:$0xff] }
 0x21d   :  { %1853 = vmatprep.subr.bf16.mxu0 %v6754_v38  ;;  %1894 = vmatprep.subr.bf16.mxu1 %v6755_v39  ;;  %v6765_v38 = vld [vmem:[#allocation75_spill] sm:$0xff]  ;;  %v6766_v39 = vld [vmem:[#allocation45_spill] sm:$0xff] }
 0x220   :  { %1854 = vmatpush1.bf16.msra.mxu0 %v6756_v42  ;;  %1895 = vmatpush1.bf16.msra.mxu1 %v6757_v20  ;;  %v6767_v42 = vld [vmem:[#allocation77_spill] sm:$0xff]  ;;  %v6768_v20 = vld [vmem:[#allocation47_spill] sm:$0xff] }
 0x221   :  { %1855 = vmatprep.subr.bf16.mxu0 %v6758_v51  ;;  %1896 = vmatprep.subr.bf16.mxu1 %v6759_v22  ;;  %v6769_v51 = vld [vmem:[#allocation79_spill] sm:$0xff]  ;;  %v6770_v22 = vld [vmem:[#allocation49_spill] sm:$0xff] }
 0x224   :  { %1856 = vmatpush1.bf16.msra.mxu0 %v6760_v55  ;;  %1897 = vmatpush1.bf16.msra.mxu1 %v6761_v61  ;;  %v6771_v55 = vld [vmem:[#allocation81_spill] sm:$0xff]  ;;  %v6772_v61 = vld [vmem:[#allocation51_spill] sm:$0xff] }
 0x225   :  { %1857 = vmatprep.subr.bf16.mxu0 %v6762_v62  ;;  %1898 = vmatprep.subr.bf16.mxu1 %v6763_v30  ;;  %v6773_v62 = vld [vmem:[#allocation83_spill] sm:$0xff]  ;;  %v6774_v30 = vld [vmem:[#allocation54_spill] sm:$0xff] }
 0x228   :  { %1858 = vmatpush1.bf16.msra.mxu0 %v6764_v50  ;;  %1899 = vmatpush1.bf16.msra.mxu1 %v6765_v38  ;;  %v6775_v50 = vld [vmem:[#allocation86_spill] sm:$0xff] }
 0x229   :  { %1859 = vmatprep.subr.bf16.mxu0 %v6766_v39  ;;  %1900 = vmatprep.subr.bf16.mxu1 %v6767_v42 }
 0x22c   :  { %1860 = vmatpush1.bf16.msra.mxu0 %v6768_v20  ;;  %1901 = vmatpush1.bf16.msra.mxu1 %v6769_v51 }
 0x22d   :  { %1861 = vmatprep.subr.bf16.mxu0 %v6770_v22  ;;  %1902 = vmatprep.subr.bf16.mxu1 %v6771_v55 }
 0x230   :  { %1862 = vmatpush1.bf16.msra.mxu0 %v6772_v61  ;;  %1903 = vmatpush1.bf16.msra.mxu1 %v6773_v62 }
 0x231   :  { %1913 = vmatprep.subr.bf16.mxu0 %v6774_v30  ;;  %1954 = vmatprep.subr.bf16.mxu1 %v6775_v50 }
 0x286   :  { %v1635_v38 = vpop.f32.mrb[32].mxu0  ;;  %v1676_v39 = vpop.f32.mrb[48].mxu1 }
 0x287   :  { %v1765_v42 = vadd.f32 %v1635_v38, %v6776_v28  ;;  %v1767_v20 = vadd.f32 %v1676_v39, %v6777_v49  ;;  %v1637_v47 = vpop.f32.mrb[33].mxu0  ;;  %v1678_v51 = vpop.f32.mrb[49].mxu1 }
 0x288   :  { %v1766_v22 = vadd.f32 %v1637_v47, %v6778_v41  ;;  %v1768_v55 = vadd.f32 %v1678_v51, %v6779_v8  ;;  %v1639_v34 = vpop.f32.mrb[34].mxu0  ;;  %v1680_v61 = vpop.f32.mrb[50].mxu1 }
 0x289   :  { %v1640_v25 = vpop.f32.mrb[35].mxu0  ;;  %v1681_v62 = vpop.f32.mrb[51].mxu1  ;;  %v3568_v44 = vmul.f32 -1.442695, %v1765_v42  ;;  %v3570_v30 = vmul.f32 -1.442695, %v1767_v20 }
 0x28a   :  { %v3569_v32 = vmul.f32 -1.442695, %v1766_v22  ;;  %v3571_v50 = vmul.f32 -1.442695, %v1768_v55  ;;  %v6780_v20 = vld [vmem:[#allocation146_spill] sm:$0xff]  ;;  %v6781_v42 = vld [vmem:[#allocation173_spill] sm:$0xff] }
 0x28b   :  { %3707 = vpow2.f32 %v3568_v44  ;;  %v6783_v44 = vld [vmem:[#allocation174_spill] sm:$0xff] }
 0x28c   :  { %3709 = vpow2.f32 %v3570_v30 }
 0x28d   :  { %3711 = vpow2.f32 %v3569_v32 }
 0x28e   :  { %3713 = vpow2.f32 %v3571_v50  ;;  %v6782_v50 = vld [vmem:[#allocation148_spill] sm:$0xff] }
 0x295   :  { %v3708_v28 = vpop.eup %3707 }
 0x296   :  { %v3710_v38 = vpop.eup %3709  ;;  %v1779_v40 = vadd.f32 1.0, %v3708_v28 }
 0x297   :  { %v3712_v49 = vpop.eup %3711  ;;  %v1791_v41 = vadd.f32 1.0, %v3710_v38 }
 0x298   :  { %v3714_v39 = vpop.eup %3713  ;;  %v1780_v47 = vadd.f32 1.0, %v3712_v49  ;;  %3715 = vrcp.f32 %v1779_v40 }
 0x299   :  { %v1792_v51 = vadd.f32 1.0, %v3714_v39  ;;  %3717 = vrcp.f32 %v1791_v41 }
 0x29a   :  { %3719 = vrcp.f32 %v1780_v47 }
 0x29b   :  { %3721 = vrcp.f32 %v1792_v51 }
 0x2a2   :  { %v3716_v41 = vpop.eup %3715 }
 0x2a3   :  { %v3718_v47 = vpop.eup %3717 }
 0x2c6   :  { %v1717_v61 = vpop.f32.mrb[36].mxu0  ;;  %v1758_v62 = vpop.f32.mrb[52].mxu1 }
 0x2c7   :  { %v1769_v22 = vadd.f32 %v1717_v61, %v6780_v20  ;;  %v1771_v55 = vadd.f32 %v1758_v62, %v6781_v42  ;;  %v1719_v30 = vpop.f32.mrb[37].mxu0  ;;  %v1760_v32 = vpop.f32.mrb[53].mxu1  ;;  %v1811_v42 = vmul.f32 %v3718_v47, %v5169_v21  ;;  %v6784_v47 = vld [vmem:[#allocation110_spill] sm:$0xff] }
 0x2c8   :  { %v1770_v25 = vadd.f32 %v1719_v30, %v6782_v50  ;;  %v1772_v34 = vadd.f32 %v1760_v32, %v6783_v44  ;;  %v1721_v8 = vpop.f32.mrb[38].mxu0  ;;  %v1762_v28 = vpop.f32.mrb[54].mxu1 }
 0x2c9   :  { %3723 = vtanh.f32 %v1769_v22  ;;  %v3572_v38 = vmul.f32 -1.442695, %v1771_v55  ;;  %v1722_v40 = vpop.f32.mrb[39].mxu0  ;;  %v1763_v49 = vpop.f32.mrb[55].mxu1 }
 0x2ca   :  { %3725 = vtanh.f32 %v1770_v25  ;;  %v3573_v39 = vmul.f32 -1.442695, %v1772_v34  ;;  %v3720_v61 = vpop.eup %3719 }
 0x2cb   :  { %3727 = vpow2.f32 %v3572_v38  ;;  %v3722_v62 = vpop.eup %3721 }
 0x2cc   :  { %3729 = vpow2.f32 %v3573_v39  ;;  %v1812_v50 = vmul.f32 %v3722_v62, %v5171_v23  ;;  %v6786_v62 = vld [vmem:[#allocation114_spill] sm:$0xff] }
 0x2d3   :  { %v3724_v20 = vpop.eup %3723 }
 0x2d4   :  { %v3726_v51 = vpop.eup %3725  ;;  %v1813_v30 = vmul.f32 %v3724_v20, %v3716_v41  ;;  %v6787_v20 = vld [vmem:[#allocation115_spill] sm:$0xff] }
 0x2d5   :  { %v3728_v32 = vpop.eup %3727  ;;  %v1814_v22 = vmul.f32 %v3726_v51, %v3720_v61  ;;  %v6785_v61 = vld [vmem:[#allocation112_spill] sm:$0xff] }
 0x2d6   :  { %v3730_v55 = vpop.eup %3729  ;;  %v5323_v44 = vadd.f32 %v1813_v30, %v1811_v42  ;;  %v1805_v25 = vadd.f32 1.0, %v3728_v32  ;;  %v6788_v51 = vld [vmem:[#allocation116_spill] sm:$0xff]  ;;  %v6789_v42 = vld [vmem:[#allocation117_spill] sm:$0xff]  ;;  %v6790_v30 = vld [vmem:[#allocation118_spill] sm:$0xff] }
 0x2d7   :  { %v5325_v34 = vadd.f32 %v1814_v22, %v1812_v50  ;;  %v1806_v8 = vadd.f32 1.0, %v3730_v55  ;;  %v6791_v32 = vld [vmem:[#allocation119_spill] sm:$0xff]  ;;  %v6792_v50 = vld [vmem:[#allocation120_spill] sm:$0xff]  ;;  %v6793_v22 = vld [vmem:[#allocation122_spill] sm:$0xff] }
 0x2d8   :  { %3731 = vtanh.f32 %v5323_v44  ;;  %v6794_v55 = vld [vmem:[#allocation124_spill] sm:$0xff] }
 0x2d9   :  { %3733 = vrcp.f32 %v1805_v25  ;;  %v6795_v25 = vld [vmem:[#allocation125_spill] sm:$0xff] }
 0x2da   :  { %3735 = vtanh.f32 %v5325_v34 }
 0x2db   :  { %3737 = vrcp.f32 %v1806_v8  ;;  %v6796_v8 = vld [vmem:[#allocation126_spill] sm:$0xff] }
 0x2e2   :  { %v3732_v28 = vpop.eup %3731 }
 0x2e3   :  { %v3734_v21 = vpop.eup %3733 }
 0x2e4   :  { %v3736_v38 = vpop.eup %3735  ;;  %v1819_v49 = vmul.f32 %v3734_v21, %v3732_v28  ;;  %v6797_v28 = vld [vmem:[#allocation108_spill] sm:$0xff]  ;;  %v6798_v21 = vld [vmem:[#allocation127_spill] sm:$0xff] }
 0x2e5   :  { %v3738_v40 = vpop.eup %3737 }
 0x2e6   :  { %v1820_v23 = vmul.f32 %v3738_v40, %v3736_v38  ;;  %v5329_v41 = vpack.c.bf16 %v1819_v49, %v1819_v49  ;;  %v6799_v38 = vld [vmem:[#allocation109_spill] sm:$0xff]  ;;  %v6800_v40 = vld [vmem:[#allocation128_spill] sm:$0xff]  ;;  %v6801_v49 = vld [vmem:[#allocation111_spill] sm:$0xff] }
 0x2e8   :  { %v1830_v39 = vpack.c.bf16 %v1820_v23, %v1820_v23  ;;  %v6802_v23 = vld [vmem:[#allocation129_spill] sm:$0xff] }
 0x2ea   :  { %1863 = vmatprep.mubr.bf16.mxu0 %v1830_v39  ;;  %1904 = vmatprep.mubr.bf16.mxu1 %v1830_v39 }
 0x2eb   :  { %1864 = vmatmul.mubr.bf16.vlgmr.msra.gmra.mrb[40].mxu0 %v5329_v41  ;;  %1905 = vmatmul.mubr.bf16.vlgmr.msra.gmra.mrb[56].mxu1 %v5329_v41 }
 0x2ec   :  { %1914 = vmatpush1.bf16.msra.mxu0 %v6681_v4  ;;  %1955 = vmatpush1.bf16.msra.mxu1 %v6682_v53 }
 0x2ed   :  { %1945 = vmatprep.mubr.bf16.mxu0 %v1830_v39  ;;  %1986 = vmatprep.mubr.bf16.mxu1 %v1830_v39  ;;  %v6803_v39 = vld [vmem:[#allocation113_spill] sm:$0xff] }
 0x2ee   :  { %1915 = vmatprep.subr.bf16.mxu0 %v6683_v45  ;;  %1956 = vmatprep.subr.bf16.mxu1 %v6684_v29 }
 0x2f0   :  { %1916 = vmatpush1.bf16.msra.mxu0 %v6685_v36  ;;  %1957 = vmatpush1.bf16.msra.mxu1 %v6686_v31 }
 0x2f1   :  { %1917 = vmatprep.subr.bf16.mxu0 %v6687_v57  ;;  %1958 = vmatprep.subr.bf16.mxu1 %v6688_v2 }
 0x2f4   :  { %1918 = vmatpush1.bf16.msra.mxu0 %v6689_v11  ;;  %1959 = vmatpush1.bf16.msra.mxu1 %v6690_v27 }
 0x2f5   :  { %1919 = vmatprep.subr.bf16.mxu0 %v6691_v24  ;;  %1960 = vmatprep.subr.bf16.mxu1 %v6692_v19 }
 0x2f8   :  { %1920 = vmatpush1.bf16.msra.mxu0 %v6693_v48  ;;  %1961 = vmatpush1.bf16.msra.mxu1 %v6694_v58 }
 0x2f9   :  { %1921 = vmatprep.subr.bf16.mxu0 %v6695_v1  ;;  %1962 = vmatprep.subr.bf16.mxu1 %v6696_v18 }
 0x2fc   :  { %1922 = vmatpush1.bf16.msra.mxu0 %v6697_v0  ;;  %1963 = vmatpush1.bf16.msra.mxu1 %v6698_v5 }
 0x2fd   :  { %1923 = vmatprep.subr.bf16.mxu0 %v6699_v63  ;;  %1964 = vmatprep.subr.bf16.mxu1 %v6700_v52 }
 0x300   :  { %1924 = vmatpush1.bf16.msra.mxu0 %v6701_v43  ;;  %1965 = vmatpush1.bf16.msra.mxu1 %v4728_v14 }
 0x301   :  { %1925 = vmatprep.subr.bf16.mxu0 %v6702_v6  ;;  %1966 = vmatprep.subr.bf16.mxu1 %v4734_v59 }
 0x304   :  { %1926 = vmatpush1.bf16.msra.mxu0 %v6703_v7  ;;  %1967 = vmatpush1.bf16.msra.mxu1 %v6784_v47 }
 0x305   :  { %1927 = vmatprep.subr.bf16.mxu0 %v6704_v37  ;;  %1968 = vmatprep.subr.bf16.mxu1 %v6785_v61 }
 0x308   :  { %1928 = vmatpush1.bf16.msra.mxu0 %v6705_v54  ;;  %1969 = vmatpush1.bf16.msra.mxu1 %v6786_v62 }
 0x309   :  { %1929 = vmatprep.subr.bf16.mxu0 %v6706_v35  ;;  %1970 = vmatprep.subr.bf16.mxu1 %v6787_v20 }
 0x30c   :  { %1930 = vmatpush1.bf16.msra.mxu0 %v6707_v15  ;;  %1971 = vmatpush1.bf16.msra.mxu1 %v6788_v51 }
 0x30d   :  { %1931 = vmatprep.subr.bf16.mxu0 %v6708_v10  ;;  %1972 = vmatprep.subr.bf16.mxu1 %v6789_v42 }
 0x310   :  { %1932 = vmatpush1.bf16.msra.mxu0 %v6709_v46  ;;  %1973 = vmatpush1.bf16.msra.mxu1 %v6790_v30 }
 0x311   :  { %1933 = vmatprep.subr.bf16.mxu0 %v6710_v26  ;;  %1974 = vmatprep.subr.bf16.mxu1 %v6791_v32 }
 0x314   :  { %1934 = vmatpush1.bf16.msra.mxu0 %v6711_v33  ;;  %1975 = vmatpush1.bf16.msra.mxu1 %v6792_v50 }
 0x315   :  { %1935 = vmatprep.subr.bf16.mxu0 %v6712_v12  ;;  %1976 = vmatprep.subr.bf16.mxu1 %v4816_v9 }
 0x318   :  { %1936 = vmatpush1.bf16.msra.mxu0 %v6713_v16  ;;  %1977 = vmatpush1.bf16.msra.mxu1 %v6793_v22 }
 0x319   :  { %1937 = vmatprep.subr.bf16.mxu0 %v6714_v13  ;;  %1978 = vmatprep.subr.bf16.mxu1 %v4830_v3  ;;  %v6873_v3 = vld [vmem:[#allocation140_spill] sm:$0xff]  ;;  %v6874_v13 = vld [vmem:[#allocation151_spill] sm:$0xff] }
 0x31c   :  { %1938 = vmatpush1.bf16.msra.mxu0 %v6715_v17  ;;  %1979 = vmatpush1.bf16.msra.mxu1 %v6794_v55  ;;  %v6872_v55 = vld [vmem:[#allocation149_spill] sm:$0xff] }
 0x31d   :  { %1939 = vmatprep.subr.bf16.mxu0 %v6716_v56  ;;  %1980 = vmatprep.subr.bf16.mxu1 %v6795_v25  ;;  %v6804_v56 = vld [vmem:[#allocation130_spill] sm:$0xff]  ;;  %v6805_v25 = vld [vmem:[#allocation5_spill] sm:$0xff] }
 0x320   :  { %1940 = vmatpush1.bf16.msra.mxu0 %v6717_v60  ;;  %1981 = vmatpush1.bf16.msra.mxu1 %v6796_v8  ;;  %v6806_v60 = vld [vmem:[#allocation10_spill] sm:$0xff] }
 0x321   :  { %1941 = vmatprep.subr.bf16.mxu0 %v6797_v28  ;;  %1982 = vmatprep.subr.bf16.mxu1 %v6798_v21  ;;  %v6807_v21 = vld [vmem:[#allocation6_spill] sm:$0xff]  ;;  %v6816_v28 = vld [vmem:[#allocation32_spill] sm:$0xff] }
 0x322   :  { %v6871_v8 = vld [vmem:[#allocation138_spill] sm:$0xff] }
 0x324   :  { %1942 = vmatpush1.bf16.msra.mxu0 %v6799_v38  ;;  %1983 = vmatpush1.bf16.msra.mxu1 %v6800_v40  ;;  %v6808_v38 = vld [vmem:[#allocation24_spill] sm:$0xff]  ;;  %v6809_v40 = vld [vmem:[#allocation7_spill] sm:$0xff] }
 0x325   :  { %1943 = vmatprep.subr.bf16.mxu0 %v6801_v49  ;;  %1984 = vmatprep.subr.bf16.mxu1 %v6802_v23  ;;  %v6810_v49 = vld [vmem:[#allocation26_spill] sm:$0xff]  ;;  %v6811_v23 = vld [vmem:[#allocation8_spill] sm:$0xff] }
 0x328   :  { %1944 = vmatpush1.bf16.msra.mxu0 %v6803_v39  ;;  %1985 = vmatpush1.bf16.msra.mxu1 %v6804_v56  ;;  %v6812_v39 = vld [vmem:[#allocation28_spill] sm:$0xff]  ;;  %v6813_v56 = vld [vmem:[#allocation9_spill] sm:$0xff] }
 0x329   :  { %2061 = vmatprep.subr.bf16.mxu0 %v6805_v25  ;;  %2102 = vmatprep.subr.bf16.mxu1 %v6806_v60  ;;  %v6814_v25 = vld [vmem:[#allocation30_spill] sm:$0xff]  ;;  %v6815_v60 = vld [vmem:[#allocation11_spill] sm:$0xff] }
 0x32b   :  { %1946 = vmatmul.mubr.bf16.vlgmr.msra.gmra.mrb[44].mxu0 %v5329_v41  ;;  %1987 = vmatmul.mubr.bf16.vlgmr.msra.gmra.mrb[60].mxu1 %v5329_v41  ;;  %v6817_v41 = vld [vmem:[#allocation12_spill] sm:$0xff] }
 0x32c   :  { %2062 = vmatpush1.bf16.msra.mxu0 %v6807_v21  ;;  %2103 = vmatpush1.bf16.msra.mxu1 %v6808_v38  ;;  %v6818_v21 = vld [vmem:[#allocation34_spill] sm:$0xff]  ;;  %v6819_v38 = vld [vmem:[#allocation13_spill] sm:$0xff] }
 0x32d   :  { %2063 = vmatprep.subr.bf16.mxu0 %v6809_v40  ;;  %2104 = vmatprep.subr.bf16.mxu1 %v6810_v49  ;;  %v6820_v40 = vld [vmem:[#allocation36_spill] sm:$0xff]  ;;  %v6821_v49 = vld [vmem:[#allocation14_spill] sm:$0xff] }
 0x330   :  { %2064 = vmatpush1.bf16.msra.mxu0 %v6811_v23  ;;  %2105 = vmatpush1.bf16.msra.mxu1 %v6812_v39  ;;  %v6822_v23 = vld [vmem:[#allocation38_spill] sm:$0xff]  ;;  %v6823_v39 = vld [vmem:[#allocation15_spill] sm:$0xff] }
 0x331   :  { %2065 = vmatprep.subr.bf16.mxu0 %v6813_v56  ;;  %2106 = vmatprep.subr.bf16.mxu1 %v6814_v25  ;;  %v6824_v56 = vld [vmem:[#allocation40_spill] sm:$0xff] }
 0x332   :  { %v6825_v25 = vld [vmem:[#allocation16_spill] sm:$0xff] }
 0x334   :  { %2066 = vmatpush1.bf16.msra.mxu0 %v6815_v60  ;;  %2107 = vmatpush1.bf16.msra.mxu1 %v6816_v28  ;;  %v6826_v60 = vld [vmem:[#allocation42_spill] sm:$0xff]  ;;  %v6827_v28 = vld [vmem:[#allocation17_spill] sm:$0xff] }
 0x335   :  { %2067 = vmatprep.subr.bf16.mxu0 %v6817_v41  ;;  %2108 = vmatprep.subr.bf16.mxu1 %v6818_v21  ;;  %v6828_v41 = vld [vmem:[#allocation44_spill] sm:$0xff]  ;;  %v6829_v21 = vld [vmem:[#allocation18_spill] sm:$0xff] }
 0x338   :  { %2068 = vmatpush1.bf16.msra.mxu0 %v6819_v38  ;;  %2109 = vmatpush1.bf16.msra.mxu1 %v6820_v40  ;;  %v6830_v38 = vld [vmem:[#allocation46_spill] sm:$0xff]  ;;  %v6831_v40 = vld [vmem:[#allocation19_spill] sm:$0xff] }
 0x339   :  { %2069 = vmatprep.subr.bf16.mxu0 %v6821_v49  ;;  %2110 = vmatprep.subr.bf16.mxu1 %v6822_v23  ;;  %v6832_v49 = vld [vmem:[#allocation48_spill] sm:$0xff] }
 0x33a   :  { %v6833_v23 = vld [vmem:[#allocation20_spill] sm:$0xff] }
 0x33c   :  { %2070 = vmatpush1.bf16.msra.mxu0 %v6823_v39  ;;  %2111 = vmatpush1.bf16.msra.mxu1 %v6824_v56  ;;  %v6834_v39 = vld [vmem:[#allocation50_spill] sm:$0xff]  ;;  %v6835_v56 = vld [vmem:[#allocation21_spill] sm:$0xff] }
 0x33d   :  { %2071 = vmatprep.subr.bf16.mxu0 %v6825_v25  ;;  %2112 = vmatprep.subr.bf16.mxu1 %v6826_v60  ;;  %v6836_v25 = vld [vmem:[#allocation52_spill] sm:$0xff]  ;;  %v6837_v60 = vld [vmem:[#allocation22_spill] sm:$0xff] }
 0x340   :  { %2072 = vmatpush1.bf16.msra.mxu0 %v6827_v28  ;;  %2113 = vmatpush1.bf16.msra.mxu1 %v6828_v41  ;;  %v6838_v28 = vld [vmem:[#allocation53_spill] sm:$0xff]  ;;  %v6839_v41 = vld [vmem:[#allocation23_spill] sm:$0xff] }
 0x341   :  { %2073 = vmatprep.subr.bf16.mxu0 %v6829_v21  ;;  %2114 = vmatprep.subr.bf16.mxu1 %v6830_v38  ;;  %v6840_v21 = vld [vmem:[#allocation55_spill] sm:$0xff]  ;;  %v6841_v38 = vld [vmem:[#allocation25_spill] sm:$0xff] }
 0x344   :  { %2074 = vmatpush1.bf16.msra.mxu0 %v6831_v40  ;;  %2115 = vmatpush1.bf16.msra.mxu1 %v6832_v49  ;;  %v6842_v40 = vld [vmem:[#allocation57_spill] sm:$0xff]  ;;  %v6843_v49 = vld [vmem:[#allocation27_spill] sm:$0xff] }
 0x345   :  { %2075 = vmatprep.subr.bf16.mxu0 %v6833_v23  ;;  %2116 = vmatprep.subr.bf16.mxu1 %v6834_v39  ;;  %v6844_v23 = vld [vmem:[#allocation59_spill] sm:$0xff]  ;;  %v6845_v39 = vld [vmem:[#allocation29_spill] sm:$0xff] }
 0x348   :  { %2076 = vmatpush1.bf16.msra.mxu0 %v6835_v56  ;;  %2117 = vmatpush1.bf16.msra.mxu1 %v6836_v25  ;;  %v6846_v56 = vld [vmem:[#allocation61_spill] sm:$0xff]  ;;  %v6847_v25 = vld [vmem:[#allocation31_spill] sm:$0xff] }
 0x349   :  { %2077 = vmatprep.subr.bf16.mxu0 %v6837_v60  ;;  %2118 = vmatprep.subr.bf16.mxu1 %v6838_v28  ;;  %v6848_v60 = vld [vmem:[#allocation63_spill] sm:$0xff]  ;;  %v6849_v28 = vld [vmem:[#allocation33_spill] sm:$0xff] }
 0x34c   :  { %2078 = vmatpush1.bf16.msra.mxu0 %v6839_v41  ;;  %2119 = vmatpush1.bf16.msra.mxu1 %v6840_v21  ;;  %v6850_v41 = vld [vmem:[#allocation65_spill] sm:$0xff]  ;;  %v6851_v21 = vld [vmem:[#allocation35_spill] sm:$0xff] }
 0x34d   :  { %2079 = vmatprep.subr.bf16.mxu0 %v6841_v38  ;;  %2120 = vmatprep.subr.bf16.mxu1 %v6842_v40  ;;  %v6852_v38 = vld [vmem:[#allocation67_spill] sm:$0xff]  ;;  %v6853_v40 = vld [vmem:[#allocation37_spill] sm:$0xff] }
 0x350   :  { %2080 = vmatpush1.bf16.msra.mxu0 %v6843_v49  ;;  %2121 = vmatpush1.bf16.msra.mxu1 %v6844_v23  ;;  %v6854_v49 = vld [vmem:[#allocation69_spill] sm:$0xff]  ;;  %v6855_v23 = vld [vmem:[#allocation39_spill] sm:$0xff] }
 0x351   :  { %2081 = vmatprep.subr.bf16.mxu0 %v6845_v39  ;;  %2122 = vmatprep.subr.bf16.mxu1 %v6846_v56  ;;  %v6856_v39 = vld [vmem:[#allocation71_spill] sm:$0xff]  ;;  %v6857_v56 = vld [vmem:[#allocation41_spill] sm:$0xff] }
 0x354   :  { %2082 = vmatpush1.bf16.msra.mxu0 %v6847_v25  ;;  %2123 = vmatpush1.bf16.msra.mxu1 %v6848_v60  ;;  %v6858_v25 = vld [vmem:[#allocation73_spill] sm:$0xff]  ;;  %v6859_v60 = vld [vmem:[#allocation43_spill] sm:$0xff] }
 0x355   :  { %2083 = vmatprep.subr.bf16.mxu0 %v6849_v28  ;;  %2124 = vmatprep.subr.bf16.mxu1 %v6850_v41  ;;  %v6860_v28 = vld [vmem:[#allocation75_spill] sm:$0xff]  ;;  %v6861_v41 = vld [vmem:[#allocation45_spill] sm:$0xff] }
 0x358   :  { %2084 = vmatpush1.bf16.msra.mxu0 %v6851_v21  ;;  %2125 = vmatpush1.bf16.msra.mxu1 %v6852_v38  ;;  %v6862_v21 = vld [vmem:[#allocation77_spill] sm:$0xff]  ;;  %v6863_v38 = vld [vmem:[#allocation47_spill] sm:$0xff] }
 0x359   :  { %2085 = vmatprep.subr.bf16.mxu0 %v6853_v40  ;;  %2126 = vmatprep.subr.bf16.mxu1 %v6854_v49  ;;  %v6864_v40 = vld [vmem:[#allocation79_spill] sm:$0xff]  ;;  %v6865_v49 = vld [vmem:[#allocation49_spill] sm:$0xff] }
 0x35c   :  { %2086 = vmatpush1.bf16.msra.mxu0 %v6855_v23  ;;  %2127 = vmatpush1.bf16.msra.mxu1 %v6856_v39  ;;  %v6866_v23 = vld [vmem:[#allocation81_spill] sm:$0xff]  ;;  %v6867_v39 = vld [vmem:[#allocation51_spill] sm:$0xff] }
 0x35d   :  { %2087 = vmatprep.subr.bf16.mxu0 %v6857_v56  ;;  %2128 = vmatprep.subr.bf16.mxu1 %v6858_v25  ;;  %v6868_v56 = vld [vmem:[#allocation83_spill] sm:$0xff]  ;;  %v6869_v25 = vld [vmem:[#allocation54_spill] sm:$0xff] }
 0x360   :  { %2088 = vmatpush1.bf16.msra.mxu0 %v6859_v60  ;;  %2129 = vmatpush1.bf16.msra.mxu1 %v6860_v28  ;;  %v6870_v60 = vld [vmem:[#allocation86_spill] sm:$0xff] }
 0x361   :  { %2089 = vmatprep.subr.bf16.mxu0 %v6861_v41  ;;  %2130 = vmatprep.subr.bf16.mxu1 %v6862_v21 }
 0x364   :  { %2090 = vmatpush1.bf16.msra.mxu0 %v6863_v38  ;;  %2131 = vmatpush1.bf16.msra.mxu1 %v6864_v40 }
 0x365   :  { %2091 = vmatprep.subr.bf16.mxu0 %v6865_v49  ;;  %2132 = vmatprep.subr.bf16.mxu1 %v6866_v23 }
 0x368   :  { %2092 = vmatpush1.bf16.msra.mxu0 %v6867_v39  ;;  %2133 = vmatpush1.bf16.msra.mxu1 %v6868_v56 }
 0x369   :  { %2143 = vmatprep.subr.bf16.mxu0 %v6869_v25  ;;  %2184 = vmatprep.subr.bf16.mxu1 %v6870_v60 }
 0x3be   :  { %v1865_v28 = vpop.f32.mrb[40].mxu0  ;;  %v1906_v41 = vpop.f32.mrb[56].mxu1 }
 0x3bf   :  { %v1995_v21 = vadd.f32 %v1865_v28, %v6871_v8  ;;  %v1997_v38 = vadd.f32 %v1906_v41, %v6872_v55  ;;  %v1867_v17 = vpop.f32.mrb[41].mxu0  ;;  %v1908_v40 = vpop.f32.mrb[57].mxu1 }
 0x3c0   :  { %v1996_v49 = vadd.f32 %v1867_v17, %v6873_v3  ;;  %v1998_v23 = vadd.f32 %v1908_v40, %v6874_v13  ;;  %v1869_v22 = vpop.f32.mrb[42].mxu0  ;;  %v1910_v39 = vpop.f32.mrb[58].mxu1 }
 0x3c1   :  { %v1870_v16 = vpop.f32.mrb[43].mxu0  ;;  %v1911_v56 = vpop.f32.mrb[59].mxu1  ;;  %v3574_v9 = vmul.f32 -1.442695, %v1995_v21  ;;  %v3576_v25 = vmul.f32 -1.442695, %v1997_v38 }
 0x3c2   :  { %v3575_v12 = vmul.f32 -1.442695, %v1996_v49  ;;  %v3577_v60 = vmul.f32 -1.442695, %v1998_v23  ;;  %v6875_v22 = vld [vmem:[#allocation150_spill] sm:$0xff]  ;;  %v6876_v38 = vld [vmem:[#allocation175_spill] sm:$0xff] }
 0x3c3   :  { %3739 = vpow2.f32 %v3574_v9  ;;  %v6878_v49 = vld [vmem:[#allocation176_spill] sm:$0xff] }
 0x3c4   :  { %3741 = vpow2.f32 %v3576_v25 }
 0x3c5   :  { %3743 = vpow2.f32 %v3575_v12 }
 0x3c6   :  { %3745 = vpow2.f32 %v3577_v60  ;;  %v6877_v60 = vld [vmem:[#allocation152_spill] sm:$0xff] }
 0x3cd   :  { %v3740_v8 = vpop.eup %3739 }
 0x3ce   :  { %v3742_v55 = vpop.eup %3741  ;;  %v2009_v50 = vadd.f32 1.0, %v3740_v8 }
 0x3cf   :  { %v3744_v28 = vpop.eup %3743  ;;  %v2021_v17 = vadd.f32 1.0, %v3742_v55 }
 0x3d0   :  { %v3746_v41 = vpop.eup %3745  ;;  %v2010_v3 = vadd.f32 1.0, %v3744_v28  ;;  %3747 = vrcp.f32 %v2009_v50 }
 0x3d1   :  { %v2022_v13 = vadd.f32 1.0, %v3746_v41  ;;  %3749 = vrcp.f32 %v2021_v17 }
 0x3d2   :  { %3751 = vrcp.f32 %v2010_v3 }
 0x3d3   :  { %3753 = vrcp.f32 %v2022_v13 }
 0x3da   :  { %v3748_v17 = vpop.eup %3747 }
 0x3db   :  { %v3750_v3 = vpop.eup %3749 }
 0x3fe   :  { %v1947_v16 = vpop.f32.mrb[44].mxu0  ;;  %v1988_v56 = vpop.f32.mrb[60].mxu1 }
 0x3ff   :  { %v1999_v21 = vadd.f32 %v1947_v16, %v6875_v22  ;;  %v2001_v9 = vadd.f32 %v1988_v56, %v6876_v38  ;;  %v1949_v25 = vpop.f32.mrb[45].mxu0  ;;  %v1990_v12 = vpop.f32.mrb[61].mxu1  ;;  %v2041_v38 = vmul.f32 %v3750_v3, %v5323_v44  ;;  %v6879_v3 = vld [vmem:[#allocation120_spill] sm:$0xff] }
 0x400   :  { %v2000_v40 = vadd.f32 %v1949_v25, %v6877_v60  ;;  %v2002_v23 = vadd.f32 %v1990_v12, %v6878_v49  ;;  %v1951_v39 = vpop.f32.mrb[46].mxu0  ;;  %v1992_v8 = vpop.f32.mrb[62].mxu1 }
 0x401   :  { %3755 = vtanh.f32 %v1999_v21  ;;  %v3578_v55 = vmul.f32 -1.442695, %v2001_v9  ;;  %v1952_v50 = vpop.f32.mrb[47].mxu0  ;;  %v1993_v28 = vpop.f32.mrb[63].mxu1 }
 0x402   :  { %3757 = vtanh.f32 %v2000_v40  ;;  %v3579_v41 = vmul.f32 -1.442695, %v2002_v23  ;;  %v3752_v16 = vpop.eup %3751 }
 0x403   :  { %3759 = vpow2.f32 %v3578_v55  ;;  %v3754_v56 = vpop.eup %3753 }
 0x404   :  { %3761 = vpow2.f32 %v3579_v41  ;;  %v2042_v60 = vmul.f32 %v3754_v56, %v5325_v34  ;;  %v6881_v56 = vld [vmem:[#allocation121_spill] sm:$0xff] }
 0x40b   :  { %v3756_v22 = vpop.eup %3755 }
 0x40c   :  { %v3758_v13 = vpop.eup %3757  ;;  %v2043_v25 = vmul.f32 %v3756_v22, %v3748_v17  ;;  %v6882_v22 = vld [vmem:[#allocation99_spill] sm:$0xff] }
 0x40d   :  { %v3760_v12 = vpop.eup %3759  ;;  %v2044_v21 = vmul.f32 %v3758_v13, %v3752_v16  ;;  %v6880_v16 = vld [vmem:[#allocation97_spill] sm:$0xff]  ;;  %v6883_v13 = vld [vmem:[#allocation122_spill] sm:$0xff] }
 0x40e   :  { %v3762_v9 = vpop.eup %3761  ;;  %v5473_v49 = vadd.f32 %v2043_v25, %v2041_v38  ;;  %v2035_v40 = vadd.f32 1.0, %v3760_v12  ;;  %v6884_v38 = vld [vmem:[#allocation101_spill] sm:$0xff]  ;;  %v6885_v25 = vld [vmem:[#allocation123_spill] sm:$0xff] }
 0x40f   :  { %v5475_v23 = vadd.f32 %v2044_v21, %v2042_v60  ;;  %v2036_v39 = vadd.f32 1.0, %v3762_v9  ;;  %v6886_v12 = vld [vmem:[#allocation103_spill] sm:$0xff]  ;;  %v6887_v60 = vld [vmem:[#allocation124_spill] sm:$0xff]  ;;  %v6888_v21 = vld [vmem:[#allocation105_spill] sm:$0xff] }
 0x410   :  { %3763 = vtanh.f32 %v5473_v49  ;;  %v6889_v9 = vld [vmem:[#allocation125_spill] sm:$0xff] }
 0x411   :  { %3765 = vrcp.f32 %v2035_v40  ;;  %v6890_v40 = vld [vmem:[#allocation107_spill] sm:$0xff] }
 0x412   :  { %3767 = vtanh.f32 %v5475_v23 }
 0x413   :  { %3769 = vrcp.f32 %v2036_v39  ;;  %v6891_v39 = vld [vmem:[#allocation126_spill] sm:$0xff] }
 0x41a   :  { %v3764_v8 = vpop.eup %3763 }
 0x41b   :  { %v3766_v44 = vpop.eup %3765 }
 0x41c   :  { %v3768_v55 = vpop.eup %3767  ;;  %v2049_v28 = vmul.f32 %v3766_v44, %v3764_v8  ;;  %v6892_v8 = vld [vmem:[#allocation108_spill] sm:$0xff]  ;;  %v6893_v44 = vld [vmem:[#allocation127_spill] sm:$0xff] }
 0x41d   :  { %v3770_v50 = vpop.eup %3769 }
 0x41e   :  { %v2050_v34 = vmul.f32 %v3770_v50, %v3768_v55  ;;  %v5479_v17 = vpack.c.bf16 %v2049_v28, %v2049_v28  ;;  %v6894_v55 = vld [vmem:[#allocation109_spill] sm:$0xff]  ;;  %v6895_v50 = vld [vmem:[#allocation128_spill] sm:$0xff]  ;;  %v6896_v28 = vld [vmem:[#allocation111_spill] sm:$0xff] }
 0x420   :  { %v2060_v41 = vpack.c.bf16 %v2050_v34, %v2050_v34  ;;  %v6897_v34 = vld [vmem:[#allocation129_spill] sm:$0xff] }
 0x422   :  { %2093 = vmatprep.mubr.bf16.mxu0 %v2060_v41  ;;  %2134 = vmatprep.mubr.bf16.mxu1 %v2060_v41 }
 0x423   :  { %2094 = vmatmul.mubr.bf16.vlgmr.msra.gmra.mrb[48].mxu0 %v5479_v17  ;;  %2135 = vmatmul.mubr.bf16.vlgmr.msra.gmra.mrb[64].mxu1 %v5479_v17 }
 0x424   :  { %2144 = vmatpush1.bf16.msra.mxu0 %v6681_v4  ;;  %2185 = vmatpush1.bf16.msra.mxu1 %v6682_v53 }
 0x425   :  { %2175 = vmatprep.mubr.bf16.mxu0 %v2060_v41  ;;  %2216 = vmatprep.mubr.bf16.mxu1 %v2060_v41  ;;  %v6898_v41 = vld [vmem:[#allocation113_spill] sm:$0xff] }
 0x426   :  { %2145 = vmatprep.subr.bf16.mxu0 %v6683_v45  ;;  %2186 = vmatprep.subr.bf16.mxu1 %v6684_v29 }
 0x428   :  { %2146 = vmatpush1.bf16.msra.mxu0 %v6685_v36  ;;  %2187 = vmatpush1.bf16.msra.mxu1 %v6686_v31 }
 0x429   :  { %2147 = vmatprep.subr.bf16.mxu0 %v6687_v57  ;;  %2188 = vmatprep.subr.bf16.mxu1 %v6688_v2 }
 0x42c   :  { %2148 = vmatpush1.bf16.msra.mxu0 %v6689_v11  ;;  %2189 = vmatpush1.bf16.msra.mxu1 %v6690_v27 }
 0x42d   :  { %2149 = vmatprep.subr.bf16.mxu0 %v6691_v24  ;;  %2190 = vmatprep.subr.bf16.mxu1 %v6692_v19 }
 0x430   :  { %2150 = vmatpush1.bf16.msra.mxu0 %v6693_v48  ;;  %2191 = vmatpush1.bf16.msra.mxu1 %v6694_v58 }
 0x431   :  { %2151 = vmatprep.subr.bf16.mxu0 %v6695_v1  ;;  %2192 = vmatprep.subr.bf16.mxu1 %v6696_v18 }
 0x434   :  { %2152 = vmatpush1.bf16.msra.mxu0 %v6697_v0  ;;  %2193 = vmatpush1.bf16.msra.mxu1 %v6698_v5 }
 0x435   :  { %2153 = vmatprep.subr.bf16.mxu0 %v6699_v63  ;;  %2194 = vmatprep.subr.bf16.mxu1 %v6700_v52 }
 0x438   :  { %2154 = vmatpush1.bf16.msra.mxu0 %v6701_v43  ;;  %2195 = vmatpush1.bf16.msra.mxu1 %v4728_v14 }
 0x439   :  { %2155 = vmatprep.subr.bf16.mxu0 %v6702_v6  ;;  %2196 = vmatprep.subr.bf16.mxu1 %v4734_v59 }
 0x43c   :  { %2156 = vmatpush1.bf16.msra.mxu0 %v6703_v7  ;;  %2197 = vmatpush1.bf16.msra.mxu1 %v6784_v47 }
 0x43d   :  { %2157 = vmatprep.subr.bf16.mxu0 %v6704_v37  ;;  %2198 = vmatprep.subr.bf16.mxu1 %v6785_v61 }
 0x440   :  { %2158 = vmatpush1.bf16.msra.mxu0 %v6705_v54  ;;  %2199 = vmatpush1.bf16.msra.mxu1 %v6786_v62 }
 0x441   :  { %2159 = vmatprep.subr.bf16.mxu0 %v6706_v35  ;;  %2200 = vmatprep.subr.bf16.mxu1 %v6787_v20 }
 0x444   :  { %2160 = vmatpush1.bf16.msra.mxu0 %v6707_v15  ;;  %2201 = vmatpush1.bf16.msra.mxu1 %v6788_v51 }
 0x445   :  { %2161 = vmatprep.subr.bf16.mxu0 %v6708_v10  ;;  %2202 = vmatprep.subr.bf16.mxu1 %v6789_v42 }
 0x448   :  { %2162 = vmatpush1.bf16.msra.mxu0 %v6709_v46  ;;  %2203 = vmatpush1.bf16.msra.mxu1 %v6790_v30 }
 0x449   :  { %2163 = vmatprep.subr.bf16.mxu0 %v6710_v26  ;;  %2204 = vmatprep.subr.bf16.mxu1 %v6791_v32 }
 0x44c   :  { %2164 = vmatpush1.bf16.msra.mxu0 %v6711_v33  ;;  %2205 = vmatpush1.bf16.msra.mxu1 %v6879_v3 }
 0x44d   :  { %2165 = vmatprep.subr.bf16.mxu0 %v6880_v16  ;;  %2206 = vmatprep.subr.bf16.mxu1 %v6881_v56 }
 0x450   :  { %2166 = vmatpush1.bf16.msra.mxu0 %v6882_v22  ;;  %2207 = vmatpush1.bf16.msra.mxu1 %v6883_v13 }
 0x451   :  { %2167 = vmatprep.subr.bf16.mxu0 %v6884_v38  ;;  %2208 = vmatprep.subr.bf16.mxu1 %v6885_v25  ;;  %v6968_v25 = vld [vmem:[#allocation144_spill] sm:$0xff]  ;;  %v6969_v38 = vld [vmem:[#allocation155_spill] sm:$0xff] }
 0x454   :  { %2168 = vmatpush1.bf16.msra.mxu0 %v6886_v12  ;;  %2209 = vmatpush1.bf16.msra.mxu1 %v6887_v60  ;;  %v6967_v60 = vld [vmem:[#allocation153_spill] sm:$0xff] }
 0x455   :  { %2169 = vmatprep.subr.bf16.mxu0 %v6888_v21  ;;  %2210 = vmatprep.subr.bf16.mxu1 %v6889_v9  ;;  %v6899_v21 = vld [vmem:[#allocation130_spill] sm:$0xff]  ;;  %v6900_v9 = vld [vmem:[#allocation5_spill] sm:$0xff] }
 0x458   :  { %2170 = vmatpush1.bf16.msra.mxu0 %v6890_v40  ;;  %2211 = vmatpush1.bf16.msra.mxu1 %v6891_v39  ;;  %v6901_v40 = vld [vmem:[#allocation10_spill] sm:$0xff] }
 0x459   :  { %2171 = vmatprep.subr.bf16.mxu0 %v6892_v8  ;;  %2212 = vmatprep.subr.bf16.mxu1 %v6893_v44  ;;  %v6902_v44 = vld [vmem:[#allocation6_spill] sm:$0xff]  ;;  %v6911_v8 = vld [vmem:[#allocation32_spill] sm:$0xff] }
 0x45a   :  { %v6966_v39 = vld [vmem:[#allocation142_spill] sm:$0xff] }
 0x45c   :  { %2172 = vmatpush1.bf16.msra.mxu0 %v6894_v55  ;;  %2213 = vmatpush1.bf16.msra.mxu1 %v6895_v50  ;;  %v6903_v55 = vld [vmem:[#allocation24_spill] sm:$0xff]  ;;  %v6904_v50 = vld [vmem:[#allocation7_spill] sm:$0xff] }
 0x45d   :  { %2173 = vmatprep.subr.bf16.mxu0 %v6896_v28  ;;  %2214 = vmatprep.subr.bf16.mxu1 %v6897_v34  ;;  %v6905_v28 = vld [vmem:[#allocation26_spill] sm:$0xff]  ;;  %v6906_v34 = vld [vmem:[#allocation8_spill] sm:$0xff] }
 0x460   :  { %2174 = vmatpush1.bf16.msra.mxu0 %v6898_v41  ;;  %2215 = vmatpush1.bf16.msra.mxu1 %v6899_v21  ;;  %v6907_v41 = vld [vmem:[#allocation28_spill] sm:$0xff]  ;;  %v6908_v21 = vld [vmem:[#allocation9_spill] sm:$0xff] }
 0x461   :  { %2291 = vmatprep.subr.bf16.mxu0 %v6900_v9  ;;  %2332 = vmatprep.subr.bf16.mxu1 %v6901_v40  ;;  %v6909_v9 = vld [vmem:[#allocation30_spill] sm:$0xff]  ;;  %v6910_v40 = vld [vmem:[#allocation11_spill] sm:$0xff] }
 0x463   :  { %2176 = vmatmul.mubr.bf16.vlgmr.msra.gmra.mrb[52].mxu0 %v5479_v17  ;;  %2217 = vmatmul.mubr.bf16.vlgmr.msra.gmra.mrb[68].mxu1 %v5479_v17  ;;  %v6912_v17 = vld [vmem:[#allocation12_spill] sm:$0xff] }
 0x464   :  { %2292 = vmatpush1.bf16.msra.mxu0 %v6902_v44  ;;  %2333 = vmatpush1.bf16.msra.mxu1 %v6903_v55  ;;  %v6913_v44 = vld [vmem:[#allocation34_spill] sm:$0xff]  ;;  %v6914_v55 = vld [vmem:[#allocation13_spill] sm:$0xff] }
 0x465   :  { %2293 = vmatprep.subr.bf16.mxu0 %v6904_v50  ;;  %2334 = vmatprep.subr.bf16.mxu1 %v6905_v28  ;;  %v6915_v50 = vld [vmem:[#allocation36_spill] sm:$0xff]  ;;  %v6916_v28 = vld [vmem:[#allocation14_spill] sm:$0xff] }
 0x468   :  { %2294 = vmatpush1.bf16.msra.mxu0 %v6906_v34  ;;  %2335 = vmatpush1.bf16.msra.mxu1 %v6907_v41  ;;  %v6917_v34 = vld [vmem:[#allocation38_spill] sm:$0xff]  ;;  %v6918_v41 = vld [vmem:[#allocation15_spill] sm:$0xff] }
 0x469   :  { %2295 = vmatprep.subr.bf16.mxu0 %v6908_v21  ;;  %2336 = vmatprep.subr.bf16.mxu1 %v6909_v9  ;;  %v6919_v21 = vld [vmem:[#allocation40_spill] sm:$0xff] }
 0x46a   :  { %v6920_v9 = vld [vmem:[#allocation16_spill] sm:$0xff] }
 0x46c   :  { %2296 = vmatpush1.bf16.msra.mxu0 %v6910_v40  ;;  %2337 = vmatpush1.bf16.msra.mxu1 %v6911_v8  ;;  %v6921_v40 = vld [vmem:[#allocation42_spill] sm:$0xff]  ;;  %v6922_v8 = vld [vmem:[#allocation17_spill] sm:$0xff] }
 0x46d   :  { %2297 = vmatprep.subr.bf16.mxu0 %v6912_v17  ;;  %2338 = vmatprep.subr.bf16.mxu1 %v6913_v44  ;;  %v6923_v17 = vld [vmem:[#allocation44_spill] sm:$0xff]  ;;  %v6924_v44 = vld [vmem:[#allocation18_spill] sm:$0xff] }
 0x470   :  { %2298 = vmatpush1.bf16.msra.mxu0 %v6914_v55  ;;  %2339 = vmatpush1.bf16.msra.mxu1 %v6915_v50  ;;  %v6925_v55 = vld [vmem:[#allocation46_spill] sm:$0xff]  ;;  %v6926_v50 = vld [vmem:[#allocation19_spill] sm:$0xff] }
 0x471   :  { %2299 = vmatprep.subr.bf16.mxu0 %v6916_v28  ;;  %2340 = vmatprep.subr.bf16.mxu1 %v6917_v34  ;;  %v6927_v28 = vld [vmem:[#allocation48_spill] sm:$0xff] }
 0x472   :  { %v6928_v34 = vld [vmem:[#allocation20_spill] sm:$0xff] }
 0x474   :  { %2300 = vmatpush1.bf16.msra.mxu0 %v6918_v41  ;;  %2341 = vmatpush1.bf16.msra.mxu1 %v6919_v21  ;;  %v6929_v41 = vld [vmem:[#allocation50_spill] sm:$0xff]  ;;  %v6930_v21 = vld [vmem:[#allocation21_spill] sm:$0xff] }
 0x475   :  { %2301 = vmatprep.subr.bf16.mxu0 %v6920_v9  ;;  %2342 = vmatprep.subr.bf16.mxu1 %v6921_v40  ;;  %v6931_v9 = vld [vmem:[#allocation52_spill] sm:$0xff]  ;;  %v6932_v40 = vld [vmem:[#allocation22_spill] sm:$0xff] }
 0x478   :  { %2302 = vmatpush1.bf16.msra.mxu0 %v6922_v8  ;;  %2343 = vmatpush1.bf16.msra.mxu1 %v6923_v17  ;;  %v6933_v8 = vld [vmem:[#allocation53_spill] sm:$0xff]  ;;  %v6934_v17 = vld [vmem:[#allocation23_spill] sm:$0xff] }
 0x479   :  { %2303 = vmatprep.subr.bf16.mxu0 %v6924_v44  ;;  %2344 = vmatprep.subr.bf16.mxu1 %v6925_v55  ;;  %v6935_v44 = vld [vmem:[#allocation55_spill] sm:$0xff]  ;;  %v6936_v55 = vld [vmem:[#allocation25_spill] sm:$0xff] }
 0x47c   :  { %2304 = vmatpush1.bf16.msra.mxu0 %v6926_v50  ;;  %2345 = vmatpush1.bf16.msra.mxu1 %v6927_v28  ;;  %v6937_v50 = vld [vmem:[#allocation57_spill] sm:$0xff]  ;;  %v6938_v28 = vld [vmem:[#allocation27_spill] sm:$0xff] }
 0x47d   :  { %2305 = vmatprep.subr.bf16.mxu0 %v6928_v34  ;;  %2346 = vmatprep.subr.bf16.mxu1 %v6929_v41  ;;  %v6939_v34 = vld [vmem:[#allocation59_spill] sm:$0xff]  ;;  %v6940_v41 = vld [vmem:[#allocation29_spill] sm:$0xff] }
 0x480   :  { %2306 = vmatpush1.bf16.msra.mxu0 %v6930_v21  ;;  %2347 = vmatpush1.bf16.msra.mxu1 %v6931_v9  ;;  %v6941_v21 = vld [vmem:[#allocation61_spill] sm:$0xff]  ;;  %v6942_v9 = vld [vmem:[#allocation31_spill] sm:$0xff] }
 0x481   :  { %2307 = vmatprep.subr.bf16.mxu0 %v6932_v40  ;;  %2348 = vmatprep.subr.bf16.mxu1 %v6933_v8  ;;  %v6943_v40 = vld [vmem:[#allocation63_spill] sm:$0xff]  ;;  %v6944_v8 = vld [vmem:[#allocation33_spill] sm:$0xff] }
 0x484   :  { %2308 = vmatpush1.bf16.msra.mxu0 %v6934_v17  ;;  %2349 = vmatpush1.bf16.msra.mxu1 %v6935_v44  ;;  %v6945_v17 = vld [vmem:[#allocation65_spill] sm:$0xff]  ;;  %v6946_v44 = vld [vmem:[#allocation35_spill] sm:$0xff] }
 0x485   :  { %2309 = vmatprep.subr.bf16.mxu0 %v6936_v55  ;;  %2350 = vmatprep.subr.bf16.mxu1 %v6937_v50  ;;  %v6947_v55 = vld [vmem:[#allocation67_spill] sm:$0xff]  ;;  %v6948_v50 = vld [vmem:[#allocation37_spill] sm:$0xff] }
 0x488   :  { %2310 = vmatpush1.bf16.msra.mxu0 %v6938_v28  ;;  %2351 = vmatpush1.bf16.msra.mxu1 %v6939_v34  ;;  %v6949_v28 = vld [vmem:[#allocation69_spill] sm:$0xff]  ;;  %v6950_v34 = vld [vmem:[#allocation39_spill] sm:$0xff] }
 0x489   :  { %2311 = vmatprep.subr.bf16.mxu0 %v6940_v41  ;;  %2352 = vmatprep.subr.bf16.mxu1 %v6941_v21  ;;  %v6951_v41 = vld [vmem:[#allocation71_spill] sm:$0xff]  ;;  %v6952_v21 = vld [vmem:[#allocation41_spill] sm:$0xff] }
 0x48c   :  { %2312 = vmatpush1.bf16.msra.mxu0 %v6942_v9  ;;  %2353 = vmatpush1.bf16.msra.mxu1 %v6943_v40  ;;  %v6953_v9 = vld [vmem:[#allocation73_spill] sm:$0xff]  ;;  %v6954_v40 = vld [vmem:[#allocation43_spill] sm:$0xff] }
 0x48d   :  { %2313 = vmatprep.subr.bf16.mxu0 %v6944_v8  ;;  %2354 = vmatprep.subr.bf16.mxu1 %v6945_v17  ;;  %v6955_v8 = vld [vmem:[#allocation75_spill] sm:$0xff]  ;;  %v6956_v17 = vld [vmem:[#allocation45_spill] sm:$0xff] }
 0x490   :  { %2314 = vmatpush1.bf16.msra.mxu0 %v6946_v44  ;;  %2355 = vmatpush1.bf16.msra.mxu1 %v6947_v55  ;;  %v6957_v44 = vld [vmem:[#allocation77_spill] sm:$0xff]  ;;  %v6958_v55 = vld [vmem:[#allocation47_spill] sm:$0xff] }
 0x491   :  { %2315 = vmatprep.subr.bf16.mxu0 %v6948_v50  ;;  %2356 = vmatprep.subr.bf16.mxu1 %v6949_v28  ;;  %v6959_v50 = vld [vmem:[#allocation79_spill] sm:$0xff]  ;;  %v6960_v28 = vld [vmem:[#allocation49_spill] sm:$0xff] }
 0x494   :  { %2316 = vmatpush1.bf16.msra.mxu0 %v6950_v34  ;;  %2357 = vmatpush1.bf16.msra.mxu1 %v6951_v41  ;;  %v6961_v34 = vld [vmem:[#allocation81_spill] sm:$0xff]  ;;  %v6962_v41 = vld [vmem:[#allocation51_spill] sm:$0xff] }
 0x495   :  { %2317 = vmatprep.subr.bf16.mxu0 %v6952_v21  ;;  %2358 = vmatprep.subr.bf16.mxu1 %v6953_v9  ;;  %v6963_v21 = vld [vmem:[#allocation83_spill] sm:$0xff]  ;;  %v6964_v9 = vld [vmem:[#allocation54_spill] sm:$0xff] }
 0x498   :  { %2318 = vmatpush1.bf16.msra.mxu0 %v6954_v40  ;;  %2359 = vmatpush1.bf16.msra.mxu1 %v6955_v8  ;;  %v6965_v40 = vld [vmem:[#allocation86_spill] sm:$0xff] }
 0x499   :  { %2319 = vmatprep.subr.bf16.mxu0 %v6956_v17  ;;  %2360 = vmatprep.subr.bf16.mxu1 %v6957_v44 }
 0x49c   :  { %2320 = vmatpush1.bf16.msra.mxu0 %v6958_v55  ;;  %2361 = vmatpush1.bf16.msra.mxu1 %v6959_v50 }
 0x49d   :  { %2321 = vmatprep.subr.bf16.mxu0 %v6960_v28  ;;  %2362 = vmatprep.subr.bf16.mxu1 %v6961_v34 }
 0x4a0   :  { %2322 = vmatpush1.bf16.msra.mxu0 %v6962_v41  ;;  %2363 = vmatpush1.bf16.msra.mxu1 %v6963_v21 }
 0x4a1   :  { %2373 = vmatprep.subr.bf16.mxu0 %v6964_v9  ;;  %2414 = vmatprep.subr.bf16.mxu1 %v6965_v40 }
 0x4f6   :  { %v2095_v8 = vpop.f32.mrb[48].mxu0  ;;  %v2136_v17 = vpop.f32.mrb[64].mxu1 }
 0x4f7   :  { %v2225_v44 = vadd.f32 %v2095_v8, %v6966_v39  ;;  %v2227_v55 = vadd.f32 %v2136_v17, %v6967_v60  ;;  %v2097_v12 = vpop.f32.mrb[49].mxu0  ;;  %v2138_v50 = vpop.f32.mrb[65].mxu1 }
 0x4f8   :  { %v2226_v28 = vadd.f32 %v2097_v12, %v6968_v25  ;;  %v2228_v34 = vadd.f32 %v2138_v50, %v6969_v38  ;;  %v2099_v13 = vpop.f32.mrb[50].mxu0  ;;  %v2140_v41 = vpop.f32.mrb[66].mxu1 }
 0x4f9   :  { %v2100_v22 = vpop.f32.mrb[51].mxu0  ;;  %v2141_v21 = vpop.f32.mrb[67].mxu1  ;;  %v3580_v56 = vmul.f32 -1.442695, %v2225_v44  ;;  %v3582_v9 = vmul.f32 -1.442695, %v2227_v55 }
 0x4fa   :  { %v3581_v16 = vmul.f32 -1.442695, %v2226_v28  ;;  %v3583_v40 = vmul.f32 -1.442695, %v2228_v34  ;;  %v6970_v21 = vld [vmem:[#allocation154_spill] sm:$0xff]  ;;  %v6971_v55 = vld [vmem:[#allocation177_spill] sm:$0xff] }
 0x4fb   :  { %3771 = vpow2.f32 %v3580_v56  ;;  %v6973_v28 = vld [vmem:[#allocation178_spill] sm:$0xff] }
 0x4fc   :  { %3773 = vpow2.f32 %v3582_v9 }
 0x4fd   :  { %3775 = vpow2.f32 %v3581_v16 }
 0x4fe   :  { %3777 = vpow2.f32 %v3583_v40  ;;  %v6972_v40 = vld [vmem:[#allocation156_spill] sm:$0xff] }
 0x505   :  { %v3772_v39 = vpop.eup %3771 }
 0x506   :  { %v3774_v60 = vpop.eup %3773  ;;  %v2239_v3 = vadd.f32 1.0, %v3772_v39 }
 0x507   :  { %v3776_v8 = vpop.eup %3775  ;;  %v2251_v25 = vadd.f32 1.0, %v3774_v60 }
 0x508   :  { %v3778_v17 = vpop.eup %3777  ;;  %v2240_v12 = vadd.f32 1.0, %v3776_v8  ;;  %3779 = vrcp.f32 %v2239_v3 }
 0x509   :  { %v2252_v38 = vadd.f32 1.0, %v3778_v17  ;;  %3781 = vrcp.f32 %v2251_v25 }
 0x50a   :  { %3783 = vrcp.f32 %v2240_v12 }
 0x50b   :  { %3785 = vrcp.f32 %v2252_v38 }
 0x512   :  { %v3780_v25 = vpop.eup %3779 }
 0x513   :  { %v3782_v12 = vpop.eup %3781 }
 0x536   :  { %v2177_v22 = vpop.f32.mrb[52].mxu0  ;;  %v2218_v13 = vpop.f32.mrb[68].mxu1 }
 0x537   :  { %v2229_v44 = vadd.f32 %v2177_v22, %v6970_v21  ;;  %v2231_v56 = vadd.f32 %v2218_v13, %v6971_v55  ;;  %v2179_v9 = vpop.f32.mrb[53].mxu0  ;;  %v2220_v16 = vpop.f32.mrb[69].mxu1  ;;  %v2271_v55 = vmul.f32 %v3782_v12, %v5473_v49  ;;  %v6974_v12 = vld [vmem:[#allocation120_spill] sm:$0xff] }
 0x538   :  { %v2230_v50 = vadd.f32 %v2179_v9, %v6972_v40  ;;  %v2232_v34 = vadd.f32 %v2220_v16, %v6973_v28  ;;  %v2181_v41 = vpop.f32.mrb[54].mxu0  ;;  %v2222_v39 = vpop.f32.mrb[70].mxu1 }
 0x539   :  { %3787 = vtanh.f32 %v2229_v44  ;;  %v3584_v60 = vmul.f32 -1.442695, %v2231_v56  ;;  %v2182_v3 = vpop.f32.mrb[55].mxu0  ;;  %v2223_v8 = vpop.f32.mrb[71].mxu1 }
 0x53a   :  { %3789 = vtanh.f32 %v2230_v50  ;;  %v3585_v17 = vmul.f32 -1.442695, %v2232_v34  ;;  %v3784_v22 = vpop.eup %3783 }
 0x53b   :  { %3791 = vpow2.f32 %v3584_v60  ;;  %v3786_v13 = vpop.eup %3785 }
 0x53c   :  { %3793 = vpow2.f32 %v3585_v17  ;;  %v2272_v40 = vmul.f32 %v3786_v13, %v5475_v23  ;;  %v6976_v13 = vld [vmem:[#allocation121_spill] sm:$0xff] }
 0x543   :  { %v3788_v21 = vpop.eup %3787 }
 0x544   :  { %v3790_v38 = vpop.eup %3789  ;;  %v2273_v9 = vmul.f32 %v3788_v21, %v3780_v25  ;;  %v6977_v21 = vld [vmem:[#allocation99_spill] sm:$0xff] }
 0x545   :  { %v3792_v16 = vpop.eup %3791  ;;  %v2274_v44 = vmul.f32 %v3790_v38, %v3784_v22  ;;  %v6975_v22 = vld [vmem:[#allocation97_spill] sm:$0xff]  ;;  %v6978_v38 = vld [vmem:[#allocation122_spill] sm:$0xff] }
 0x546   :  { %v3794_v56 = vpop.eup %3793  ;;  %v5623_v28 = vadd.f32 %v2273_v9, %v2271_v55  ;;  %v2265_v50 = vadd.f32 1.0, %v3792_v16  ;;  %v6979_v55 = vld [vmem:[#allocation101_spill] sm:$0xff]  ;;  %v6980_v9 = vld [vmem:[#allocation123_spill] sm:$0xff] }
 0x547   :  { %v5625_v34 = vadd.f32 %v2274_v44, %v2272_v40  ;;  %v2266_v41 = vadd.f32 1.0, %v3794_v56  ;;  %v6981_v16 = vld [vmem:[#allocation103_spill] sm:$0xff]  ;;  %v6982_v40 = vld [vmem:[#allocation124_spill] sm:$0xff]  ;;  %v6983_v44 = vld [vmem:[#allocation105_spill] sm:$0xff] }
 0x548   :  { %3795 = vtanh.f32 %v5623_v28  ;;  %v6984_v56 = vld [vmem:[#allocation125_spill] sm:$0xff] }
 0x549   :  { %3797 = vrcp.f32 %v2265_v50  ;;  %v6985_v50 = vld [vmem:[#allocation107_spill] sm:$0xff] }
 0x54a   :  { %3799 = vtanh.f32 %v5625_v34 }
 0x54b   :  { %3801 = vrcp.f32 %v2266_v41  ;;  %v6986_v41 = vld [vmem:[#allocation126_spill] sm:$0xff] }
 0x552   :  { %v3796_v39 = vpop.eup %3795 }
 0x553   :  { %v3798_v49 = vpop.eup %3797 }
 0x554   :  { %v3800_v60 = vpop.eup %3799  ;;  %v2279_v8 = vmul.f32 %v3798_v49, %v3796_v39  ;;  %v6987_v39 = vld [vmem:[#allocation108_spill] sm:$0xff]  ;;  %v6988_v49 = vld [vmem:[#allocation127_spill] sm:$0xff] }
 0x555   :  { %v3802_v3 = vpop.eup %3801 }
 0x556   :  { %v2280_v23 = vmul.f32 %v3802_v3, %v3800_v60  ;;  %v5629_v25 = vpack.c.bf16 %v2279_v8, %v2279_v8  ;;  %v6989_v60 = vld [vmem:[#allocation109_spill] sm:$0xff]  ;;  %v6990_v3 = vld [vmem:[#allocation128_spill] sm:$0xff]  ;;  %v6991_v8 = vld [vmem:[#allocation111_spill] sm:$0xff] }
 0x558   :  { %v2290_v17 = vpack.c.bf16 %v2280_v23, %v2280_v23  ;;  %v6992_v23 = vld [vmem:[#allocation129_spill] sm:$0xff] }
 0x55a   :  { %2323 = vmatprep.mubr.bf16.mxu0 %v2290_v17  ;;  %2364 = vmatprep.mubr.bf16.mxu1 %v2290_v17 }
 0x55b   :  { %2324 = vmatmul.mubr.bf16.vlgmr.msra.gmra.mrb[56].mxu0 %v5629_v25  ;;  %2365 = vmatmul.mubr.bf16.vlgmr.msra.gmra.mrb[72].mxu1 %v5629_v25 }
 0x55c   :  { %2374 = vmatpush1.bf16.msra.mxu0 %v6681_v4  ;;  %2415 = vmatpush1.bf16.msra.mxu1 %v6682_v53 }
 0x55d   :  { %2405 = vmatprep.mubr.bf16.mxu0 %v2290_v17  ;;  %2446 = vmatprep.mubr.bf16.mxu1 %v2290_v17  ;;  %v6993_v17 = vld [vmem:[#allocation113_spill] sm:$0xff] }
 0x55e   :  { %2375 = vmatprep.subr.bf16.mxu0 %v6683_v45  ;;  %2416 = vmatprep.subr.bf16.mxu1 %v6684_v29 }
 0x560   :  { %2376 = vmatpush1.bf16.msra.mxu0 %v6685_v36  ;;  %2417 = vmatpush1.bf16.msra.mxu1 %v6686_v31 }
 0x561   :  { %2377 = vmatprep.subr.bf16.mxu0 %v6687_v57  ;;  %2418 = vmatprep.subr.bf16.mxu1 %v6688_v2 }
 0x564   :  { %2378 = vmatpush1.bf16.msra.mxu0 %v6689_v11  ;;  %2419 = vmatpush1.bf16.msra.mxu1 %v6690_v27 }
 0x565   :  { %2379 = vmatprep.subr.bf16.mxu0 %v6691_v24  ;;  %2420 = vmatprep.subr.bf16.mxu1 %v6692_v19 }
 0x568   :  { %2380 = vmatpush1.bf16.msra.mxu0 %v6693_v48  ;;  %2421 = vmatpush1.bf16.msra.mxu1 %v6694_v58 }
 0x569   :  { %2381 = vmatprep.subr.bf16.mxu0 %v6695_v1  ;;  %2422 = vmatprep.subr.bf16.mxu1 %v6696_v18 }
 0x56c   :  { %2382 = vmatpush1.bf16.msra.mxu0 %v6697_v0  ;;  %2423 = vmatpush1.bf16.msra.mxu1 %v6698_v5 }
 0x56d   :  { %2383 = vmatprep.subr.bf16.mxu0 %v6699_v63  ;;  %2424 = vmatprep.subr.bf16.mxu1 %v6700_v52 }
 0x570   :  { %2384 = vmatpush1.bf16.msra.mxu0 %v6701_v43  ;;  %2425 = vmatpush1.bf16.msra.mxu1 %v4728_v14 }
 0x571   :  { %2385 = vmatprep.subr.bf16.mxu0 %v6702_v6  ;;  %2426 = vmatprep.subr.bf16.mxu1 %v4734_v59 }
 0x574   :  { %2386 = vmatpush1.bf16.msra.mxu0 %v6703_v7  ;;  %2427 = vmatpush1.bf16.msra.mxu1 %v6784_v47 }
 0x575   :  { %2387 = vmatprep.subr.bf16.mxu0 %v6704_v37  ;;  %2428 = vmatprep.subr.bf16.mxu1 %v6785_v61 }
 0x578   :  { %2388 = vmatpush1.bf16.msra.mxu0 %v6705_v54  ;;  %2429 = vmatpush1.bf16.msra.mxu1 %v6786_v62 }
 0x579   :  { %2389 = vmatprep.subr.bf16.mxu0 %v6706_v35  ;;  %2430 = vmatprep.subr.bf16.mxu1 %v6787_v20 }
 0x57c   :  { %2390 = vmatpush1.bf16.msra.mxu0 %v6707_v15  ;;  %2431 = vmatpush1.bf16.msra.mxu1 %v6788_v51 }
 0x57d   :  { %2391 = vmatprep.subr.bf16.mxu0 %v6708_v10  ;;  %2432 = vmatprep.subr.bf16.mxu1 %v6789_v42 }
 0x580   :  { %2392 = vmatpush1.bf16.msra.mxu0 %v6709_v46  ;;  %2433 = vmatpush1.bf16.msra.mxu1 %v6790_v30 }
 0x581   :  { %2393 = vmatprep.subr.bf16.mxu0 %v6710_v26  ;;  %2434 = vmatprep.subr.bf16.mxu1 %v6791_v32 }
 0x584   :  { %2394 = vmatpush1.bf16.msra.mxu0 %v6711_v33  ;;  %2435 = vmatpush1.bf16.msra.mxu1 %v6974_v12 }
 0x585   :  { %2395 = vmatprep.subr.bf16.mxu0 %v6975_v22  ;;  %2436 = vmatprep.subr.bf16.mxu1 %v6976_v13 }
 0x588   :  { %2396 = vmatpush1.bf16.msra.mxu0 %v6977_v21  ;;  %2437 = vmatpush1.bf16.msra.mxu1 %v6978_v38 }
 0x589   :  { %2397 = vmatprep.subr.bf16.mxu0 %v6979_v55  ;;  %2438 = vmatprep.subr.bf16.mxu1 %v6980_v9  ;;  %v7063_v9 = vld [vmem:[#allocation132_spill] sm:$0xff]  ;;  %v7064_v55 = vld [vmem:[#allocation159_spill] sm:$0xff] }
 0x58c   :  { %2398 = vmatpush1.bf16.msra.mxu0 %v6981_v16  ;;  %2439 = vmatpush1.bf16.msra.mxu1 %v6982_v40  ;;  %v7062_v40 = vld [vmem:[#allocation157_spill] sm:$0xff] }
 0x58d   :  { %2399 = vmatprep.subr.bf16.mxu0 %v6983_v44  ;;  %2440 = vmatprep.subr.bf16.mxu1 %v6984_v56  ;;  %v6994_v44 = vld [vmem:[#allocation130_spill] sm:$0xff]  ;;  %v6995_v56 = vld [vmem:[#allocation5_spill] sm:$0xff] }
 0x590   :  { %2400 = vmatpush1.bf16.msra.mxu0 %v6985_v50  ;;  %2441 = vmatpush1.bf16.msra.mxu1 %v6986_v41  ;;  %v6996_v50 = vld [vmem:[#allocation10_spill] sm:$0xff]  ;;  %v7061_v41 = vld [vmem:[#allocation131_spill] sm:$0xff] }
 0x591   :  { %2401 = vmatprep.subr.bf16.mxu0 %v6987_v39  ;;  %2442 = vmatprep.subr.bf16.mxu1 %v6988_v49  ;;  %v6997_v49 = vld [vmem:[#allocation6_spill] sm:$0xff]  ;;  %v7006_v39 = vld [vmem:[#allocation32_spill] sm:$0xff] }
 0x594   :  { %2402 = vmatpush1.bf16.msra.mxu0 %v6989_v60  ;;  %2443 = vmatpush1.bf16.msra.mxu1 %v6990_v3  ;;  %v6998_v60 = vld [vmem:[#allocation24_spill] sm:$0xff]  ;;  %v6999_v3 = vld [vmem:[#allocation7_spill] sm:$0xff] }
 0x595   :  { %2403 = vmatprep.subr.bf16.mxu0 %v6991_v8  ;;  %2444 = vmatprep.subr.bf16.mxu1 %v6992_v23  ;;  %v7000_v8 = vld [vmem:[#allocation26_spill] sm:$0xff]  ;;  %v7001_v23 = vld [vmem:[#allocation8_spill] sm:$0xff] }
 0x598   :  { %2404 = vmatpush1.bf16.msra.mxu0 %v6993_v17  ;;  %2445 = vmatpush1.bf16.msra.mxu1 %v6994_v44  ;;  %v7002_v17 = vld [vmem:[#allocation28_spill] sm:$0xff]  ;;  %v7003_v44 = vld [vmem:[#allocation9_spill] sm:$0xff] }
 0x599   :  { %2521 = vmatprep.subr.bf16.mxu0 %v6995_v56  ;;  %2562 = vmatprep.subr.bf16.mxu1 %v6996_v50  ;;  %v7004_v56 = vld [vmem:[#allocation30_spill] sm:$0xff]  ;;  %v7005_v50 = vld [vmem:[#allocation11_spill] sm:$0xff] }
 0x59b   :  { %2406 = vmatmul.mubr.bf16.vlgmr.msra.gmra.mrb[60].mxu0 %v5629_v25  ;;  %2447 = vmatmul.mubr.bf16.vlgmr.msra.gmra.mrb[76].mxu1 %v5629_v25  ;;  %v7007_v25 = vld [vmem:[#allocation12_spill] sm:$0xff] }
 0x59c   :  { %2522 = vmatpush1.bf16.msra.mxu0 %v6997_v49  ;;  %2563 = vmatpush1.bf16.msra.mxu1 %v6998_v60  ;;  %v7008_v49 = vld [vmem:[#allocation34_spill] sm:$0xff]  ;;  %v7009_v60 = vld [vmem:[#allocation13_spill] sm:$0xff] }
 0x59d   :  { %2523 = vmatprep.subr.bf16.mxu0 %v6999_v3  ;;  %2564 = vmatprep.subr.bf16.mxu1 %v7000_v8  ;;  %v7010_v3 = vld [vmem:[#allocation36_spill] sm:$0xff]  ;;  %v7011_v8 = vld [vmem:[#allocation14_spill] sm:$0xff] }
 0x5a0   :  { %2524 = vmatpush1.bf16.msra.mxu0 %v7001_v23  ;;  %2565 = vmatpush1.bf16.msra.mxu1 %v7002_v17  ;;  %v7012_v23 = vld [vmem:[#allocation38_spill] sm:$0xff]  ;;  %v7013_v17 = vld [vmem:[#allocation15_spill] sm:$0xff] }
 0x5a1   :  { %2525 = vmatprep.subr.bf16.mxu0 %v7003_v44  ;;  %2566 = vmatprep.subr.bf16.mxu1 %v7004_v56  ;;  %v7014_v44 = vld [vmem:[#allocation40_spill] sm:$0xff] }
 0x5a2   :  { %v7015_v56 = vld [vmem:[#allocation16_spill] sm:$0xff] }
 0x5a4   :  { %2526 = vmatpush1.bf16.msra.mxu0 %v7005_v50  ;;  %2567 = vmatpush1.bf16.msra.mxu1 %v7006_v39  ;;  %v7016_v50 = vld [vmem:[#allocation42_spill] sm:$0xff]  ;;  %v7017_v39 = vld [vmem:[#allocation17_spill] sm:$0xff] }
 0x5a5   :  { %2527 = vmatprep.subr.bf16.mxu0 %v7007_v25  ;;  %2568 = vmatprep.subr.bf16.mxu1 %v7008_v49  ;;  %v7018_v25 = vld [vmem:[#allocation44_spill] sm:$0xff]  ;;  %v7019_v49 = vld [vmem:[#allocation18_spill] sm:$0xff] }
 0x5a8   :  { %2528 = vmatpush1.bf16.msra.mxu0 %v7009_v60  ;;  %2569 = vmatpush1.bf16.msra.mxu1 %v7010_v3  ;;  %v7020_v60 = vld [vmem:[#allocation46_spill] sm:$0xff]  ;;  %v7021_v3 = vld [vmem:[#allocation19_spill] sm:$0xff] }
 0x5a9   :  { %2529 = vmatprep.subr.bf16.mxu0 %v7011_v8  ;;  %2570 = vmatprep.subr.bf16.mxu1 %v7012_v23  ;;  %v7022_v8 = vld [vmem:[#allocation48_spill] sm:$0xff] }
 0x5aa   :  { %v7023_v23 = vld [vmem:[#allocation20_spill] sm:$0xff] }
 0x5ac   :  { %2530 = vmatpush1.bf16.msra.mxu0 %v7013_v17  ;;  %2571 = vmatpush1.bf16.msra.mxu1 %v7014_v44  ;;  %v7024_v17 = vld [vmem:[#allocation50_spill] sm:$0xff]  ;;  %v7025_v44 = vld [vmem:[#allocation21_spill] sm:$0xff] }
 0x5ad   :  { %2531 = vmatprep.subr.bf16.mxu0 %v7015_v56  ;;  %2572 = vmatprep.subr.bf16.mxu1 %v7016_v50  ;;  %v7026_v56 = vld [vmem:[#allocation52_spill] sm:$0xff]  ;;  %v7027_v50 = vld [vmem:[#allocation22_spill] sm:$0xff] }
 0x5b0   :  { %2532 = vmatpush1.bf16.msra.mxu0 %v7017_v39  ;;  %2573 = vmatpush1.bf16.msra.mxu1 %v7018_v25  ;;  %v7028_v39 = vld [vmem:[#allocation53_spill] sm:$0xff]  ;;  %v7029_v25 = vld [vmem:[#allocation23_spill] sm:$0xff] }
 0x5b1   :  { %2533 = vmatprep.subr.bf16.mxu0 %v7019_v49  ;;  %2574 = vmatprep.subr.bf16.mxu1 %v7020_v60  ;;  %v7030_v49 = vld [vmem:[#allocation55_spill] sm:$0xff]  ;;  %v7031_v60 = vld [vmem:[#allocation25_spill] sm:$0xff] }
 0x5b4   :  { %2534 = vmatpush1.bf16.msra.mxu0 %v7021_v3  ;;  %2575 = vmatpush1.bf16.msra.mxu1 %v7022_v8  ;;  %v7032_v3 = vld [vmem:[#allocation57_spill] sm:$0xff]  ;;  %v7033_v8 = vld [vmem:[#allocation27_spill] sm:$0xff] }
 0x5b5   :  { %2535 = vmatprep.subr.bf16.mxu0 %v7023_v23  ;;  %2576 = vmatprep.subr.bf16.mxu1 %v7024_v17  ;;  %v7034_v23 = vld [vmem:[#allocation59_spill] sm:$0xff]  ;;  %v7035_v17 = vld [vmem:[#allocation29_spill] sm:$0xff] }
 0x5b8   :  { %2536 = vmatpush1.bf16.msra.mxu0 %v7025_v44  ;;  %2577 = vmatpush1.bf16.msra.mxu1 %v7026_v56  ;;  %v7036_v44 = vld [vmem:[#allocation61_spill] sm:$0xff]  ;;  %v7037_v56 = vld [vmem:[#allocation31_spill] sm:$0xff] }
 0x5b9   :  { %2537 = vmatprep.subr.bf16.mxu0 %v7027_v50  ;;  %2578 = vmatprep.subr.bf16.mxu1 %v7028_v39  ;;  %v7038_v50 = vld [vmem:[#allocation63_spill] sm:$0xff]  ;;  %v7039_v39 = vld [vmem:[#allocation33_spill] sm:$0xff] }
 0x5bc   :  { %2538 = vmatpush1.bf16.msra.mxu0 %v7029_v25  ;;  %2579 = vmatpush1.bf16.msra.mxu1 %v7030_v49  ;;  %v7040_v25 = vld [vmem:[#allocation65_spill] sm:$0xff]  ;;  %v7041_v49 = vld [vmem:[#allocation35_spill] sm:$0xff] }
 0x5bd   :  { %2539 = vmatprep.subr.bf16.mxu0 %v7031_v60  ;;  %2580 = vmatprep.subr.bf16.mxu1 %v7032_v3  ;;  %v7042_v60 = vld [vmem:[#allocation67_spill] sm:$0xff]  ;;  %v7043_v3 = vld [vmem:[#allocation37_spill] sm:$0xff] }
 0x5c0   :  { %2540 = vmatpush1.bf16.msra.mxu0 %v7033_v8  ;;  %2581 = vmatpush1.bf16.msra.mxu1 %v7034_v23  ;;  %v7044_v8 = vld [vmem:[#allocation69_spill] sm:$0xff]  ;;  %v7045_v23 = vld [vmem:[#allocation39_spill] sm:$0xff] }
 0x5c1   :  { %2541 = vmatprep.subr.bf16.mxu0 %v7035_v17  ;;  %2582 = vmatprep.subr.bf16.mxu1 %v7036_v44  ;;  %v7046_v17 = vld [vmem:[#allocation71_spill] sm:$0xff]  ;;  %v7047_v44 = vld [vmem:[#allocation41_spill] sm:$0xff] }
 0x5c4   :  { %2542 = vmatpush1.bf16.msra.mxu0 %v7037_v56  ;;  %2583 = vmatpush1.bf16.msra.mxu1 %v7038_v50  ;;  %v7048_v56 = vld [vmem:[#allocation73_spill] sm:$0xff]  ;;  %v7049_v50 = vld [vmem:[#allocation43_spill] sm:$0xff] }
 0x5c5   :  { %2543 = vmatprep.subr.bf16.mxu0 %v7039_v39  ;;  %2584 = vmatprep.subr.bf16.mxu1 %v7040_v25  ;;  %v7050_v39 = vld [vmem:[#allocation75_spill] sm:$0xff]  ;;  %v7051_v25 = vld [vmem:[#allocation45_spill] sm:$0xff] }
 0x5c8   :  { %2544 = vmatpush1.bf16.msra.mxu0 %v7041_v49  ;;  %2585 = vmatpush1.bf16.msra.mxu1 %v7042_v60  ;;  %v7052_v49 = vld [vmem:[#allocation77_spill] sm:$0xff]  ;;  %v7053_v60 = vld [vmem:[#allocation47_spill] sm:$0xff] }
 0x5c9   :  { %2545 = vmatprep.subr.bf16.mxu0 %v7043_v3  ;;  %2586 = vmatprep.subr.bf16.mxu1 %v7044_v8  ;;  %v7054_v3 = vld [vmem:[#allocation79_spill] sm:$0xff]  ;;  %v7055_v8 = vld [vmem:[#allocation49_spill] sm:$0xff] }
 0x5cc   :  { %2546 = vmatpush1.bf16.msra.mxu0 %v7045_v23  ;;  %2587 = vmatpush1.bf16.msra.mxu1 %v7046_v17  ;;  %v7056_v23 = vld [vmem:[#allocation81_spill] sm:$0xff]  ;;  %v7057_v17 = vld [vmem:[#allocation51_spill] sm:$0xff] }
 0x5cd   :  { %2547 = vmatprep.subr.bf16.mxu0 %v7047_v44  ;;  %2588 = vmatprep.subr.bf16.mxu1 %v7048_v56  ;;  %v7058_v44 = vld [vmem:[#allocation83_spill] sm:$0xff]  ;;  %v7059_v56 = vld [vmem:[#allocation54_spill] sm:$0xff] }
 0x5d0   :  { %2548 = vmatpush1.bf16.msra.mxu0 %v7049_v50  ;;  %2589 = vmatpush1.bf16.msra.mxu1 %v7050_v39  ;;  %v7060_v50 = vld [vmem:[#allocation86_spill] sm:$0xff] }
 0x5d1   :  { %2549 = vmatprep.subr.bf16.mxu0 %v7051_v25  ;;  %2590 = vmatprep.subr.bf16.mxu1 %v7052_v49 }
 0x5d4   :  { %2550 = vmatpush1.bf16.msra.mxu0 %v7053_v60  ;;  %2591 = vmatpush1.bf16.msra.mxu1 %v7054_v3 }
 0x5d5   :  { %2551 = vmatprep.subr.bf16.mxu0 %v7055_v8  ;;  %2592 = vmatprep.subr.bf16.mxu1 %v7056_v23 }
 0x5d8   :  { %2552 = vmatpush1.bf16.msra.mxu0 %v7057_v17  ;;  %2593 = vmatpush1.bf16.msra.mxu1 %v7058_v44 }
 0x5d9   :  { %2603 = vmatprep.subr.bf16.mxu0 %v7059_v56  ;;  %2644 = vmatprep.subr.bf16.mxu1 %v7060_v50 }
 0x62e   :  { %v2325_v39 = vpop.f32.mrb[56].mxu0  ;;  %v2366_v25 = vpop.f32.mrb[72].mxu1 }
 0x62f   :  { %v2455_v49 = vadd.f32 %v2325_v39, %v7061_v41  ;;  %v2457_v60 = vadd.f32 %v2366_v25, %v7062_v40  ;;  %v2327_v16 = vpop.f32.mrb[57].mxu0  ;;  %v2368_v3 = vpop.f32.mrb[73].mxu1 }
 0x630   :  { %v2456_v8 = vadd.f32 %v2327_v16, %v7063_v9  ;;  %v2458_v23 = vadd.f32 %v2368_v3, %v7064_v55  ;;  %v2329_v38 = vpop.f32.mrb[58].mxu0  ;;  %v2370_v17 = vpop.f32.mrb[74].mxu1 }
 0x631   :  { %v2330_v21 = vpop.f32.mrb[59].mxu0  ;;  %v2371_v44 = vpop.f32.mrb[75].mxu1  ;;  %v3586_v13 = vmul.f32 -1.442695, %v2455_v49  ;;  %v3588_v56 = vmul.f32 -1.442695, %v2457_v60 }
 0x632   :  { %v3587_v22 = vmul.f32 -1.442695, %v2456_v8  ;;  %v3589_v50 = vmul.f32 -1.442695, %v2458_v23  ;;  %v7065_v44 = vld [vmem:[#allocation158_spill] sm:$0xff]  ;;  %v7066_v60 = vld [vmem:[#allocation179_spill] sm:$0xff] }
 0x633   :  { %3803 = vpow2.f32 %v3586_v13  ;;  %v7068_v8 = vld [vmem:[#allocation180_spill] sm:$0xff] }
 0x634   :  { %3805 = vpow2.f32 %v3588_v56 }
 0x635   :  { %3807 = vpow2.f32 %v3587_v22 }
 0x636   :  { %3809 = vpow2.f32 %v3589_v50  ;;  %v7067_v50 = vld [vmem:[#allocation160_spill] sm:$0xff] }
 0x63d   :  { %v3804_v41 = vpop.eup %3803 }
 0x63e   :  { %v3806_v40 = vpop.eup %3805  ;;  %v2469_v12 = vadd.f32 1.0, %v3804_v41 }
 0x63f   :  { %v3808_v39 = vpop.eup %3807  ;;  %v2481_v9 = vadd.f32 1.0, %v3806_v40 }
 0x640   :  { %v3810_v25 = vpop.eup %3809  ;;  %v2470_v16 = vadd.f32 1.0, %v3808_v39  ;;  %3811 = vrcp.f32 %v2469_v12 }
 0x641   :  { %v2482_v55 = vadd.f32 1.0, %v3810_v25  ;;  %3813 = vrcp.f32 %v2481_v9 }
 0x642   :  { %3815 = vrcp.f32 %v2470_v16 }
 0x643   :  { %3817 = vrcp.f32 %v2482_v55 }
 0x64a   :  { %v3812_v9 = vpop.eup %3811 }
 0x64b   :  { %v3814_v16 = vpop.eup %3813 }
 0x66e   :  { %v2407_v21 = vpop.f32.mrb[60].mxu0  ;;  %v2448_v38 = vpop.f32.mrb[76].mxu1 }
 0x66f   :  { %v2459_v49 = vadd.f32 %v2407_v21, %v7065_v44  ;;  %v2461_v13 = vadd.f32 %v2448_v38, %v7066_v60  ;;  %v2409_v56 = vpop.f32.mrb[61].mxu0  ;;  %v2450_v22 = vpop.f32.mrb[77].mxu1  ;;  %v2501_v60 = vmul.f32 %v3814_v16, %v5623_v28  ;;  %v7069_v16 = vld [vmem:[#allocation120_spill] sm:$0xff] }
 0x670   :  { %v2460_v3 = vadd.f32 %v2409_v56, %v7067_v50  ;;  %v2462_v23 = vadd.f32 %v2450_v22, %v7068_v8  ;;  %v2411_v17 = vpop.f32.mrb[62].mxu0  ;;  %v2452_v41 = vpop.f32.mrb[78].mxu1 }
 0x671   :  { %3819 = vtanh.f32 %v2459_v49  ;;  %v3590_v40 = vmul.f32 -1.442695, %v2461_v13  ;;  %v2412_v12 = vpop.f32.mrb[63].mxu0  ;;  %v2453_v39 = vpop.f32.mrb[79].mxu1 }
 0x672   :  { %3821 = vtanh.f32 %v2460_v3  ;;  %v3591_v25 = vmul.f32 -1.442695, %v2462_v23  ;;  %v3816_v21 = vpop.eup %3815 }
 0x673   :  { %3823 = vpow2.f32 %v3590_v40  ;;  %v3818_v38 = vpop.eup %3817 }
 0x674   :  { %3825 = vpow2.f32 %v3591_v25  ;;  %v2502_v50 = vmul.f32 %v3818_v38, %v5625_v34  ;;  %v7071_v38 = vld [vmem:[#allocation121_spill] sm:$0xff] }
 0x67b   :  { %v3820_v44 = vpop.eup %3819 }
 0x67c   :  { %v3822_v55 = vpop.eup %3821  ;;  %v2503_v56 = vmul.f32 %v3820_v44, %v3812_v9  ;;  %v7072_v44 = vld [vmem:[#allocation99_spill] sm:$0xff] }
 0x67d   :  { %v3824_v22 = vpop.eup %3823  ;;  %v2504_v49 = vmul.f32 %v3822_v55, %v3816_v21  ;;  %v7070_v21 = vld [vmem:[#allocation97_spill] sm:$0xff]  ;;  %v7073_v55 = vld [vmem:[#allocation122_spill] sm:$0xff] }
 0x67e   :  { %v3826_v13 = vpop.eup %3825  ;;  %v5773_v8 = vadd.f32 %v2503_v56, %v2501_v60  ;;  %v2495_v3 = vadd.f32 1.0, %v3824_v22  ;;  %v7074_v60 = vld [vmem:[#allocation101_spill] sm:$0xff]  ;;  %v7075_v56 = vld [vmem:[#allocation123_spill] sm:$0xff] }
 0x67f   :  { %v5775_v23 = vadd.f32 %v2504_v49, %v2502_v50  ;;  %v2496_v17 = vadd.f32 1.0, %v3826_v13  ;;  %v7076_v22 = vld [vmem:[#allocation103_spill] sm:$0xff]  ;;  %v7077_v50 = vld [vmem:[#allocation124_spill] sm:$0xff]  ;;  %v7078_v49 = vld [vmem:[#allocation105_spill] sm:$0xff] }
 0x680   :  { %3827 = vtanh.f32 %v5773_v8  ;;  %v7079_v13 = vld [vmem:[#allocation125_spill] sm:$0xff] }
 0x681   :  { %3829 = vrcp.f32 %v2495_v3  ;;  %v7080_v3 = vld [vmem:[#allocation107_spill] sm:$0xff] }
 0x682   :  { %3831 = vtanh.f32 %v5775_v23 }
 0x683   :  { %3833 = vrcp.f32 %v2496_v17  ;;  %v7081_v17 = vld [vmem:[#allocation126_spill] sm:$0xff] }
 0x68a   :  { %v3828_v41 = vpop.eup %3827 }
 0x68b   :  { %v3830_v28 = vpop.eup %3829 }
 0x68c   :  { %v3832_v40 = vpop.eup %3831  ;;  %v2509_v39 = vmul.f32 %v3830_v28, %v3828_v41  ;;  %v7082_v41 = vld [vmem:[#allocation108_spill] sm:$0xff]  ;;  %v7083_v28 = vld [vmem:[#allocation127_spill] sm:$0xff] }
 0x68d   :  { %v3834_v12 = vpop.eup %3833 }
 0x68e   :  { %v2510_v34 = vmul.f32 %v3834_v12, %v3832_v40  ;;  %v5779_v9 = vpack.c.bf16 %v2509_v39, %v2509_v39  ;;  %v7084_v40 = vld [vmem:[#allocation109_spill] sm:$0xff]  ;;  %v7085_v12 = vld [vmem:[#allocation128_spill] sm:$0xff]  ;;  %v7086_v39 = vld [vmem:[#allocation111_spill] sm:$0xff] }
 0x690   :  { %v2520_v25 = vpack.c.bf16 %v2510_v34, %v2510_v34  ;;  %v7087_v34 = vld [vmem:[#allocation129_spill] sm:$0xff] }
 0x692   :  { %2553 = vmatprep.mubr.bf16.mxu0 %v2520_v25  ;;  %2594 = vmatprep.mubr.bf16.mxu1 %v2520_v25 }
 0x693   :  { %2554 = vmatmul.mubr.bf16.vlgmr.msra.gmra.mrb[64].mxu0 %v5779_v9  ;;  %2595 = vmatmul.mubr.bf16.vlgmr.msra.gmra.mrb[80].mxu1 %v5779_v9 }
 0x694   :  { %2604 = vmatpush1.bf16.msra.mxu0 %v6681_v4  ;;  %2645 = vmatpush1.bf16.msra.mxu1 %v6682_v53 }
 0x695   :  { %2635 = vmatprep.mubr.bf16.mxu0 %v2520_v25  ;;  %2676 = vmatprep.mubr.bf16.mxu1 %v2520_v25  ;;  %v7088_v25 = vld [vmem:[#allocation113_spill] sm:$0xff] }
 0x696   :  { %2605 = vmatprep.subr.bf16.mxu0 %v6683_v45  ;;  %2646 = vmatprep.subr.bf16.mxu1 %v6684_v29 }
 0x698   :  { %2606 = vmatpush1.bf16.msra.mxu0 %v6685_v36  ;;  %2647 = vmatpush1.bf16.msra.mxu1 %v6686_v31 }
 0x699   :  { %2607 = vmatprep.subr.bf16.mxu0 %v6687_v57  ;;  %2648 = vmatprep.subr.bf16.mxu1 %v6688_v2 }
 0x69c   :  { %2608 = vmatpush1.bf16.msra.mxu0 %v6689_v11  ;;  %2649 = vmatpush1.bf16.msra.mxu1 %v6690_v27 }
 0x69d   :  { %2609 = vmatprep.subr.bf16.mxu0 %v6691_v24  ;;  %2650 = vmatprep.subr.bf16.mxu1 %v6692_v19 }
 0x6a0   :  { %2610 = vmatpush1.bf16.msra.mxu0 %v6693_v48  ;;  %2651 = vmatpush1.bf16.msra.mxu1 %v6694_v58 }
 0x6a1   :  { %2611 = vmatprep.subr.bf16.mxu0 %v6695_v1  ;;  %2652 = vmatprep.subr.bf16.mxu1 %v6696_v18 }
 0x6a4   :  { %2612 = vmatpush1.bf16.msra.mxu0 %v6697_v0  ;;  %2653 = vmatpush1.bf16.msra.mxu1 %v6698_v5 }
 0x6a5   :  { %2613 = vmatprep.subr.bf16.mxu0 %v6699_v63  ;;  %2654 = vmatprep.subr.bf16.mxu1 %v6700_v52 }
 0x6a8   :  { %2614 = vmatpush1.bf16.msra.mxu0 %v6701_v43  ;;  %2655 = vmatpush1.bf16.msra.mxu1 %v4728_v14 }
 0x6a9   :  { %2615 = vmatprep.subr.bf16.mxu0 %v6702_v6  ;;  %2656 = vmatprep.subr.bf16.mxu1 %v4734_v59 }
 0x6ac   :  { %2616 = vmatpush1.bf16.msra.mxu0 %v6703_v7  ;;  %2657 = vmatpush1.bf16.msra.mxu1 %v6784_v47 }
 0x6ad   :  { %2617 = vmatprep.subr.bf16.mxu0 %v6704_v37  ;;  %2658 = vmatprep.subr.bf16.mxu1 %v6785_v61 }
 0x6b0   :  { %2618 = vmatpush1.bf16.msra.mxu0 %v6705_v54  ;;  %2659 = vmatpush1.bf16.msra.mxu1 %v6786_v62 }
 0x6b1   :  { %2619 = vmatprep.subr.bf16.mxu0 %v6706_v35  ;;  %2660 = vmatprep.subr.bf16.mxu1 %v6787_v20 }
 0x6b4   :  { %2620 = vmatpush1.bf16.msra.mxu0 %v6707_v15  ;;  %2661 = vmatpush1.bf16.msra.mxu1 %v6788_v51 }
 0x6b5   :  { %2621 = vmatprep.subr.bf16.mxu0 %v6708_v10  ;;  %2662 = vmatprep.subr.bf16.mxu1 %v6789_v42 }
 0x6b8   :  { %2622 = vmatpush1.bf16.msra.mxu0 %v6709_v46  ;;  %2663 = vmatpush1.bf16.msra.mxu1 %v6790_v30 }
 0x6b9   :  { %2623 = vmatprep.subr.bf16.mxu0 %v6710_v26  ;;  %2664 = vmatprep.subr.bf16.mxu1 %v6791_v32 }
 0x6bc   :  { %2624 = vmatpush1.bf16.msra.mxu0 %v6711_v33  ;;  %2665 = vmatpush1.bf16.msra.mxu1 %v7069_v16 }
 0x6bd   :  { %2625 = vmatprep.subr.bf16.mxu0 %v7070_v21  ;;  %2666 = vmatprep.subr.bf16.mxu1 %v7071_v38 }
 0x6c0   :  { %2626 = vmatpush1.bf16.msra.mxu0 %v7072_v44  ;;  %2667 = vmatpush1.bf16.msra.mxu1 %v7073_v55 }
 0x6c1   :  { %2627 = vmatprep.subr.bf16.mxu0 %v7074_v60  ;;  %2668 = vmatprep.subr.bf16.mxu1 %v7075_v56  ;;  %v7158_v56 = vld [vmem:[#allocation135_spill] sm:$0xff] }
 0x6c2   :  { %v7159_v60 = vld [vmem:[#allocation163_spill] sm:$0xff] }
 0x6c4   :  { %2628 = vmatpush1.bf16.msra.mxu0 %v7076_v22  ;;  %2669 = vmatpush1.bf16.msra.mxu1 %v7077_v50  ;;  %v7157_v50 = vld [vmem:[#allocation161_spill] sm:$0xff] }
 0x6c5   :  { %2629 = vmatprep.subr.bf16.mxu0 %v7078_v49  ;;  %2670 = vmatprep.subr.bf16.mxu1 %v7079_v13  ;;  %v7089_v49 = vld [vmem:[#allocation130_spill] sm:$0xff]  ;;  %v7090_v13 = vld [vmem:[#allocation5_spill] sm:$0xff] }
 0x6c8   :  { %2630 = vmatpush1.bf16.msra.mxu0 %v7080_v3  ;;  %2671 = vmatpush1.bf16.msra.mxu1 %v7081_v17  ;;  %v7091_v3 = vld [vmem:[#allocation10_spill] sm:$0xff]  ;;  %v7156_v17 = vld [vmem:[#allocation133_spill] sm:$0xff] }
 0x6c9   :  { %2631 = vmatprep.subr.bf16.mxu0 %v7082_v41  ;;  %2672 = vmatprep.subr.bf16.mxu1 %v7083_v28  ;;  %v7092_v28 = vld [vmem:[#allocation6_spill] sm:$0xff]  ;;  %v7101_v41 = vld [vmem:[#allocation32_spill] sm:$0xff] }
 0x6cc   :  { %2632 = vmatpush1.bf16.msra.mxu0 %v7084_v40  ;;  %2673 = vmatpush1.bf16.msra.mxu1 %v7085_v12  ;;  %v7093_v40 = vld [vmem:[#allocation24_spill] sm:$0xff]  ;;  %v7094_v12 = vld [vmem:[#allocation7_spill] sm:$0xff] }
 0x6cd   :  { %2633 = vmatprep.subr.bf16.mxu0 %v7086_v39  ;;  %2674 = vmatprep.subr.bf16.mxu1 %v7087_v34  ;;  %v7095_v39 = vld [vmem:[#allocation26_spill] sm:$0xff]  ;;  %v7096_v34 = vld [vmem:[#allocation8_spill] sm:$0xff] }
 0x6d0   :  { %2634 = vmatpush1.bf16.msra.mxu0 %v7088_v25  ;;  %2675 = vmatpush1.bf16.msra.mxu1 %v7089_v49  ;;  %v7097_v25 = vld [vmem:[#allocation28_spill] sm:$0xff]  ;;  %v7098_v49 = vld [vmem:[#allocation9_spill] sm:$0xff] }
 0x6d1   :  { %2751 = vmatprep.subr.bf16.mxu0 %v7090_v13  ;;  %2792 = vmatprep.subr.bf16.mxu1 %v7091_v3  ;;  %v7099_v13 = vld [vmem:[#allocation30_spill] sm:$0xff]  ;;  %v7100_v3 = vld [vmem:[#allocation11_spill] sm:$0xff] }
 0x6d3   :  { %2636 = vmatmul.mubr.bf16.vlgmr.msra.gmra.mrb[68].mxu0 %v5779_v9  ;;  %2677 = vmatmul.mubr.bf16.vlgmr.msra.gmra.mrb[84].mxu1 %v5779_v9  ;;  %v7102_v9 = vld [vmem:[#allocation12_spill] sm:$0xff] }
 0x6d4   :  { %2752 = vmatpush1.bf16.msra.mxu0 %v7092_v28  ;;  %2793 = vmatpush1.bf16.msra.mxu1 %v7093_v40  ;;  %v7103_v28 = vld [vmem:[#allocation34_spill] sm:$0xff]  ;;  %v7104_v40 = vld [vmem:[#allocation13_spill] sm:$0xff] }
 0x6d5   :  { %2753 = vmatprep.subr.bf16.mxu0 %v7094_v12  ;;  %2794 = vmatprep.subr.bf16.mxu1 %v7095_v39  ;;  %v7105_v12 = vld [vmem:[#allocation36_spill] sm:$0xff]  ;;  %v7106_v39 = vld [vmem:[#allocation14_spill] sm:$0xff] }
 0x6d8   :  { %2754 = vmatpush1.bf16.msra.mxu0 %v7096_v34  ;;  %2795 = vmatpush1.bf16.msra.mxu1 %v7097_v25  ;;  %v7107_v34 = vld [vmem:[#allocation38_spill] sm:$0xff]  ;;  %v7108_v25 = vld [vmem:[#allocation15_spill] sm:$0xff] }
 0x6d9   :  { %2755 = vmatprep.subr.bf16.mxu0 %v7098_v49  ;;  %2796 = vmatprep.subr.bf16.mxu1 %v7099_v13  ;;  %v7109_v49 = vld [vmem:[#allocation40_spill] sm:$0xff] }
 0x6da   :  { %v7110_v13 = vld [vmem:[#allocation16_spill] sm:$0xff] }
 0x6dc   :  { %2756 = vmatpush1.bf16.msra.mxu0 %v7100_v3  ;;  %2797 = vmatpush1.bf16.msra.mxu1 %v7101_v41  ;;  %v7111_v3 = vld [vmem:[#allocation42_spill] sm:$0xff]  ;;  %v7112_v41 = vld [vmem:[#allocation17_spill] sm:$0xff] }
 0x6dd   :  { %2757 = vmatprep.subr.bf16.mxu0 %v7102_v9  ;;  %2798 = vmatprep.subr.bf16.mxu1 %v7103_v28  ;;  %v7113_v9 = vld [vmem:[#allocation44_spill] sm:$0xff]  ;;  %v7114_v28 = vld [vmem:[#allocation18_spill] sm:$0xff] }
 0x6e0   :  { %2758 = vmatpush1.bf16.msra.mxu0 %v7104_v40  ;;  %2799 = vmatpush1.bf16.msra.mxu1 %v7105_v12  ;;  %v7115_v40 = vld [vmem:[#allocation46_spill] sm:$0xff]  ;;  %v7116_v12 = vld [vmem:[#allocation19_spill] sm:$0xff] }
 0x6e1   :  { %2759 = vmatprep.subr.bf16.mxu0 %v7106_v39  ;;  %2800 = vmatprep.subr.bf16.mxu1 %v7107_v34  ;;  %v7117_v39 = vld [vmem:[#allocation48_spill] sm:$0xff] }
 0x6e2   :  { %v7118_v34 = vld [vmem:[#allocation20_spill] sm:$0xff] }
 0x6e4   :  { %2760 = vmatpush1.bf16.msra.mxu0 %v7108_v25  ;;  %2801 = vmatpush1.bf16.msra.mxu1 %v7109_v49  ;;  %v7119_v25 = vld [vmem:[#allocation50_spill] sm:$0xff]  ;;  %v7120_v49 = vld [vmem:[#allocation21_spill] sm:$0xff] }
 0x6e5   :  { %2761 = vmatprep.subr.bf16.mxu0 %v7110_v13  ;;  %2802 = vmatprep.subr.bf16.mxu1 %v7111_v3  ;;  %v7121_v13 = vld [vmem:[#allocation52_spill] sm:$0xff]  ;;  %v7122_v3 = vld [vmem:[#allocation22_spill] sm:$0xff] }
 0x6e8   :  { %2762 = vmatpush1.bf16.msra.mxu0 %v7112_v41  ;;  %2803 = vmatpush1.bf16.msra.mxu1 %v7113_v9  ;;  %v7123_v41 = vld [vmem:[#allocation53_spill] sm:$0xff]  ;;  %v7124_v9 = vld [vmem:[#allocation23_spill] sm:$0xff] }
 0x6e9   :  { %2763 = vmatprep.subr.bf16.mxu0 %v7114_v28  ;;  %2804 = vmatprep.subr.bf16.mxu1 %v7115_v40  ;;  %v7125_v28 = vld [vmem:[#allocation55_spill] sm:$0xff]  ;;  %v7126_v40 = vld [vmem:[#allocation25_spill] sm:$0xff] }
 0x6ec   :  { %2764 = vmatpush1.bf16.msra.mxu0 %v7116_v12  ;;  %2805 = vmatpush1.bf16.msra.mxu1 %v7117_v39  ;;  %v7127_v12 = vld [vmem:[#allocation57_spill] sm:$0xff]  ;;  %v7128_v39 = vld [vmem:[#allocation27_spill] sm:$0xff] }
 0x6ed   :  { %2765 = vmatprep.subr.bf16.mxu0 %v7118_v34  ;;  %2806 = vmatprep.subr.bf16.mxu1 %v7119_v25  ;;  %v7129_v34 = vld [vmem:[#allocation59_spill] sm:$0xff]  ;;  %v7130_v25 = vld [vmem:[#allocation29_spill] sm:$0xff] }
 0x6f0   :  { %2766 = vmatpush1.bf16.msra.mxu0 %v7120_v49  ;;  %2807 = vmatpush1.bf16.msra.mxu1 %v7121_v13  ;;  %v7131_v49 = vld [vmem:[#allocation61_spill] sm:$0xff]  ;;  %v7132_v13 = vld [vmem:[#allocation31_spill] sm:$0xff] }
 0x6f1   :  { %2767 = vmatprep.subr.bf16.mxu0 %v7122_v3  ;;  %2808 = vmatprep.subr.bf16.mxu1 %v7123_v41  ;;  %v7133_v3 = vld [vmem:[#allocation63_spill] sm:$0xff]  ;;  %v7134_v41 = vld [vmem:[#allocation33_spill] sm:$0xff] }
 0x6f4   :  { %2768 = vmatpush1.bf16.msra.mxu0 %v7124_v9  ;;  %2809 = vmatpush1.bf16.msra.mxu1 %v7125_v28  ;;  %v7135_v9 = vld [vmem:[#allocation65_spill] sm:$0xff]  ;;  %v7136_v28 = vld [vmem:[#allocation35_spill] sm:$0xff] }
 0x6f5   :  { %2769 = vmatprep.subr.bf16.mxu0 %v7126_v40  ;;  %2810 = vmatprep.subr.bf16.mxu1 %v7127_v12  ;;  %v7137_v40 = vld [vmem:[#allocation67_spill] sm:$0xff]  ;;  %v7138_v12 = vld [vmem:[#allocation37_spill] sm:$0xff] }
 0x6f8   :  { %2770 = vmatpush1.bf16.msra.mxu0 %v7128_v39  ;;  %2811 = vmatpush1.bf16.msra.mxu1 %v7129_v34  ;;  %v7139_v39 = vld [vmem:[#allocation69_spill] sm:$0xff]  ;;  %v7140_v34 = vld [vmem:[#allocation39_spill] sm:$0xff] }
 0x6f9   :  { %2771 = vmatprep.subr.bf16.mxu0 %v7130_v25  ;;  %2812 = vmatprep.subr.bf16.mxu1 %v7131_v49  ;;  %v7141_v25 = vld [vmem:[#allocation71_spill] sm:$0xff]  ;;  %v7142_v49 = vld [vmem:[#allocation41_spill] sm:$0xff] }
 0x6fc   :  { %2772 = vmatpush1.bf16.msra.mxu0 %v7132_v13  ;;  %2813 = vmatpush1.bf16.msra.mxu1 %v7133_v3  ;;  %v7143_v13 = vld [vmem:[#allocation73_spill] sm:$0xff]  ;;  %v7144_v3 = vld [vmem:[#allocation43_spill] sm:$0xff] }
 0x6fd   :  { %2773 = vmatprep.subr.bf16.mxu0 %v7134_v41  ;;  %2814 = vmatprep.subr.bf16.mxu1 %v7135_v9  ;;  %v7145_v41 = vld [vmem:[#allocation75_spill] sm:$0xff]  ;;  %v7146_v9 = vld [vmem:[#allocation45_spill] sm:$0xff] }
 0x700   :  { %2774 = vmatpush1.bf16.msra.mxu0 %v7136_v28  ;;  %2815 = vmatpush1.bf16.msra.mxu1 %v7137_v40  ;;  %v7147_v28 = vld [vmem:[#allocation77_spill] sm:$0xff]  ;;  %v7148_v40 = vld [vmem:[#allocation47_spill] sm:$0xff] }
 0x701   :  { %2775 = vmatprep.subr.bf16.mxu0 %v7138_v12  ;;  %2816 = vmatprep.subr.bf16.mxu1 %v7139_v39  ;;  %v7149_v12 = vld [vmem:[#allocation79_spill] sm:$0xff]  ;;  %v7150_v39 = vld [vmem:[#allocation49_spill] sm:$0xff] }
 0x704   :  { %2776 = vmatpush1.bf16.msra.mxu0 %v7140_v34  ;;  %2817 = vmatpush1.bf16.msra.mxu1 %v7141_v25  ;;  %v7151_v34 = vld [vmem:[#allocation81_spill] sm:$0xff]  ;;  %v7152_v25 = vld [vmem:[#allocation51_spill] sm:$0xff] }
 0x705   :  { %2777 = vmatprep.subr.bf16.mxu0 %v7142_v49  ;;  %2818 = vmatprep.subr.bf16.mxu1 %v7143_v13  ;;  %v7153_v49 = vld [vmem:[#allocation83_spill] sm:$0xff]  ;;  %v7154_v13 = vld [vmem:[#allocation54_spill] sm:$0xff] }
 0x708   :  { %2778 = vmatpush1.bf16.msra.mxu0 %v7144_v3  ;;  %2819 = vmatpush1.bf16.msra.mxu1 %v7145_v41  ;;  %v7155_v3 = vld [vmem:[#allocation86_spill] sm:$0xff] }
 0x709   :  { %2779 = vmatprep.subr.bf16.mxu0 %v7146_v9  ;;  %2820 = vmatprep.subr.bf16.mxu1 %v7147_v28 }
 0x70c   :  { %2780 = vmatpush1.bf16.msra.mxu0 %v7148_v40  ;;  %2821 = vmatpush1.bf16.msra.mxu1 %v7149_v12 }
 0x70d   :  { %2781 = vmatprep.subr.bf16.mxu0 %v7150_v39  ;;  %2822 = vmatprep.subr.bf16.mxu1 %v7151_v34 }
 0x710   :  { %2782 = vmatpush1.bf16.msra.mxu0 %v7152_v25  ;;  %2823 = vmatpush1.bf16.msra.mxu1 %v7153_v49 }
 0x711   :  { %2833 = vmatprep.subr.bf16.mxu0 %v7154_v13  ;;  %2874 = vmatprep.subr.bf16.mxu1 %v7155_v3 }
 0x766   :  { %v2555_v41 = vpop.f32.mrb[64].mxu0  ;;  %v2596_v9 = vpop.f32.mrb[80].mxu1 }
 0x767   :  { %v2685_v28 = vadd.f32 %v2555_v41, %v7156_v17  ;;  %v2687_v40 = vadd.f32 %v2596_v9, %v7157_v50  ;;  %v2557_v22 = vpop.f32.mrb[65].mxu0  ;;  %v2598_v12 = vpop.f32.mrb[81].mxu1 }
 0x768   :  { %v2686_v39 = vadd.f32 %v2557_v22, %v7158_v56  ;;  %v2688_v34 = vadd.f32 %v2598_v12, %v7159_v60  ;;  %v2559_v55 = vpop.f32.mrb[66].mxu0  ;;  %v2600_v25 = vpop.f32.mrb[82].mxu1 }
 0x769   :  { %v2560_v44 = vpop.f32.mrb[67].mxu0  ;;  %v2601_v49 = vpop.f32.mrb[83].mxu1  ;;  %v3592_v38 = vmul.f32 -1.442695, %v2685_v28  ;;  %v3594_v13 = vmul.f32 -1.442695, %v2687_v40 }
 0x76a   :  { %v3593_v21 = vmul.f32 -1.442695, %v2686_v39  ;;  %v3595_v3 = vmul.f32 -1.442695, %v2688_v34  ;;  %v7160_v49 = vld [vmem:[#allocation162_spill] sm:$0xff]  ;;  %v7161_v40 = vld [vmem:[#allocation181_spill] sm:$0xff] }
 0x76b   :  { %3835 = vpow2.f32 %v3592_v38  ;;  %v7163_v39 = vld [vmem:[#allocation182_spill] sm:$0xff] }
 0x76c   :  { %3837 = vpow2.f32 %v3594_v13 }
 0x76d   :  { %3839 = vpow2.f32 %v3593_v21 }
 0x76e   :  { %3841 = vpow2.f32 %v3595_v3  ;;  %v7162_v3 = vld [vmem:[#allocation164_spill] sm:$0xff] }
 0x775   :  { %v3836_v17 = vpop.eup %3835 }
 0x776   :  { %v3838_v50 = vpop.eup %3837  ;;  %v2699_v16 = vadd.f32 1.0, %v3836_v17 }
 0x777   :  { %v3840_v41 = vpop.eup %3839  ;;  %v2711_v56 = vadd.f32 1.0, %v3838_v50 }
 0x778   :  { %v3842_v9 = vpop.eup %3841  ;;  %v2700_v22 = vadd.f32 1.0, %v3840_v41  ;;  %3843 = vrcp.f32 %v2699_v16 }
 0x779   :  { %v2712_v60 = vadd.f32 1.0, %v3842_v9  ;;  %3845 = vrcp.f32 %v2711_v56 }
 0x77a   :  { %3847 = vrcp.f32 %v2700_v22 }
 0x77b   :  { %3849 = vrcp.f32 %v2712_v60 }
 0x782   :  { %v3844_v56 = vpop.eup %3843 }
 0x783   :  { %v3846_v22 = vpop.eup %3845 }
 0x7a6   :  { %v2637_v44 = vpop.f32.mrb[68].mxu0  ;;  %v2678_v55 = vpop.f32.mrb[84].mxu1 }
 0x7a7   :  { %v2689_v28 = vadd.f32 %v2637_v44, %v7160_v49  ;;  %v2691_v38 = vadd.f32 %v2678_v55, %v7161_v40  ;;  %v2639_v13 = vpop.f32.mrb[69].mxu0  ;;  %v2680_v21 = vpop.f32.mrb[85].mxu1  ;;  %v2731_v40 = vmul.f32 %v3846_v22, %v5773_v8  ;;  %v7164_v22 = vld [vmem:[#allocation120_spill] sm:$0xff] }
 0x7a8   :  { %v2690_v12 = vadd.f32 %v2639_v13, %v7162_v3  ;;  %v2692_v34 = vadd.f32 %v2680_v21, %v7163_v39  ;;  %v2641_v25 = vpop.f32.mrb[70].mxu0  ;;  %v2682_v17 = vpop.f32.mrb[86].mxu1 }
 0x7a9   :  { %3851 = vtanh.f32 %v2689_v28  ;;  %v3596_v50 = vmul.f32 -1.442695, %v2691_v38  ;;  %v2642_v16 = vpop.f32.mrb[71].mxu0  ;;  %v2683_v41 = vpop.f32.mrb[87].mxu1 }
 0x7aa   :  { %3853 = vtanh.f32 %v2690_v12  ;;  %v3597_v9 = vmul.f32 -1.442695, %v2692_v34  ;;  %v3848_v44 = vpop.eup %3847 }
 0x7ab   :  { %3855 = vpow2.f32 %v3596_v50  ;;  %v3850_v55 = vpop.eup %3849 }
 0x7ac   :  { %3857 = vpow2.f32 %v3597_v9  ;;  %v2732_v3 = vmul.f32 %v3850_v55, %v5775_v23  ;;  %v7166_v55 = vld [vmem:[#allocation121_spill] sm:$0xff] }
 0x7b3   :  { %v3852_v49 = vpop.eup %3851 }
 0x7b4   :  { %v3854_v60 = vpop.eup %3853  ;;  %v2733_v13 = vmul.f32 %v3852_v49, %v3844_v56  ;;  %v7167_v49 = vld [vmem:[#allocation99_spill] sm:$0xff] }
 0x7b5   :  { %v3856_v21 = vpop.eup %3855  ;;  %v2734_v28 = vmul.f32 %v3854_v60, %v3848_v44  ;;  %v7165_v44 = vld [vmem:[#allocation97_spill] sm:$0xff]  ;;  %v7168_v60 = vld [vmem:[#allocation122_spill] sm:$0xff] }
 0x7b6   :  { %v3858_v38 = vpop.eup %3857  ;;  %v5923_v39 = vadd.f32 %v2733_v13, %v2731_v40  ;;  %v2725_v12 = vadd.f32 1.0, %v3856_v21  ;;  %v7169_v40 = vld [vmem:[#allocation101_spill] sm:$0xff]  ;;  %v7170_v13 = vld [vmem:[#allocation123_spill] sm:$0xff] }
 0x7b7   :  { %v5925_v34 = vadd.f32 %v2734_v28, %v2732_v3  ;;  %v2726_v25 = vadd.f32 1.0, %v3858_v38  ;;  %v7171_v21 = vld [vmem:[#allocation103_spill] sm:$0xff]  ;;  %v7172_v3 = vld [vmem:[#allocation124_spill] sm:$0xff]  ;;  %v7173_v28 = vld [vmem:[#allocation105_spill] sm:$0xff] }
 0x7b8   :  { %3859 = vtanh.f32 %v5923_v39  ;;  %v7174_v38 = vld [vmem:[#allocation125_spill] sm:$0xff] }
 0x7b9   :  { %3861 = vrcp.f32 %v2725_v12  ;;  %v7175_v12 = vld [vmem:[#allocation107_spill] sm:$0xff] }
 0x7ba   :  { %3863 = vtanh.f32 %v5925_v34 }
 0x7bb   :  { %3865 = vrcp.f32 %v2726_v25  ;;  %v7176_v25 = vld [vmem:[#allocation126_spill] sm:$0xff] }
 0x7c2   :  { %v3860_v17 = vpop.eup %3859 }
 0x7c3   :  { %v3862_v8 = vpop.eup %3861 }
 0x7c4   :  { %v3864_v50 = vpop.eup %3863  ;;  %v2739_v41 = vmul.f32 %v3862_v8, %v3860_v17  ;;  %v7177_v17 = vld [vmem:[#allocation108_spill] sm:$0xff]  ;;  %v7178_v8 = vld [vmem:[#allocation127_spill] sm:$0xff] }
 0x7c5   :  { %v3866_v16 = vpop.eup %3865 }
 0x7c6   :  { %v2740_v23 = vmul.f32 %v3866_v16, %v3864_v50  ;;  %v5929_v56 = vpack.c.bf16 %v2739_v41, %v2739_v41  ;;  %v7179_v50 = vld [vmem:[#allocation109_spill] sm:$0xff]  ;;  %v7180_v16 = vld [vmem:[#allocation128_spill] sm:$0xff]  ;;  %v7181_v41 = vld [vmem:[#allocation111_spill] sm:$0xff] }
 0x7c8   :  { %v2750_v9 = vpack.c.bf16 %v2740_v23, %v2740_v23  ;;  %v7182_v23 = vld [vmem:[#allocation129_spill] sm:$0xff] }
 0x7ca   :  { %2783 = vmatprep.mubr.bf16.mxu0 %v2750_v9  ;;  %2824 = vmatprep.mubr.bf16.mxu1 %v2750_v9 }
 0x7cb   :  { %2784 = vmatmul.mubr.bf16.vlgmr.msra.gmra.mrb[72].mxu0 %v5929_v56  ;;  %2825 = vmatmul.mubr.bf16.vlgmr.msra.gmra.mrb[88].mxu1 %v5929_v56 }
 0x7cc   :  { %2834 = vmatpush1.bf16.msra.mxu0 %v6681_v4  ;;  %2875 = vmatpush1.bf16.msra.mxu1 %v6682_v53 }
 0x7cd   :  { %2865 = vmatprep.mubr.bf16.mxu0 %v2750_v9  ;;  %2906 = vmatprep.mubr.bf16.mxu1 %v2750_v9  ;;  %v7183_v9 = vld [vmem:[#allocation113_spill] sm:$0xff] }
 0x7ce   :  { %2835 = vmatprep.subr.bf16.mxu0 %v6683_v45  ;;  %2876 = vmatprep.subr.bf16.mxu1 %v6684_v29 }
 0x7d0   :  { %2836 = vmatpush1.bf16.msra.mxu0 %v6685_v36  ;;  %2877 = vmatpush1.bf16.msra.mxu1 %v6686_v31 }
 0x7d1   :  { %2837 = vmatprep.subr.bf16.mxu0 %v6687_v57  ;;  %2878 = vmatprep.subr.bf16.mxu1 %v6688_v2 }
 0x7d4   :  { %2838 = vmatpush1.bf16.msra.mxu0 %v6689_v11  ;;  %2879 = vmatpush1.bf16.msra.mxu1 %v6690_v27 }
 0x7d5   :  { %2839 = vmatprep.subr.bf16.mxu0 %v6691_v24  ;;  %2880 = vmatprep.subr.bf16.mxu1 %v6692_v19 }
 0x7d8   :  { %2840 = vmatpush1.bf16.msra.mxu0 %v6693_v48  ;;  %2881 = vmatpush1.bf16.msra.mxu1 %v6694_v58 }
 0x7d9   :  { %2841 = vmatprep.subr.bf16.mxu0 %v6695_v1  ;;  %2882 = vmatprep.subr.bf16.mxu1 %v6696_v18 }
 0x7dc   :  { %2842 = vmatpush1.bf16.msra.mxu0 %v6697_v0  ;;  %2883 = vmatpush1.bf16.msra.mxu1 %v6698_v5 }
 0x7dd   :  { %2843 = vmatprep.subr.bf16.mxu0 %v6699_v63  ;;  %2884 = vmatprep.subr.bf16.mxu1 %v6700_v52 }
 0x7e0   :  { %2844 = vmatpush1.bf16.msra.mxu0 %v6701_v43  ;;  %2885 = vmatpush1.bf16.msra.mxu1 %v4728_v14 }
 0x7e1   :  { %2845 = vmatprep.subr.bf16.mxu0 %v6702_v6  ;;  %2886 = vmatprep.subr.bf16.mxu1 %v4734_v59 }
 0x7e4   :  { %2846 = vmatpush1.bf16.msra.mxu0 %v6703_v7  ;;  %2887 = vmatpush1.bf16.msra.mxu1 %v6784_v47 }
 0x7e5   :  { %2847 = vmatprep.subr.bf16.mxu0 %v6704_v37  ;;  %2888 = vmatprep.subr.bf16.mxu1 %v6785_v61 }
 0x7e8   :  { %2848 = vmatpush1.bf16.msra.mxu0 %v6705_v54  ;;  %2889 = vmatpush1.bf16.msra.mxu1 %v6786_v62 }
 0x7e9   :  { %2849 = vmatprep.subr.bf16.mxu0 %v6706_v35  ;;  %2890 = vmatprep.subr.bf16.mxu1 %v6787_v20 }
 0x7ec   :  { %2850 = vmatpush1.bf16.msra.mxu0 %v6707_v15  ;;  %2891 = vmatpush1.bf16.msra.mxu1 %v6788_v51 }
 0x7ed   :  { %2851 = vmatprep.subr.bf16.mxu0 %v6708_v10  ;;  %2892 = vmatprep.subr.bf16.mxu1 %v6789_v42 }
 0x7f0   :  { %2852 = vmatpush1.bf16.msra.mxu0 %v6709_v46  ;;  %2893 = vmatpush1.bf16.msra.mxu1 %v6790_v30 }
 0x7f1   :  { %2853 = vmatprep.subr.bf16.mxu0 %v6710_v26  ;;  %2894 = vmatprep.subr.bf16.mxu1 %v6791_v32 }
 0x7f4   :  { %2854 = vmatpush1.bf16.msra.mxu0 %v6711_v33  ;;  %2895 = vmatpush1.bf16.msra.mxu1 %v7164_v22 }
 0x7f5   :  { %2855 = vmatprep.subr.bf16.mxu0 %v7165_v44  ;;  %2896 = vmatprep.subr.bf16.mxu1 %v7166_v55 }
 0x7f8   :  { %2856 = vmatpush1.bf16.msra.mxu0 %v7167_v49  ;;  %2897 = vmatpush1.bf16.msra.mxu1 %v7168_v60 }
 0x7f9   :  { %2857 = vmatprep.subr.bf16.mxu0 %v7169_v40  ;;  %2898 = vmatprep.subr.bf16.mxu1 %v7170_v13  ;;  %v7253_v13 = vld [vmem:[#allocation139_spill] sm:$0xff] }
 0x7fa   :  { %v7254_v40 = vld [vmem:[#allocation167_spill] sm:$0xff] }
 0x7fc   :  { %2858 = vmatpush1.bf16.msra.mxu0 %v7171_v21  ;;  %2899 = vmatpush1.bf16.msra.mxu1 %v7172_v3  ;;  %v7252_v3 = vld [vmem:[#allocation165_spill] sm:$0xff] }
 0x7fd   :  { %2859 = vmatprep.subr.bf16.mxu0 %v7173_v28  ;;  %2900 = vmatprep.subr.bf16.mxu1 %v7174_v38  ;;  %v7184_v28 = vld [vmem:[#allocation130_spill] sm:$0xff]  ;;  %v7185_v38 = vld [vmem:[#allocation5_spill] sm:$0xff] }
 0x800   :  { %2860 = vmatpush1.bf16.msra.mxu0 %v7175_v12  ;;  %2901 = vmatpush1.bf16.msra.mxu1 %v7176_v25  ;;  %v7186_v12 = vld [vmem:[#allocation10_spill] sm:$0xff]  ;;  %v7251_v25 = vld [vmem:[#allocation137_spill] sm:$0xff] }
 0x801   :  { %2861 = vmatprep.subr.bf16.mxu0 %v7177_v17  ;;  %2902 = vmatprep.subr.bf16.mxu1 %v7178_v8  ;;  %v7187_v8 = vld [vmem:[#allocation6_spill] sm:$0xff]  ;;  %v7196_v17 = vld [vmem:[#allocation32_spill] sm:$0xff] }
 0x804   :  { %2862 = vmatpush1.bf16.msra.mxu0 %v7179_v50  ;;  %2903 = vmatpush1.bf16.msra.mxu1 %v7180_v16  ;;  %v7188_v50 = vld [vmem:[#allocation24_spill] sm:$0xff]  ;;  %v7189_v16 = vld [vmem:[#allocation7_spill] sm:$0xff] }
 0x805   :  { %2863 = vmatprep.subr.bf16.mxu0 %v7181_v41  ;;  %2904 = vmatprep.subr.bf16.mxu1 %v7182_v23  ;;  %v7190_v41 = vld [vmem:[#allocation26_spill] sm:$0xff]  ;;  %v7191_v23 = vld [vmem:[#allocation8_spill] sm:$0xff] }
 0x808   :  { %2864 = vmatpush1.bf16.msra.mxu0 %v7183_v9  ;;  %2905 = vmatpush1.bf16.msra.mxu1 %v7184_v28  ;;  %v7192_v9 = vld [vmem:[#allocation28_spill] sm:$0xff]  ;;  %v7193_v28 = vld [vmem:[#allocation9_spill] sm:$0xff] }
 0x809   :  { %2981 = vmatprep.subr.bf16.mxu0 %v7185_v38  ;;  %3022 = vmatprep.subr.bf16.mxu1 %v7186_v12  ;;  %v7194_v38 = vld [vmem:[#allocation30_spill] sm:$0xff]  ;;  %v7195_v12 = vld [vmem:[#allocation11_spill] sm:$0xff] }
 0x80b   :  { %2866 = vmatmul.mubr.bf16.vlgmr.msra.gmra.mrb[76].mxu0 %v5929_v56  ;;  %2907 = vmatmul.mubr.bf16.vlgmr.msra.gmra.mrb[92].mxu1 %v5929_v56  ;;  %v7197_v56 = vld [vmem:[#allocation12_spill] sm:$0xff] }
 0x80c   :  { %2982 = vmatpush1.bf16.msra.mxu0 %v7187_v8  ;;  %3023 = vmatpush1.bf16.msra.mxu1 %v7188_v50  ;;  %v7198_v8 = vld [vmem:[#allocation34_spill] sm:$0xff]  ;;  %v7199_v50 = vld [vmem:[#allocation13_spill] sm:$0xff] }
 0x80d   :  { %2983 = vmatprep.subr.bf16.mxu0 %v7189_v16  ;;  %3024 = vmatprep.subr.bf16.mxu1 %v7190_v41  ;;  %v7200_v16 = vld [vmem:[#allocation36_spill] sm:$0xff]  ;;  %v7201_v41 = vld [vmem:[#allocation14_spill] sm:$0xff] }
 0x810   :  { %2984 = vmatpush1.bf16.msra.mxu0 %v7191_v23  ;;  %3025 = vmatpush1.bf16.msra.mxu1 %v7192_v9  ;;  %v7202_v23 = vld [vmem:[#allocation38_spill] sm:$0xff]  ;;  %v7203_v9 = vld [vmem:[#allocation15_spill] sm:$0xff] }
 0x811   :  { %2985 = vmatprep.subr.bf16.mxu0 %v7193_v28  ;;  %3026 = vmatprep.subr.bf16.mxu1 %v7194_v38  ;;  %v7204_v28 = vld [vmem:[#allocation40_spill] sm:$0xff] }
 0x812   :  { %v7205_v38 = vld [vmem:[#allocation16_spill] sm:$0xff] }
 0x814   :  { %2986 = vmatpush1.bf16.msra.mxu0 %v7195_v12  ;;  %3027 = vmatpush1.bf16.msra.mxu1 %v7196_v17  ;;  %v7206_v12 = vld [vmem:[#allocation42_spill] sm:$0xff]  ;;  %v7207_v17 = vld [vmem:[#allocation17_spill] sm:$0xff] }
 0x815   :  { %2987 = vmatprep.subr.bf16.mxu0 %v7197_v56  ;;  %3028 = vmatprep.subr.bf16.mxu1 %v7198_v8  ;;  %v7208_v56 = vld [vmem:[#allocation44_spill] sm:$0xff]  ;;  %v7209_v8 = vld [vmem:[#allocation18_spill] sm:$0xff] }
 0x818   :  { %2988 = vmatpush1.bf16.msra.mxu0 %v7199_v50  ;;  %3029 = vmatpush1.bf16.msra.mxu1 %v7200_v16  ;;  %v7210_v50 = vld [vmem:[#allocation46_spill] sm:$0xff]  ;;  %v7211_v16 = vld [vmem:[#allocation19_spill] sm:$0xff] }
 0x819   :  { %2989 = vmatprep.subr.bf16.mxu0 %v7201_v41  ;;  %3030 = vmatprep.subr.bf16.mxu1 %v7202_v23  ;;  %v7212_v41 = vld [vmem:[#allocation48_spill] sm:$0xff] }
 0x81a   :  { %v7213_v23 = vld [vmem:[#allocation20_spill] sm:$0xff] }
 0x81c   :  { %2990 = vmatpush1.bf16.msra.mxu0 %v7203_v9  ;;  %3031 = vmatpush1.bf16.msra.mxu1 %v7204_v28  ;;  %v7214_v9 = vld [vmem:[#allocation50_spill] sm:$0xff]  ;;  %v7215_v28 = vld [vmem:[#allocation21_spill] sm:$0xff] }
 0x81d   :  { %2991 = vmatprep.subr.bf16.mxu0 %v7205_v38  ;;  %3032 = vmatprep.subr.bf16.mxu1 %v7206_v12  ;;  %v7216_v38 = vld [vmem:[#allocation52_spill] sm:$0xff]  ;;  %v7217_v12 = vld [vmem:[#allocation22_spill] sm:$0xff] }
 0x820   :  { %2992 = vmatpush1.bf16.msra.mxu0 %v7207_v17  ;;  %3033 = vmatpush1.bf16.msra.mxu1 %v7208_v56  ;;  %v7218_v17 = vld [vmem:[#allocation53_spill] sm:$0xff]  ;;  %v7219_v56 = vld [vmem:[#allocation23_spill] sm:$0xff] }
 0x821   :  { %2993 = vmatprep.subr.bf16.mxu0 %v7209_v8  ;;  %3034 = vmatprep.subr.bf16.mxu1 %v7210_v50  ;;  %v7220_v8 = vld [vmem:[#allocation55_spill] sm:$0xff]  ;;  %v7221_v50 = vld [vmem:[#allocation25_spill] sm:$0xff] }
 0x824   :  { %2994 = vmatpush1.bf16.msra.mxu0 %v7211_v16  ;;  %3035 = vmatpush1.bf16.msra.mxu1 %v7212_v41  ;;  %v7222_v16 = vld [vmem:[#allocation57_spill] sm:$0xff]  ;;  %v7223_v41 = vld [vmem:[#allocation27_spill] sm:$0xff] }
 0x825   :  { %2995 = vmatprep.subr.bf16.mxu0 %v7213_v23  ;;  %3036 = vmatprep.subr.bf16.mxu1 %v7214_v9  ;;  %v7224_v23 = vld [vmem:[#allocation59_spill] sm:$0xff]  ;;  %v7225_v9 = vld [vmem:[#allocation29_spill] sm:$0xff] }
 0x828   :  { %2996 = vmatpush1.bf16.msra.mxu0 %v7215_v28  ;;  %3037 = vmatpush1.bf16.msra.mxu1 %v7216_v38  ;;  %v7226_v28 = vld [vmem:[#allocation61_spill] sm:$0xff]  ;;  %v7227_v38 = vld [vmem:[#allocation31_spill] sm:$0xff] }
 0x829   :  { %2997 = vmatprep.subr.bf16.mxu0 %v7217_v12  ;;  %3038 = vmatprep.subr.bf16.mxu1 %v7218_v17  ;;  %v7228_v12 = vld [vmem:[#allocation63_spill] sm:$0xff]  ;;  %v7229_v17 = vld [vmem:[#allocation33_spill] sm:$0xff] }
 0x82c   :  { %2998 = vmatpush1.bf16.msra.mxu0 %v7219_v56  ;;  %3039 = vmatpush1.bf16.msra.mxu1 %v7220_v8  ;;  %v7230_v56 = vld [vmem:[#allocation65_spill] sm:$0xff]  ;;  %v7231_v8 = vld [vmem:[#allocation35_spill] sm:$0xff] }
 0x82d   :  { %2999 = vmatprep.subr.bf16.mxu0 %v7221_v50  ;;  %3040 = vmatprep.subr.bf16.mxu1 %v7222_v16  ;;  %v7232_v50 = vld [vmem:[#allocation67_spill] sm:$0xff]  ;;  %v7233_v16 = vld [vmem:[#allocation37_spill] sm:$0xff] }
 0x830   :  { %3000 = vmatpush1.bf16.msra.mxu0 %v7223_v41  ;;  %3041 = vmatpush1.bf16.msra.mxu1 %v7224_v23  ;;  %v7234_v41 = vld [vmem:[#allocation69_spill] sm:$0xff]  ;;  %v7235_v23 = vld [vmem:[#allocation39_spill] sm:$0xff] }
 0x831   :  { %3001 = vmatprep.subr.bf16.mxu0 %v7225_v9  ;;  %3042 = vmatprep.subr.bf16.mxu1 %v7226_v28  ;;  %v7236_v9 = vld [vmem:[#allocation71_spill] sm:$0xff]  ;;  %v7237_v28 = vld [vmem:[#allocation41_spill] sm:$0xff] }
 0x834   :  { %3002 = vmatpush1.bf16.msra.mxu0 %v7227_v38  ;;  %3043 = vmatpush1.bf16.msra.mxu1 %v7228_v12  ;;  %v7238_v38 = vld [vmem:[#allocation73_spill] sm:$0xff]  ;;  %v7239_v12 = vld [vmem:[#allocation43_spill] sm:$0xff] }
 0x835   :  { %3003 = vmatprep.subr.bf16.mxu0 %v7229_v17  ;;  %3044 = vmatprep.subr.bf16.mxu1 %v7230_v56  ;;  %v7240_v17 = vld [vmem:[#allocation75_spill] sm:$0xff]  ;;  %v7241_v56 = vld [vmem:[#allocation45_spill] sm:$0xff] }
 0x838   :  { %3004 = vmatpush1.bf16.msra.mxu0 %v7231_v8  ;;  %3045 = vmatpush1.bf16.msra.mxu1 %v7232_v50  ;;  %v7242_v8 = vld [vmem:[#allocation77_spill] sm:$0xff]  ;;  %v7243_v50 = vld [vmem:[#allocation47_spill] sm:$0xff] }
 0x839   :  { %3005 = vmatprep.subr.bf16.mxu0 %v7233_v16  ;;  %3046 = vmatprep.subr.bf16.mxu1 %v7234_v41  ;;  %v7244_v16 = vld [vmem:[#allocation79_spill] sm:$0xff]  ;;  %v7245_v41 = vld [vmem:[#allocation49_spill] sm:$0xff] }
 0x83c   :  { %3006 = vmatpush1.bf16.msra.mxu0 %v7235_v23  ;;  %3047 = vmatpush1.bf16.msra.mxu1 %v7236_v9  ;;  %v7246_v23 = vld [vmem:[#allocation81_spill] sm:$0xff]  ;;  %v7247_v9 = vld [vmem:[#allocation51_spill] sm:$0xff] }
 0x83d   :  { %3007 = vmatprep.subr.bf16.mxu0 %v7237_v28  ;;  %3048 = vmatprep.subr.bf16.mxu1 %v7238_v38  ;;  %v7248_v28 = vld [vmem:[#allocation83_spill] sm:$0xff]  ;;  %v7249_v38 = vld [vmem:[#allocation54_spill] sm:$0xff] }
 0x840   :  { %3008 = vmatpush1.bf16.msra.mxu0 %v7239_v12  ;;  %3049 = vmatpush1.bf16.msra.mxu1 %v7240_v17  ;;  %v7250_v12 = vld [vmem:[#allocation86_spill] sm:$0xff] }
 0x841   :  { %3009 = vmatprep.subr.bf16.mxu0 %v7241_v56  ;;  %3050 = vmatprep.subr.bf16.mxu1 %v7242_v8 }
 0x844   :  { %3010 = vmatpush1.bf16.msra.mxu0 %v7243_v50  ;;  %3051 = vmatpush1.bf16.msra.mxu1 %v7244_v16 }
 0x845   :  { %3011 = vmatprep.subr.bf16.mxu0 %v7245_v41  ;;  %3052 = vmatprep.subr.bf16.mxu1 %v7246_v23 }
 0x848   :  { %3012 = vmatpush1.bf16.msra.mxu0 %v7247_v9  ;;  %3053 = vmatpush1.bf16.msra.mxu1 %v7248_v28 }
 0x849   :  { %3063 = vmatprep.subr.bf16.mxu0 %v7249_v38  ;;  %3104 = vmatprep.subr.bf16.mxu1 %v7250_v12 }
 0x89e   :  { %v2785_v17 = vpop.f32.mrb[72].mxu0  ;;  %v2826_v56 = vpop.f32.mrb[88].mxu1 }
 0x89f   :  { %v2915_v8 = vadd.f32 %v2785_v17, %v7251_v25  ;;  %v2917_v50 = vadd.f32 %v2826_v56, %v7252_v3  ;;  %v2787_v21 = vpop.f32.mrb[73].mxu0  ;;  %v2828_v16 = vpop.f32.mrb[89].mxu1 }
 0x8a0   :  { %v2916_v41 = vadd.f32 %v2787_v21, %v7253_v13  ;;  %v2918_v23 = vadd.f32 %v2828_v16, %v7254_v40  ;;  %v2789_v60 = vpop.f32.mrb[74].mxu0  ;;  %v2830_v9 = vpop.f32.mrb[90].mxu1  ;;  %v7256_v16 = vld [vmem:[#allocation183_spill] sm:$0xff] }
 0x8a1   :  { %v2790_v49 = vpop.f32.mrb[75].mxu0  ;;  %v2831_v28 = vpop.f32.mrb[91].mxu1  ;;  %v3598_v55 = vmul.f32 -1.442695, %v2915_v8  ;;  %v3600_v38 = vmul.f32 -1.442695, %v2917_v50 }
 0x8a2   :  { %v3599_v44 = vmul.f32 -1.442695, %v2916_v41  ;;  %v3601_v12 = vmul.f32 -1.442695, %v2918_v23  ;;  %v7255_v8 = vld [vmem:[#allocation166_spill] sm:$0xff]  ;;  %v7257_v23 = vld [vmem:[#allocation168_spill] sm:$0xff] }
 0x8a3   :  { %3867 = vpow2.f32 %v3598_v55  ;;  %v7258_v28 = vld [vmem:[#allocation184_spill] sm:$0xff] }
 0x8a4   :  { %3869 = vpow2.f32 %v3600_v38 }
 0x8a5   :  { %3871 = vpow2.f32 %v3599_v44 }
 0x8a6   :  { %3873 = vpow2.f32 %v3601_v12 }
 0x8ad   :  { %v3868_v25 = vpop.eup %3867 }
 0x8ae   :  { %v3870_v3 = vpop.eup %3869  ;;  %v2929_v22 = vadd.f32 1.0, %v3868_v25 }
 0x8af   :  { %v3872_v17 = vpop.eup %3871  ;;  %v2941_v13 = vadd.f32 1.0, %v3870_v3 }
 0x8b0   :  { %v3874_v56 = vpop.eup %3873  ;;  %v2930_v21 = vadd.f32 1.0, %v3872_v17  ;;  %3875 = vrcp.f32 %v2929_v22 }
 0x8b1   :  { %v2942_v40 = vadd.f32 1.0, %v3874_v56  ;;  %3877 = vrcp.f32 %v2941_v13 }
 0x8b2   :  { %3879 = vrcp.f32 %v2930_v21 }
 0x8b3   :  { %3881 = vrcp.f32 %v2942_v40 }
 0x8ba   :  { %v3876_v13 = vpop.eup %3875 }
 0x8bb   :  { %v3878_v21 = vpop.eup %3877 }
 0x8de   :  { %v2867_v49 = vpop.f32.mrb[76].mxu0  ;;  %v2908_v60 = vpop.f32.mrb[92].mxu1 }
 0x8df   :  { %v2919_v50 = vadd.f32 %v2867_v49, %v7255_v8  ;;  %v2921_v55 = vadd.f32 %v2908_v60, %v7256_v16  ;;  %v2869_v41 = vpop.f32.mrb[77].mxu0  ;;  %v2910_v44 = vpop.f32.mrb[93].mxu1  ;;  %v2961_v16 = vmul.f32 %v3878_v21, %v5923_v39  ;;  %v7281_v21 = vld [vmem:[#allocation169_spill] sm:$0xff] }
 0x8e0   :  { %v2920_v9 = vadd.f32 %v2869_v41, %v7257_v23  ;;  %v2922_v38 = vadd.f32 %v2910_v44, %v7258_v28  ;;  %v2871_v12 = vpop.f32.mrb[78].mxu0  ;;  %v2912_v25 = vpop.f32.mrb[94].mxu1 }
 0x8e1   :  { %3883 = vtanh.f32 %v2919_v50  ;;  %v3602_v3 = vmul.f32 -1.442695, %v2921_v55  ;;  %v2872_v22 = vpop.f32.mrb[79].mxu0  ;;  %v2913_v17 = vpop.f32.mrb[95].mxu1 }
 0x8e2   :  { %3885 = vtanh.f32 %v2920_v9  ;;  %v3603_v56 = vmul.f32 -1.442695, %v2922_v38  ;;  %v3880_v49 = vpop.eup %3879 }
 0x8e3   :  { %3887 = vpow2.f32 %v3602_v3  ;;  %v3882_v60 = vpop.eup %3881 }
 0x8e4   :  { %3889 = vpow2.f32 %v3603_v56  ;;  %v2962_v23 = vmul.f32 %v3882_v60, %v5925_v34 }
 0x8eb   :  { %v3884_v8 = vpop.eup %3883 }
 0x8ec   :  { %v3886_v40 = vpop.eup %3885  ;;  %v2963_v41 = vmul.f32 %v3884_v8, %v3876_v13 }
 0x8ed   :  { %v3888_v44 = vpop.eup %3887  ;;  %v2964_v50 = vmul.f32 %v3886_v40, %v3880_v49  ;;  %v7282_v40 = vld [vmem:[#allocation143_spill] sm:$0xff] }
 0x8ee   :  { %v3890_v55 = vpop.eup %3889  ;;  %v6073_v28 = vadd.f32 %v2963_v41, %v2961_v16  ;;  %v2955_v9 = vadd.f32 1.0, %v3888_v44  ;;  %v7283_v41 = vld [vmem:[#allocation171_spill] sm:$0xff] }
 0x8ef   :  { %v6075_v38 = vadd.f32 %v2964_v50, %v2962_v23  ;;  %v2956_v12 = vadd.f32 1.0, %v3890_v55 }
 0x8f0   :  { %3891 = vtanh.f32 %v6073_v28 }
 0x8f1   :  { %3893 = vrcp.f32 %v2955_v9 }
 0x8f2   :  { %3895 = vtanh.f32 %v6075_v38 }
 0x8f3   :  { %3897 = vrcp.f32 %v2956_v12 }
 0x8fa   :  { %v3892_v25 = vpop.eup %3891 }
 0x8fb   :  { %v3894_v39 = vpop.eup %3893 }
 0x8fc   :  { %v3896_v3 = vpop.eup %3895  ;;  %v2969_v17 = vmul.f32 %v3894_v39, %v3892_v25 }
 0x8fd   :  { %v3898_v22 = vpop.eup %3897 }
 0x8fe   :  { %v2970_v34 = vmul.f32 %v3898_v22, %v3896_v3  ;;  %v6079_v13 = vpack.c.bf16 %v2969_v17, %v2969_v17 }
 0x900   :  { %v2980_v56 = vpack.c.bf16 %v2970_v34, %v2970_v34 }
 0x902   :  { %3013 = vmatprep.mubr.bf16.mxu0 %v2980_v56  ;;  %3054 = vmatprep.mubr.bf16.mxu1 %v2980_v56 }
 0x903   :  { %3014 = vmatmul.mubr.bf16.vlgmr.msra.gmra.mrb[80].mxu0 %v6079_v13  ;;  %3055 = vmatmul.mubr.bf16.vlgmr.msra.gmra.mrb[96].mxu1 %v6079_v13 }
 0x904   :  { %3064 = vmatpush1.bf16.msra.mxu0 %v6681_v4  ;;  %3105 = vmatpush1.bf16.msra.mxu1 %v6682_v53  ;;  %v7261_v4 = vld [vmem:[#allocation121_spill] sm:$0xff]  ;;  %v7262_v53 = vld [vmem:[#allocation99_spill] sm:$0xff] }
 0x905   :  { %3095 = vmatprep.mubr.bf16.mxu0 %v2980_v56  ;;  %3136 = vmatprep.mubr.bf16.mxu1 %v2980_v56 }
 0x906   :  { %3065 = vmatprep.subr.bf16.mxu0 %v6683_v45  ;;  %3106 = vmatprep.subr.bf16.mxu1 %v6684_v29  ;;  %v7263_v45 = vld [vmem:[#allocation122_spill] sm:$0xff]  ;;  %v7264_v29 = vld [vmem:[#allocation101_spill] sm:$0xff] }
 0x908   :  { %3066 = vmatpush1.bf16.msra.mxu0 %v6685_v36  ;;  %3107 = vmatpush1.bf16.msra.mxu1 %v6686_v31  ;;  %v7266_v36 = vld [vmem:[#allocation103_spill] sm:$0xff]  ;;  %v7268_v31 = vld [vmem:[#allocation105_spill] sm:$0xff] }
 0x909   :  { %3067 = vmatprep.subr.bf16.mxu0 %v6687_v57  ;;  %3108 = vmatprep.subr.bf16.mxu1 %v6688_v2  ;;  %v7270_v57 = vld [vmem:[#allocation107_spill] sm:$0xff]  ;;  %v7271_v2 = vld [vmem:[#allocation126_spill] sm:$0xff] }
 0x90c   :  { %3068 = vmatpush1.bf16.msra.mxu0 %v6689_v11  ;;  %3109 = vmatpush1.bf16.msra.mxu1 %v6690_v27  ;;  %v7272_v11 = vld [vmem:[#allocation108_spill] sm:$0xff]  ;;  %v7273_v27 = vld [vmem:[#allocation127_spill] sm:$0xff] }
 0x90d   :  { %3069 = vmatprep.subr.bf16.mxu0 %v6691_v24  ;;  %3110 = vmatprep.subr.bf16.mxu1 %v6692_v19  ;;  %v7274_v24 = vld [vmem:[#allocation109_spill] sm:$0xff]  ;;  %v7275_v19 = vld [vmem:[#allocation128_spill] sm:$0xff] }
 0x910   :  { %3070 = vmatpush1.bf16.msra.mxu0 %v6693_v48  ;;  %3111 = vmatpush1.bf16.msra.mxu1 %v6694_v58  ;;  %v7276_v48 = vld [vmem:[#allocation111_spill] sm:$0xff]  ;;  %v7277_v58 = vld [vmem:[#allocation129_spill] sm:$0xff] }
 0x911   :  { %3071 = vmatprep.subr.bf16.mxu0 %v6695_v1  ;;  %3112 = vmatprep.subr.bf16.mxu1 %v6696_v18  ;;  %v7278_v1 = vld [vmem:[#allocation113_spill] sm:$0xff]  ;;  %v7279_v18 = vld [vmem:[#allocation130_spill] sm:$0xff] }
 0x914   :  { %3072 = vmatpush1.bf16.msra.mxu0 %v6697_v0  ;;  %3113 = vmatpush1.bf16.msra.mxu1 %v6698_v5  ;;  %v3659_v0 = vld [vmem:[%s6215_s4 + $0x40] sm:$0xff]  }
 0x915   :  { %3073 = vmatprep.subr.bf16.mxu0 %v6699_v63  ;;  %3114 = vmatprep.subr.bf16.mxu1 %v6700_v52  ;;  %v3660_v5 = vld [vmem:[%s6215_s4] sm:$0xff]   ;;  %v3661_v63 = vld [vmem:[%s6215_s4 + $0x48] sm:$0xff]  }
 0x916   :  { %v3662_v52 = vld [vmem:[%s6215_s4 + $0x8] sm:$0xff]  }
 0x918   :  { %3074 = vmatpush1.bf16.msra.mxu0 %v6701_v43  ;;  %3115 = vmatpush1.bf16.msra.mxu1 %v4728_v14  ;;  %v7260_v14 = vld [vmem:[#allocation97_spill] sm:$0xff]  ;;  %v3663_v43 = vld [vmem:[%s6215_s4 + $0x50] sm:$0xff]  }
 0x919   :  { %3075 = vmatprep.subr.bf16.mxu0 %v6702_v6  ;;  %3116 = vmatprep.subr.bf16.mxu1 %v4734_v59  ;;  %v7259_v59 = vld [vmem:[#allocation120_spill] sm:$0xff]  ;;  %v3664_v6 = vld [vmem:[%s6215_s4 + $0x10] sm:$0xff]  }
 0x91c   :  { %3076 = vmatpush1.bf16.msra.mxu0 %v6703_v7  ;;  %3117 = vmatpush1.bf16.msra.mxu1 %v6784_v47  ;;  %v3665_v7 = vld [vmem:[%s6215_s4 + $0x58] sm:$0xff]   ;;  %v3671_v47 = vld [vmem:[%s6215_s4 + $0x70] sm:$0xff]  }
 0x91d   :  { %3077 = vmatprep.subr.bf16.mxu0 %v6704_v37  ;;  %3118 = vmatprep.subr.bf16.mxu1 %v6785_v61  ;;  %v3666_v37 = vld [vmem:[%s6215_s4 + $0x18] sm:$0xff]   ;;  %v3672_v61 = vld [vmem:[%s6215_s4 + $0x30] sm:$0xff]  }
 0x920   :  { %3078 = vmatpush1.bf16.msra.mxu0 %v6705_v54  ;;  %3119 = vmatpush1.bf16.msra.mxu1 %v6786_v62  ;;  %v3667_v54 = vld [vmem:[%s6215_s4 + $0x60] sm:$0xff]   ;;  %v3673_v62 = vld [vmem:[%s6215_s4 + $0x78] sm:$0xff]  }
 0x921   :  { %3079 = vmatprep.subr.bf16.mxu0 %v6706_v35  ;;  %3120 = vmatprep.subr.bf16.mxu1 %v6787_v20  ;;  %v3668_v35 = vld [vmem:[%s6215_s4 + $0x20] sm:$0xff]   ;;  %v3674_v20 = vld [vmem:[%s6215_s4 + $0x38] sm:$0xff]  }
 0x924   :  { %3080 = vmatpush1.bf16.msra.mxu0 %v6707_v15  ;;  %3121 = vmatpush1.bf16.msra.mxu1 %v6788_v51  ;;  %v3669_v15 = vld [vmem:[%s6215_s4 + $0x68] sm:$0xff]  }
 0x925   :  { %3081 = vmatprep.subr.bf16.mxu0 %v6708_v10  ;;  %3122 = vmatprep.subr.bf16.mxu1 %v6789_v42  ;;  %v3670_v10 = vld [vmem:[%s6215_s4 + $0x28] sm:$0xff]  }
 0x928   :  { %3082 = vmatpush1.bf16.msra.mxu0 %v6709_v46  ;;  %3123 = vmatpush1.bf16.msra.mxu1 %v6790_v30  ;;  %v7265_v46 = vld [vmem:[#allocation123_spill] sm:$0xff]  ;;  %v7280_v30 = vld [vmem:[#allocation141_spill] sm:$0xff] }
 0x929   :  { %3083 = vmatprep.subr.bf16.mxu0 %v6710_v26  ;;  %3124 = vmatprep.subr.bf16.mxu1 %v6791_v32  ;;  %v7267_v26 = vld [vmem:[#allocation124_spill] sm:$0xff] }
 0x92c   :  { %3084 = vmatpush1.bf16.msra.mxu0 %v6711_v33  ;;  %3125 = vmatpush1.bf16.msra.mxu1 %v7259_v59  ;;  %v7269_v33 = vld [vmem:[#allocation125_spill] sm:$0xff] }
 0x92d   :  { %3085 = vmatprep.subr.bf16.mxu0 %v7260_v14  ;;  %3126 = vmatprep.subr.bf16.mxu1 %v7261_v4 }
 0x930   :  { %3086 = vmatpush1.bf16.msra.mxu0 %v7262_v53  ;;  %3127 = vmatpush1.bf16.msra.mxu1 %v7263_v45 }
 0x931   :  { %3087 = vmatprep.subr.bf16.mxu0 %v7264_v29  ;;  %3128 = vmatprep.subr.bf16.mxu1 %v7265_v46  ;;  %v7284_v29 = vld [vmem:[#allocation170_spill] sm:$0xff] }
 0x934   :  { %3088 = vmatpush1.bf16.msra.mxu0 %v7266_v36  ;;  %3129 = vmatpush1.bf16.msra.mxu1 %v7267_v26  ;;  %v7285_v36 = vld [vmem:[#allocation185_spill] sm:$0xff] }
 0x935   :  { %3089 = vmatprep.subr.bf16.mxu0 %v7268_v31  ;;  %3130 = vmatprep.subr.bf16.mxu1 %v7269_v33 }
 0x938   :  { %3090 = vmatpush1.bf16.msra.mxu0 %v7270_v57  ;;  %3131 = vmatpush1.bf16.msra.mxu1 %v7271_v2  ;;  %v7286_v57 = vld [vmem:[#allocation172_spill] sm:$0xff] }
 0x939   :  { %3091 = vmatprep.subr.bf16.mxu0 %v7272_v11  ;;  %3132 = vmatprep.subr.bf16.mxu1 %v7273_v27  ;;  %v7287_v11 = vld [vmem:[#allocation186_spill] sm:$0xff] }
 0x93c   :  { %3092 = vmatpush1.bf16.msra.mxu0 %v7274_v24  ;;  %3133 = vmatpush1.bf16.msra.mxu1 %v7275_v19 }
 0x93d   :  { %3093 = vmatprep.subr.bf16.mxu0 %v7276_v48  ;;  %3134 = vmatprep.subr.bf16.mxu1 %v7277_v58 }
 0x940   :  { %3094 = vmatpush1.bf16.msra.mxu0 %v7278_v1  ;;  %3135 = vmatpush1.bf16.msra.mxu1 %v7279_v18 }
 0x941   :  { %3627 = vmatprep.subr.bf16.mxu0 %v3659_v0 }
 0x943   :  { %3096 = vmatmul.mubr.bf16.vlgmr.msra.gmra.mrb[84].mxu0 %v6079_v13  ;;  %3137 = vmatmul.mubr.bf16.vlgmr.msra.gmra.mrb[100].mxu1 %v6079_v13 }
 0x944   :  { %3628 = vmatpush3.bf16.msra.mxu0 %v3660_v5 }
 0x945   :  { %3629 = vmatprep.subr.bf16.mxu0 %v3661_v63 }
 0x948   :  { %3630 = vmatpush3.bf16.msra.mxu0 %v3662_v52 }
 0x949   :  { %3631 = vmatprep.subr.bf16.mxu0 %v3663_v43 }
 0x94c   :  { %3632 = vmatpush3.bf16.msra.mxu0 %v3664_v6 }
 0x94d   :  { %3633 = vmatprep.subr.bf16.mxu0 %v3665_v7 }
 0x950   :  { %3634 = vmatpush3.bf16.msra.mxu0 %v3666_v37 }
 0x951   :  { %3635 = vmatprep.subr.bf16.mxu0 %v3667_v54 }
 0x954   :  { %3636 = vmatpush3.bf16.msra.mxu0 %v3668_v35 }
 0x955   :  { %3637 = vmatprep.subr.bf16.mxu0 %v3669_v15 }
 0x958   :  { %3638 = vmatpush3.bf16.msra.mxu0 %v3670_v10 }
 0x959   :  { %3639 = vmatprep.subr.bf16.mxu0 %v3671_v47 }
 0x95c   :  { %3640 = vmatpush3.bf16.msra.mxu0 %v3672_v61 }
 0x95d   :  { %3641 = vmatprep.subr.bf16.mxu0 %v3673_v62 }
 0x960   :  { %3642 = vmatpush3.bf16.msra.mxu0 %v3674_v20 }
 0x9d6   :  { %v3015_v51 = vpop.f32.mrb[80].mxu0  ;;  %v3056_v42 = vpop.f32.mrb[96].mxu1 }
 0x9d7   :  { %v3145_v32 = vadd.f32 %v3015_v51, %v7280_v30  ;;  %v3147_v49 = vadd.f32 %v3056_v42, %v7281_v21  ;;  %v3017_v60 = vpop.f32.mrb[81].mxu0  ;;  %v3058_v8 = vpop.f32.mrb[97].mxu1 }
 0x9d8   :  { %v3146_v16 = vadd.f32 %v3017_v60, %v7282_v40  ;;  %v3148_v44 = vadd.f32 %v3058_v8, %v7283_v41  ;;  %v3019_v23 = vpop.f32.mrb[82].mxu0  ;;  %v3060_v50 = vpop.f32.mrb[98].mxu1 }
 0x9d9   :  { %v3020_v55 = vpop.f32.mrb[83].mxu0  ;;  %v3061_v9 = vpop.f32.mrb[99].mxu1  ;;  %v3604_v12 = vmul.f32 -1.442695, %v3145_v32  ;;  %v3606_v25 = vmul.f32 -1.442695, %v3147_v49 }
 0x9da   :  { %v3605_v39 = vmul.f32 -1.442695, %v3146_v16  ;;  %v3607_v3 = vmul.f32 -1.442695, %v3148_v44  ;;  %v3610_v16 = vld [vmem:[%s6216_s5] ss:$0 sm:$0xff] }
 0x9db   :  { %3899 = vpow2.f32 %v3604_v12 }
 0x9dc   :  { %3901 = vpow2.f32 %v3606_v25 }
 0x9dd   :  { %3903 = vpow2.f32 %v3605_v39 }
 0x9de   :  { %3905 = vpow2.f32 %v3607_v3 }
 0x9e5   :  { %v3900_v22 = vpop.eup %3899 }
 0x9e6   :  { %v3902_v17 = vpop.eup %3901  ;;  %v3159_v13 = vadd.f32 1.0, %v3900_v22 }
 0x9e7   :  { %v3904_v34 = vpop.eup %3903  ;;  %v3171_v59 = vadd.f32 1.0, %v3902_v17 }
 0x9e8   :  { %v3906_v56 = vpop.eup %3905  ;;  %v3160_v14 = vadd.f32 1.0, %v3904_v34  ;;  %3907 = vrcp.f32 %v3159_v13 }
 0x9e9   :  { %v3172_v4 = vadd.f32 1.0, %v3906_v56  ;;  %3909 = vrcp.f32 %v3171_v59 }
 0x9ea   :  { %3911 = vrcp.f32 %v3160_v14 }
 0x9eb   :  { %3913 = vrcp.f32 %v3172_v4 }
 0x9f2   :  { %v3908_v0 = vpop.eup %3907 }
 0x9f3   :  { %v3910_v5 = vpop.eup %3909 }
 0x9f4   :  { %v3912_v63 = vpop.eup %3911  ;;  %v3191_v7 = vmul.f32 %v3910_v5, %v6073_v28 }
 0x9f5   :  { %v3914_v52 = vpop.eup %3913 }
 0x9f6   :  { %v3192_v35 = vmul.f32 %v3914_v52, %v6075_v38 }
 0xa16   :  { %v3097_v53 = vpop.f32.mrb[84].mxu0  ;;  %v3138_v45 = vpop.f32.mrb[100].mxu1 }
 0xa17   :  { %v3149_v46 = vadd.f32 %v3097_v53, %v7284_v29  ;;  %v3151_v26 = vadd.f32 %v3138_v45, %v7285_v36  ;;  %v3099_v31 = vpop.f32.mrb[85].mxu0  ;;  %v3140_v33 = vpop.f32.mrb[101].mxu1 }
 0xa18   :  { %v3150_v2 = vadd.f32 %v3099_v31, %v7286_v57  ;;  %v3152_v27 = vadd.f32 %v3140_v33, %v7287_v11  ;;  %v3101_v24 = vpop.f32.mrb[86].mxu0  ;;  %v3142_v19 = vpop.f32.mrb[102].mxu1 }
 0xa19   :  { %3915 = vtanh.f32 %v3149_v46  ;;  %v3608_v48 = vmul.f32 -1.442695, %v3151_v26  ;;  %v3102_v58 = vpop.f32.mrb[87].mxu0  ;;  %v3143_v1 = vpop.f32.mrb[103].mxu1 }
 0xa1a   :  { %3917 = vtanh.f32 %v3150_v2  ;;  %v3609_v18 = vmul.f32 -1.442695, %v3152_v27 }
 0xa1b   :  { %3919 = vpow2.f32 %v3608_v48 }
 0xa1c   :  { %3921 = vpow2.f32 %v3609_v18 }
 0xa23   :  { %v3916_v43 = vpop.eup %3915 }
 0xa24   :  { %v3918_v6 = vpop.eup %3917  ;;  %v3193_v37 = vmul.f32 %v3916_v43, %v3908_v0 }
 0xa25   :  { %v3920_v54 = vpop.eup %3919  ;;  %v3194_v15 = vmul.f32 %v3918_v6, %v3912_v63 }
 0xa26   :  { %v3922_v10 = vpop.eup %3921  ;;  %v3195_v47 = vadd.f32 %v3193_v37, %v3191_v7  ;;  %v3185_v61 = vadd.f32 1.0, %v3920_v54 }
 0xa27   :  { %v3196_v62 = vadd.f32 %v3194_v15, %v3192_v35  ;;  %v3186_v20 = vadd.f32 1.0, %v3922_v10 }
 0xa28   :  { %3923 = vtanh.f32 %v3195_v47 }
 0xa29   :  { %3925 = vrcp.f32 %v3185_v61 }
 0xa2a   :  { %3927 = vtanh.f32 %v3196_v62 }
 0xa2b   :  { %3929 = vrcp.f32 %v3186_v20 }
 0xa32   :  { %v3924_v51 = vpop.eup %3923 }
 0xa33   :  { %v3926_v42 = vpop.eup %3925 }
 0xa34   :  { %v3928_v30 = vpop.eup %3927  ;;  %v3199_v32 = vmul.f32 %v3926_v42, %v3924_v51 }
 0xa35   :  { %v3930_v21 = vpop.eup %3929 }
 0xa36   :  { %v3200_v28 = vmul.f32 %v3930_v21, %v3928_v30  ;;  %v3208_v49 = vmax.f32 %v3199_v32, 0.0 }
 0xa38   :  { %v3209_v60 = vmax.f32 %v3200_v28, 0.0  ;;  %v3210_v38 = vpack.c.bf16 %v3208_v49, %v3208_v49 }
 0xa3a   :  { %v3211_v8 = vpack.c.bf16 %v3209_v60, %v3209_v60 }
 0xa3c   :  { %3379 = vmatprep.mubr.bf16.mxu0 %v3211_v8 }
 0xa3d   :  { %3380 = vmatmul.mubr.bf16.vlgmr.msra.gmra.mrb[88].mxu0 %v3210_v38 }
 0xb10   :  { %v3643_v40 = vpop.f32.mrb[88].mxu0 }
 0xb11   :  { %v3644_v41 = vpop.f32.mrb[89].mxu0 }
 0xb12   :  { %v3645_v44 = vadd.f32 %v3644_v41, %v3643_v40  ;;  %v3646_v23 = vpop.f32.mrb[90].mxu0 }
 0xb13   :  { %v3647_v50 = vpop.f32.mrb[91].mxu0 }
 0xb14   :  { %v3382_v55 = vadd.f32 %v3645_v44, %v3610_v16 }
 0xb16   :  { %3387 = vst [vmem:[%s6217_s6] sm:$0xff] %v3382_v55 }

</bundles_post_ra>
